<compile_context>
chip_gen: v7x
topology: tpu7x:2x2x1
jax: 0.10.0
libtpu: 0.0.40
codegen_flags: <defaults>
</compile_context>

<pallas_src>
import numpy as np

import jax
import jax.numpy as jnp
from jax.experimental import pallas as pl
from jax.experimental.pallas import tpu as pltpu

BN_EPS = 1e-5
_INV_SQRT2 = 0.7071067811865476


def _gelu_exact(y):
    return 0.5 * y * (1.0 + jax.lax.erf(y * _INV_SQRT2))


# ---------------------------------------------------------------------------
# Kernels
# ---------------------------------------------------------------------------
def proj_stats_kernel(x_ref, u_ref, w_ref, o_ref, st_ref):
    # x_ref/u_ref: (1, TH, W, Cin)   w_ref: (2*Cin, Cout) in mxu dtype
    # o_ref: (1, TH, W, Cout) raw (pre-BN) 1x1 conv output tile (f32)
    # st_ref: (1, 1, 2, Cout) per-tile partial [sum, sum_sq] (f32)
    _, TH, W, Cin = x_ref.shape
    Cout = o_ref.shape[-1]
    x = x_ref[...].reshape(TH * W, Cin).astype(w_ref.dtype)
    u = u_ref[...].reshape(TH * W, Cin).astype(w_ref.dtype)
    xu = jnp.concatenate([x, u], axis=-1)            # lane-axis concat in VMEM
    # cat([x, u], channel) @ W as a single K=2*Cin MXU matmul, f32 accumulation.
    y = jnp.dot(xu, w_ref[...], preferred_element_type=jnp.float32)
    # NOTE: conv bias omitted — cancelled exactly by the BN batch-mean subtraction.
    o_ref[...] = y.reshape(1, TH, W, Cout)
    st_ref[:, :, 0:1, :] = jnp.sum(y, axis=0, keepdims=True).reshape(1, 1, 1, Cout)
    st_ref[:, :, 1:2, :] = jnp.sum(y * y, axis=0, keepdims=True).reshape(1, 1, 1, Cout)


def conv3x3_fused_kernel(top_ref, mid_ref, bot_ref, sc_ref, sh_ref, w_ref,
                         o_ref, st_ref, xa_ref, patch_ref):
    # top_ref/bot_ref: (1, 1, W, Cin) halo rows of the previous stage's raw output
    # mid_ref        : (1, TH, W, Cin) tile rows of the previous stage's raw output
    # sc_ref/sh_ref  : (1, Cin) folded BN scale/shift of the previous stage
    # w_ref          : (9*Cin, Cout) HWIO weight flattened, in mxu dtype
    # o_ref          : (1, TH, W, Cout) raw conv output tile (f32)
    # st_ref         : (1, 1, 2, Cout) per-tile partial [sum, sum_sq] (f32)
    # xa_ref         : (TH+2, W+2, Cin) activated + halo window (f32)
    # patch_ref      : (TH*W, 9*Cin) im2col slab (mxu dtype)
    t = pl.program_id(1)
    nt = pl.num_programs(1)
    _, TH, W, Cin = mid_ref.shape
    Cout = o_ref.shape[-1]

    scale = sc_ref[0]            # (Cin,)
    shift = sh_ref[0]            # (Cin,)

    def act(v):                  # previous-stage BN (folded) + exact-erf GELU
        return _gelu_exact(v * scale + shift)

    # Halo columns are always zero (image border along W); nothing else is
    # zero-filled except the border halo rows below.
    xa_ref[:, 0:1, :] = jnp.zeros((TH + 2, 1, Cin), jnp.float32)
    xa_ref[:, W + 1:W + 2, :] = jnp.zeros((TH + 2, 1, Cin), jnp.float32)

    # Interior rows: activate the previous stage's raw tile.
    xa_ref[1:TH + 1, 1:W + 1, :] = act(mid_ref[0])

    # Top halo row: real activated row inside the image, zeros at the border.
    @pl.when(t > 0)
    def _():
        xa_ref[0:1, 1:W + 1, :] = act(top_ref[0])

    @pl.when(t == 0)
    def _():
        xa_ref[0:1, 1:W + 1, :] = jnp.zeros((1, W, Cin), jnp.float32)

    # Bottom halo row.
    @pl.when(t < nt - 1)
    def _():
        xa_ref[TH + 1:TH + 2, 1:W + 1, :] = act(bot_ref[0])

    @pl.when(t == nt - 1)
    def _():
        xa_ref[TH + 1:TH + 2, 1:W + 1, :] = jnp.zeros((1, W, Cin), jnp.float32)

    # im2col: build one (TH*W, 9*Cin) slab, then a single K=9*Cin MXU matmul
    # (value result — no VMEM accumulator round trips).
    for kh in range(3):
        for kw in range(3):
            tap = kh * 3 + kw
            patch_ref[:, tap * Cin:(tap + 1) * Cin] = (
                xa_ref[kh:kh + TH, kw:kw + W, :]
                .reshape(TH * W, Cin).astype(patch_ref.dtype))

    y = jnp.dot(patch_ref[...], w_ref[...], preferred_element_type=jnp.float32)
    # NOTE: conv bias omitted — cancelled exactly by the BN batch-mean subtraction.
    o_ref[...] = y.reshape(1, TH, W, Cout)
    st_ref[:, :, 0:1, :] = jnp.sum(y, axis=0, keepdims=True).reshape(1, 1, 1, Cout)
    st_ref[:, :, 1:2, :] = jnp.sum(y * y, axis=0, keepdims=True).reshape(1, 1, 1, Cout)


def norm_gelu_kernel(x_ref, sc_ref, sh_ref, o_ref):
    # Final stage only: tiled normalize (folded scale/shift) + exact GELU.
    o_ref[...] = _gelu_exact(x_ref[...] * sc_ref[0] + sh_ref[0])


# ---------------------------------------------------------------------------
# pallas_call wrappers
# ---------------------------------------------------------------------------
def _vmem_limit_bytes():
    # Generation-aware scoped-VMEM budget: ~3/4 of physical, capped at 96 MiB
    # (v5e/v6e: 128 MiB physical -> 96 MiB; v7x: 64 MiB -> 48 MiB).
    try:
        cap = int(pltpu.get_tpu_info().vmem_capacity_bytes)
    except Exception:
        cap = 64 * 1024 * 1024
    return max(min(cap * 3 // 4, 96 * 1024 * 1024), 32 * 1024 * 1024)


def _compiler_params(vmem_limit):
    return pltpu.CompilerParams(
        dimension_semantics=("parallel", "parallel"),
        vmem_limit_bytes=int(vmem_limit))


def proj_conv1x1(x, u, w, tile_h, vmem_limit):
    N, H, W, Cin = x.shape
    Cout = w.shape[1]
    HT = H // tile_h
    cost = pl.CostEstimate(
        flops=int(2 * N * H * W * 2 * Cin * Cout),
        transcendentals=0,
        bytes_accessed=int(4 * (2 * N * H * W * Cin + N * H * W * Cout
                                + N * HT * 2 * Cout) + 2 * Cin * Cout * w.dtype.itemsize))
    return pl.pallas_call(
        proj_stats_kernel,
        out_shape=(jax.ShapeDtypeStruct((N, H, W, Cout), jnp.float32),
                   jax.ShapeDtypeStruct((N, HT, 2, Cout), jnp.float32)),
        grid=(N, HT),
        in_specs=[
            pl.BlockSpec((1, tile_h, W, Cin), lambda n, t: (n, t, 0, 0)),
            pl.BlockSpec((1, tile_h, W, Cin), lambda n, t: (n, t, 0, 0)),
            pl.BlockSpec((2 * Cin, Cout), lambda n, t: (0, 0)),
        ],
        out_specs=(
            pl.BlockSpec((1, tile_h, W, Cout), lambda n, t: (n, t, 0, 0)),
            pl.BlockSpec((1, 1, 2, Cout), lambda n, t: (n, t, 0, 0)),
        ),
        compiler_params=_compiler_params(vmem_limit),
        cost_estimate=cost,
    )(x, u, w)


def conv3x3_fused(h_raw, scale, shift, w9, tile_h, vmem_limit):
    N, H, W, Cin = h_raw.shape
    Cout = w9.shape[-1]
    HT = H // tile_h
    mxu_bytes = np.dtype(w9.dtype).itemsize

    # Tile + 1-row halo fetch: three views of the same HBM array.  Block size 1
    # along H means the index map returns the row index directly (clamped at the
    # image border; the border row is masked to zero inside the kernel).
    top_map = lambda n, t: (n, jnp.maximum(t * tile_h - 1, 0), 0, 0)
    bot_map = lambda n, t: (n, jnp.minimum((t + 1) * tile_h, H - 1), 0, 0)

    cost = pl.CostEstimate(
        flops=int(2 * 9 * N * H * W * Cin * Cout),
        transcendentals=int(N * (H + 2 * HT) * W * Cin),
        bytes_accessed=int(4 * (N * (H + 2 * HT) * W * Cin + N * H * W * Cout
                                + N * HT * 2 * Cout) + 9 * Cin * Cout * mxu_bytes))
    return pl.pallas_call(
        conv3x3_fused_kernel,
        out_shape=(jax.ShapeDtypeStruct((N, H, W, Cout), jnp.float32),
                   jax.ShapeDtypeStruct((N, HT, 2, Cout), jnp.float32)),
        grid=(N, HT),
        in_specs=[
            pl.BlockSpec((1, 1, W, Cin), top_map),
            pl.BlockSpec((1, tile_h, W, Cin), lambda n, t: (n, t, 0, 0)),
            pl.BlockSpec((1, 1, W, Cin), bot_map),
            pl.BlockSpec((1, Cin), lambda n, t: (0, 0)),
            pl.BlockSpec((1, Cin), lambda n, t: (0, 0)),
            pl.BlockSpec((9 * Cin, Cout), lambda n, t: (0, 0)),
        ],
        out_specs=(
            pl.BlockSpec((1, tile_h, W, Cout), lambda n, t: (n, t, 0, 0)),
            pl.BlockSpec((1, 1, 2, Cout), lambda n, t: (n, t, 0, 0)),
        ),
        scratch_shapes=[
            pltpu.VMEM((tile_h + 2, W + 2, Cin), jnp.float32),   # activated + halo window
            pltpu.VMEM((tile_h * W, 9 * Cin), w9.dtype),         # im2col slab
        ],
        compiler_params=_compiler_params(vmem_limit),
        cost_estimate=cost,
    )(h_raw, h_raw, h_raw, scale, shift, w9)


def norm_gelu(h_raw, scale, shift, tile_h, vmem_limit):
    N, H, W, C = h_raw.shape
    cost = pl.CostEstimate(
        flops=int(4 * N * H * W * C),
        transcendentals=int(N * H * W * C),
        bytes_accessed=int(4 * 2 * N * H * W * C))
    return pl.pallas_call(
        norm_gelu_kernel,
        out_shape=jax.ShapeDtypeStruct((N, H, W, C), jnp.float32),
        grid=(N, H // tile_h),
        in_specs=[
            pl.BlockSpec((1, tile_h, W, C), lambda n, t: (n, t, 0, 0)),
            pl.BlockSpec((1, C), lambda n, t: (0, 0)),
            pl.BlockSpec((1, C), lambda n, t: (0, 0)),
        ],
        out_specs=pl.BlockSpec((1, tile_h, W, C), lambda n, t: (n, t, 0, 0)),
        compiler_params=_compiler_params(vmem_limit),
        cost_estimate=cost,
    )(h_raw, scale, shift)


# ---------------------------------------------------------------------------
# BN statistics -> folded per-channel scale / shift (tiny XLA ops on (C,) vectors)
# ---------------------------------------------------------------------------
def _stats_to_scale_shift(stats, gamma, beta, count):
    tot = jnp.sum(stats, axis=(0, 1))                       # (2, C), f32
    mean = tot[0] / count
    var = jnp.maximum(tot[1] / count - mean * mean, 0.0)    # biased (training-mode) var
    scale = gamma.reshape(-1) * jax.lax.rsqrt(var + BN_EPS)
    shift = beta.reshape(-1) - mean * scale
    return (scale.reshape(1, -1).astype(jnp.float32),
            shift.reshape(1, -1).astype(jnp.float32))


def _pick_tile_h(H, W, cin, cout, mxu_bytes, vmem_limit):
    # Largest divisor of H whose per-grid-step VMEM working set (double-buffered
    # input/output blocks + halo scratch + im2col scratch + weights) fits well
    # inside the scoped budget.  Lane dims are rounded to 128, sublanes to 8.
    def rup(v, m):
        return ((v + m - 1) // m) * m

    budget = int(vmem_limit * 0.6)
    w_p = rup(W, 8)
    w_halo = rup(W + 2, 8)
    cin_b = rup(cin, 128) * 4
    cout_b = rup(cout, 128) * 4
    k_b = rup(9 * cin, 128) * mxu_bytes
    best = 1
    for th in range(1, H + 1):
        if H % th:
            continue
        step = (2 * (th + 2) * w_p * cin_b          # double-buffered h blocks (tile + 2 halo rows)
                + 2 * th * w_p * cout_b             # double-buffered raw conv output block
                + (th + 2) * w_halo * cin_b         # activated halo scratch
                + th * w_p * k_b                    # im2col patch scratch
                + 2 * 9 * cin * rup(cout, 128) * mxu_bytes)  # weights (double-buffered)
        if step <= budget:
            best = th
    return best


# ---------------------------------------------------------------------------
# Up2 forward
# ---------------------------------------------------------------------------
def up2_forward(x_nchw, u_nchw, p, tile_h=None, mxu_dtype=jnp.bfloat16):
    # NCHW -> NHWC (lane-friendly channels-last)
    x = jnp.transpose(x_nchw, (0, 2, 3, 1)).astype(jnp.float32)
    u = jnp.transpose(u_nchw, (0, 2, 3, 1)).astype(jnp.float32)
    N, H, W, Cin = x.shape
    Cmid = p["proj_w"].shape[1]
    Cout = p["conv2_w"].shape[-1]
    assert p["proj_w"].shape[0] == 2 * Cin

    vmem_limit = _vmem_limit_bytes()
    mxu_bytes = np.dtype(mxu_dtype).itemsize
    if tile_h is None:
        tile_h = _pick_tile_h(H, W, max(2 * Cin, Cmid), max(Cmid, Cout),
                              mxu_bytes, vmem_limit)
    assert H % tile_h == 0, (H, tile_h)

    # Weights in MXU dtype; 3x3 weights flattened HWIO -> (9*Cin, Cout) for im2col.
    w_proj = p["proj_w"].astype(mxu_dtype)                       # (2*Cin, Cmid)
    w1 = p["conv1_w"].reshape(9 * Cmid, Cmid).astype(mxu_dtype)
    w2 = p["conv2_w"].reshape(9 * Cmid, Cout).astype(mxu_dtype)
    count = N * H * W

    # stage 1: 1x1 projection (raw, f32) + batch stats
    h1, st1 = proj_conv1x1(x, u, w_proj, tile_h, vmem_limit)
    sc1, sh1 = _stats_to_scale_shift(st1, p["proj_gamma"], p["proj_beta"], count)

    # stage 2: [BN1+GELU fused in prologue] -> 3x3 conv (raw) + batch stats
    h2, st2 = conv3x3_fused(h1, sc1, sh1, w1, tile_h, vmem_limit)
    sc2, sh2 = _stats_to_scale_shift(st2, p["conv1_gamma"], p["conv1_beta"], count)

    # stage 3: [BN2+GELU fused in prologue] -> 3x3 conv (raw) + batch stats
    h3, st3 = conv3x3_fused(h2, sc2, sh2, w2, tile_h, vmem_limit)
    sc3, sh3 = _stats_to_scale_shift(st3, p["conv2_gamma"], p["conv2_beta"], count)

    # final BN3 + GELU (tiled); NHWC -> NCHW left to XLA (could be fused into the
    # kernel when tile_h is a multiple of 8, or skipped if the consumer takes NHWC).
    out = norm_gelu(h3, sc3, sh3, tile_h, vmem_limit)
    return jnp.transpose(out, (0, 3, 1, 2))


# ---------------------------------------------------------------------------
# Pure-JAX reference (matches the PyTorch module, including conv biases)
# ---------------------------------------------------------------------------
def ref_up2(x_nchw, u_nchw, p):
    x = jnp.transpose(x_nchw, (0, 2, 3, 1))
    u = jnp.transpose(u_nchw, (0, 2, 3, 1))
    cat = jnp.concatenate([x, u], axis=-1)

    def bn_g(y, gamma, beta):
        mean = jnp.mean(y, axis=(0, 1, 2), keepdims=True)
        var = jnp.mean((y - mean) ** 2, axis=(0, 1, 2), keepdims=True)
        yn = (y - mean) * jax.lax.rsqrt(var + BN_EPS)
        yn = yn * gamma.reshape(1, 1, 1, -1) + beta.reshape(1, 1, 1, -1)
        return jax.nn.gelu(yn, approximate=False)

    def c3(y, w, b):
        o = jax.lax.conv_general_dilated(
            y, w, (1, 1), "SAME", dimension_numbers=("NHWC", "HWIO", "NHWC"))
        return o + b.reshape(1, 1, 1, -1)

    h = cat @ p["proj_w"] + p["proj_b"].reshape(1, 1, 1, -1)
    h = bn_g(h, p["proj_gamma"], p["proj_beta"])
    h = bn_g(c3(h, p["conv1_w"], p["conv1_b"]), p["conv1_gamma"], p["conv1_beta"])
    h = bn_g(c3(h, p["conv2_w"], p["conv2_b"]), p["conv2_gamma"], p["conv2_beta"])
    return jnp.transpose(h, (0, 3, 1, 2))


def init_params(key, cin, cout):
    ks = jax.random.split(key, 12)

    def nrm(k, shape, s=0.2):
        return (s * jax.random.normal(k, shape)).astype(jnp.float32)

    return {
        # proj: Conv1x1(2*cin -> cin)
        "proj_w": nrm(ks[0], (2 * cin, cin)),
        "proj_b": nrm(ks[1], (1, cin)),
        "proj_gamma": (1.0 + nrm(ks[2], (1, cin))).astype(jnp.float32),
        "proj_beta": nrm(ks[3], (1, cin), 0.05),
        # conv1: Conv3x3(cin -> cin), weights in HWIO
        "conv1_w": nrm(ks[4], (3, 3, cin, cin)),
        "conv1_b": nrm(ks[5], (1, cin)),
        "conv1_gamma": (1.0 + nrm(ks[6], (1, cin))).astype(jnp.float32),
        "conv1_beta": nrm(ks[7], (1, cin), 0.05),
        # conv2: Conv3x3(cin -> cout)
        "conv2_w": nrm(ks[8], (3, 3, cin, cout)),
        "conv2_b": nrm(ks[9], (1, cout)),
        "conv2_gamma": (1.0 + nrm(ks[10], (1, cout))).astype(jnp.float32),
        "conv2_beta": nrm(ks[11], (1, cout), 0.05),
    }


if __name__ == "__main__":
    N, CIN, COUT, H, W = 2, 4, 8, 16, 16
    key = jax.random.PRNGKey(0)
    kx, ku, kp = jax.random.split(key, 3)
    x = jax.random.normal(kx, (N, CIN, H, W), dtype=jnp.float32)
    u = jax.random.normal(ku, (N, CIN, H, W), dtype=jnp.float32)
    params = init_params(kp, CIN, COUT)

    ref = jax.block_until_ready(ref_up2(x, u, params))

    # 1) f32 MXU path, tile_h=4 forces 4 row tiles (exercises interior + border
    #    halo branches); tight numerical check against the PyTorch-style reference.
    fwd_f32 = jax.jit(
        lambda a, b, p: up2_forward(a, b, p, tile_h=4, mxu_dtype=jnp.float32))
    out = jax.block_until_ready(fwd_f32(x, u, params))
    assert out.shape == (N, COUT, H, W), out.shape
    err = float(jnp.max(jnp.abs(out - ref)))
    assert err < 1e-3, ("f32 path", err)

    # 2) bf16 MXU path (perf default) with auto-picked tile size; looser check —
    #    bf16 operand rounding passes through three batch-norm re-normalizations.
    fwd_bf16 = jax.jit(lambda a, b, p: up2_forward(a, b, p, mxu_dtype=jnp.bfloat16))
    out16 = jax.block_until_ready(fwd_bf16(x, u, params))
    err16 = float(jnp.max(jnp.abs(out16 - ref)))
    assert err16 < 1e-1, ("bf16 path", err16)

    print("KERNEL_OK")
</pallas_src>

<mosaic_0001>
module attributes {stable_mosaic.version = 11 : i64} {
  func.func @proj_stats_kernel(%arg0: i32, %arg1: i32, %arg2: memref<1x4x16x4xf32, #tpu.memory_space<vmem>>, %arg3: memref<1x4x16x4xf32, #tpu.memory_space<vmem>>, %arg4: memref<8x4xf32, #tpu.memory_space<vmem>>, %arg5: memref<1x4x16x4xf32, #tpu.memory_space<vmem>>, %arg6: memref<1x1x2x4xf32, #tpu.memory_space<vmem>>) attributes {dimension_semantics = [#tpu.dimension_semantics<parallel>, #tpu.dimension_semantics<parallel>], iteration_bounds = array<i64: 2, 4>, scalar_prefetch = 0 : i64, scratch_operands = 0 : i64, tpu.core_type = #tpu.core_type<tc>, window_params = [{transform_indices = @transform_0, window_bounds = array<i64: 1, 4, 16, 4>}, {transform_indices = @transform_1, window_bounds = array<i64: 1, 4, 16, 4>}, {pipeline_mode = #tpu.pipeline_mode<synchronous>, transform_indices = @transform_2, window_bounds = array<i64: 8, 4>}, {transform_indices = @transform_3, window_bounds = array<i64: 1, 4, 16, 4>}, {transform_indices = @transform_4, window_bounds = array<i64: 1, 1, 2, 4>}]} {
    %c0 = arith.constant 0 : index
    %c0_0 = arith.constant 0 : index
    %c0_1 = arith.constant 0 : index
    %c0_2 = arith.constant 0 : index
    %0 = vector.load %arg2[%c0, %c0_0, %c0_1, %c0_2] : memref<1x4x16x4xf32, #tpu.memory_space<vmem>>, vector<1x4x16x4xf32>
    %1 = vector.shape_cast %0 : vector<1x4x16x4xf32> to vector<64x4xf32>
    %c0_3 = arith.constant 0 : index
    %c0_4 = arith.constant 0 : index
    %c0_5 = arith.constant 0 : index
    %c0_6 = arith.constant 0 : index
    %2 = vector.load %arg3[%c0_3, %c0_4, %c0_5, %c0_6] : memref<1x4x16x4xf32, #tpu.memory_space<vmem>>, vector<1x4x16x4xf32>
    %3 = vector.shape_cast %2 : vector<1x4x16x4xf32> to vector<64x4xf32>
    %4 = tpu.concatenate %1, %3 in 1 : vector<64x4xf32>, vector<64x4xf32> -> vector<64x8xf32>
    %c0_7 = arith.constant 0 : index
    %c0_8 = arith.constant 0 : index
    %5 = vector.load %arg4[%c0_7, %c0_8] : memref<8x4xf32, #tpu.memory_space<vmem>>, vector<8x4xf32>
    %cst = arith.constant dense<0.000000e+00> : vector<64x4xf32>
    %6 = tpu.matmul %4, %5, %cst {dimension_numbers = #tpu.dot_dimension_numbers<[1], [0], [0], [1], [0, 0, 1, 1], [], []>} : vector<64x8xf32>, vector<8x4xf32>, vector<64x4xf32> -> vector<64x4xf32>
    %7 = vector.shape_cast %6 : vector<64x4xf32> to vector<1x4x16x4xf32>
    %c0_9 = arith.constant 0 : index
    %c0_10 = arith.constant 0 : index
    %c0_11 = arith.constant 0 : index
    %c0_12 = arith.constant 0 : index
    %8 = vector.load %arg5[%c0_9, %c0_10, %c0_11, %c0_12] : memref<1x4x16x4xf32, #tpu.memory_space<vmem>>, vector<1x4x16x4xf32>
    tpu.vector_store %arg5[%c0_9, %c0_10, %c0_11, %c0_12], %7 {strides = array<i32>} : memref<1x4x16x4xf32, #tpu.memory_space<vmem>>, vector<1x4x16x4xf32>,
    %cst_13 = arith.constant dense<0.000000e+00> : vector<4xf32>
    %9 = vector.multi_reduction <add>, %6, %cst_13 [0] : vector<64x4xf32> to vector<4xf32>
    %10 = vector.shape_cast %9 : vector<4xf32> to vector<1x4xf32>
    %11 = vector.shape_cast %10 : vector<1x4xf32> to vector<1x1x1x4xf32>
    %c0_14 = arith.constant 0 : index
    %c0_15 = arith.constant 0 : index
    %c0_16 = arith.constant 0 : index
    %c0_17 = arith.constant 0 : index
    %12 = vector.load %arg6[%c0_14, %c0_15, %c0_16, %c0_17] : memref<1x1x2x4xf32, #tpu.memory_space<vmem>>, vector<1x1x1x4xf32>
    tpu.vector_store %arg6[%c0_14, %c0_15, %c0_16, %c0_17], %11 {strides = array<i32>} : memref<1x1x2x4xf32, #tpu.memory_space<vmem>>, vector<1x1x1x4xf32>,
    %13 = arith.mulf %6, %6 : vector<64x4xf32>
    %cst_18 = arith.constant dense<0.000000e+00> : vector<4xf32>
    %14 = vector.multi_reduction <add>, %13, %cst_18 [0] : vector<64x4xf32> to vector<4xf32>
    %15 = vector.shape_cast %14 : vector<4xf32> to vector<1x4xf32>
    %16 = vector.shape_cast %15 : vector<1x4xf32> to vector<1x1x1x4xf32>
    %c0_19 = arith.constant 0 : index
    %c0_20 = arith.constant 0 : index
    %c1 = arith.constant 1 : index
    %c0_21 = arith.constant 0 : index
    %17 = vector.load %arg6[%c0_19, %c0_20, %c1, %c0_21] : memref<1x1x2x4xf32, #tpu.memory_space<vmem>>, vector<1x1x1x4xf32>
    tpu.vector_store %arg6[%c0_19, %c0_20, %c1, %c0_21], %16 {strides = array<i32>} : memref<1x1x2x4xf32, #tpu.memory_space<vmem>>, vector<1x1x1x4xf32>,
    return
  }
  func.func @transform_0(%arg0: i32, %arg1: i32) -> (i32, i32, i32, i32) {
    %c0_i32 = arith.constant 0 : i32
    %c0_i32_0 = arith.constant 0 : i32
    %c0_i32_1 = arith.constant 0 : i32
    return %arg0, %arg1, %c0_i32, %c0_i32_0 : i32, i32, i32, i32
  }
  func.func @transform_1(%arg0: i32, %arg1: i32) -> (i32, i32, i32, i32) {
    %c0_i32 = arith.constant 0 : i32
    %c0_i32_0 = arith.constant 0 : i32
    %c0_i32_1 = arith.constant 0 : i32
    return %arg0, %arg1, %c0_i32, %c0_i32_0 : i32, i32, i32, i32
  }
  func.func @transform_2(%arg0: i32, %arg1: i32) -> (i32, i32) {
    %c0_i32 = arith.constant 0 : i32
    %c0_i32_0 = arith.constant 0 : i32
    %c0_i32_1 = arith.constant 0 : i32
    return %c0_i32, %c0_i32_0 : i32, i32
  }
  func.func @transform_3(%arg0: i32, %arg1: i32) -> (i32, i32, i32, i32) {
    %c0_i32 = arith.constant 0 : i32
    %c0_i32_0 = arith.constant 0 : i32
    %c0_i32_1 = arith.constant 0 : i32
    return %arg0, %arg1, %c0_i32, %c0_i32_0 : i32, i32, i32, i32
  }
  func.func @transform_4(%arg0: i32, %arg1: i32) -> (i32, i32, i32, i32) {
    %c0_i32 = arith.constant 0 : i32
    %c0_i32_0 = arith.constant 0 : i32
    %c0_i32_1 = arith.constant 0 : i32
    return %arg0, %arg1, %c0_i32, %c0_i32_0 : i32, i32, i32, i32
  }
}

module attributes {stable_mosaic.version = 11 : i64} {
  func.func @conv3x3_fused_kernel(%arg0: i32, %arg1: i32, %arg2: memref<1x1x16x4xf32, #tpu.memory_space<vmem>>, %arg3: memref<1x4x16x4xf32, #tpu.memory_space<vmem>>, %arg4: memref<1x1x16x4xf32, #tpu.memory_space<vmem>>, %arg5: memref<1x4xf32, #tpu.memory_space<vmem>>, %arg6: memref<1x4xf32, #tpu.memory_space<vmem>>, %arg7: memref<36x4xf32, #tpu.memory_space<vmem>>, %arg8: memref<1x4x16x4xf32, #tpu.memory_space<vmem>>, %arg9: memref<1x1x2x4xf32, #tpu.memory_space<vmem>>, %arg10: memref<6x18x4xf32, #tpu.memory_space<vmem>>, %arg11: memref<64x36xf32, #tpu.memory_space<vmem>>) attributes {dimension_semantics = [#tpu.dimension_semantics<parallel>, #tpu.dimension_semantics<parallel>], iteration_bounds = array<i64: 2, 4>, scalar_prefetch = 0 : i64, scratch_operands = 2 : i64, tpu.core_type = #tpu.core_type<tc>, window_params = [{transform_indices = @transform_0, window_bounds = array<i64: 1, 1, 16, 4>}, {transform_indices = @transform_1, window_bounds = array<i64: 1, 4, 16, 4>}, {transform_indices = @transform_2, window_bounds = array<i64: 1, 1, 16, 4>}, {pipeline_mode = #tpu.pipeline_mode<synchronous>, transform_indices = @transform_3, window_bounds = array<i64: 1, 4>}, {pipeline_mode = #tpu.pipeline_mode<synchronous>, transform_indices = @transform_4, window_bounds = array<i64: 1, 4>}, {pipeline_mode = #tpu.pipeline_mode<synchronous>, transform_indices = @transform_5, window_bounds = array<i64: 36, 4>}, {transform_indices = @transform_6, window_bounds = array<i64: 1, 4, 16, 4>}, {transform_indices = @transform_7, window_bounds = array<i64: 1, 1, 2, 4>}]} {
    %c0 = arith.constant 0 : index
    %c0_0 = arith.constant 0 : index
    %0 = vector.load %arg5[%c0, %c0_0] : memref<1x4xf32, #tpu.memory_space<vmem>>, vector<1x4xf32>
    %1 = vector.shape_cast %0 : vector<1x4xf32> to vector<4xf32>
    %c0_1 = arith.constant 0 : index
    %c0_2 = arith.constant 0 : index
    %2 = vector.load %arg6[%c0_1, %c0_2] : memref<1x4xf32, #tpu.memory_space<vmem>>, vector<1x4xf32>
    %3 = vector.shape_cast %2 : vector<1x4xf32> to vector<4xf32>
    %cst = arith.constant 0.000000e+00 : f32
    %4 = vector.broadcast %cst : f32 to vector<6x1x4xf32>
    %c0_3 = arith.constant 0 : index
    %c0_4 = arith.constant 0 : index
    %c0_5 = arith.constant 0 : index
    %5 = vector.load %arg10[%c0_3, %c0_4, %c0_5] : memref<6x18x4xf32, #tpu.memory_space<vmem>>, vector<6x1x4xf32>
    tpu.vector_store %arg10[%c0_3, %c0_4, %c0_5], %4 {strides = array<i32>} : memref<6x18x4xf32, #tpu.memory_space<vmem>>, vector<6x1x4xf32>,
    %cst_6 = arith.constant 0.000000e+00 : f32
    %6 = vector.broadcast %cst_6 : f32 to vector<6x1x4xf32>
    %c0_7 = arith.constant 0 : index
    %c17 = arith.constant 17 : index
    %c0_8 = arith.constant 0 : index
    %7 = vector.load %arg10[%c0_7, %c17, %c0_8] : memref<6x18x4xf32, #tpu.memory_space<vmem>>, vector<6x1x4xf32>
    tpu.vector_store %arg10[%c0_7, %c17, %c0_8], %6 {strides = array<i32>} : memref<6x18x4xf32, #tpu.memory_space<vmem>>, vector<6x1x4xf32>,
    %c0_9 = arith.constant 0 : index
    %c0_10 = arith.constant 0 : index
    %c0_11 = arith.constant 0 : index
    %c0_12 = arith.constant 0 : index
    %8 = vector.load %arg3[%c0_9, %c0_10, %c0_11, %c0_12] : memref<1x4x16x4xf32, #tpu.memory_space<vmem>>, vector<1x4x16x4xf32>
    %9 = vector.shape_cast %8 : vector<1x4x16x4xf32> to vector<4x16x4xf32>
    %10 = vector.shape_cast %1 : vector<4xf32> to vector<1x1x4xf32>
    %11 = vector.broadcast %10 : vector<1x1x4xf32> to vector<4x16x4xf32>
    %12 = arith.mulf %9, %11 : vector<4x16x4xf32>
    %13 = vector.shape_cast %3 : vector<4xf32> to vector<1x1x4xf32>
    %14 = vector.broadcast %13 : vector<1x1x4xf32> to vector<4x16x4xf32>
    %15 = arith.addf %12, %14 : vector<4x16x4xf32>
    %cst_13 = arith.constant 5.000000e-01 : f32
    %16 = vector.broadcast %cst_13 : f32 to vector<4x16x4xf32>
    %17 = arith.mulf %16, %15 : vector<4x16x4xf32>
    %cst_14 = arith.constant 0.707106769 : f32
    %18 = vector.broadcast %cst_14 : f32 to vector<4x16x4xf32>
    %19 = arith.mulf %15, %18 : vector<4x16x4xf32>
    %20 = math.erf %19 : vector<4x16x4xf32>
    %cst_15 = arith.constant 1.000000e+00 : f32
    %21 = vector.broadcast %cst_15 : f32 to vector<4x16x4xf32>
    %22 = arith.addf %21, %20 : vector<4x16x4xf32>
    %23 = arith.mulf %17, %22 : vector<4x16x4xf32>
    %c1 = arith.constant 1 : index
    %c1_16 = arith.constant 1 : index
    %c0_17 = arith.constant 0 : index
    %24 = vector.load %arg10[%c1, %c1_16, %c0_17] : memref<6x18x4xf32, #tpu.memory_space<vmem>>, vector<4x16x4xf32>
    tpu.vector_store %arg10[%c1, %c1_16, %c0_17], %23 {strides = array<i32>} : memref<6x18x4xf32, #tpu.memory_space<vmem>>, vector<4x16x4xf32>,
    %c0_i32 = arith.constant 0 : i32
    %25 = arith.cmpi sgt, %arg1, %c0_i32 : i32
    %26 = arith.extui %25 : i1 to i32
    %c0_i32_18 = arith.constant 0 : i32
    %27 = arith.cmpi ne, %26, %c0_i32_18 : i32
    scf.if %27 {
      %c0_79 = arith.constant 0 : index
      %c0_80 = arith.constant 0 : index
      %c0_81 = arith.constant 0 : index
      %c0_82 = arith.constant 0 : index
      %78 = vector.load %arg2[%c0_79, %c0_80, %c0_81, %c0_82] : memref<1x1x16x4xf32, #tpu.memory_space<vmem>>, vector<1x1x16x4xf32>
      %79 = vector.shape_cast %78 : vector<1x1x16x4xf32> to vector<1x16x4xf32>
      %80 = vector.shape_cast %1 : vector<4xf32> to vector<1x1x4xf32>
      %81 = vector.broadcast %80 : vector<1x1x4xf32> to vector<1x16x4xf32>
      %82 = arith.mulf %79, %81 : vector<1x16x4xf32>
      %83 = vector.shape_cast %3 : vector<4xf32> to vector<1x1x4xf32>
      %84 = vector.broadcast %83 : vector<1x1x4xf32> to vector<1x16x4xf32>
      %85 = arith.addf %82, %84 : vector<1x16x4xf32>
      %cst_83 = arith.constant 5.000000e-01 : f32
      %86 = vector.broadcast %cst_83 : f32 to vector<1x16x4xf32>
      %87 = arith.mulf %86, %85 : vector<1x16x4xf32>
      %cst_84 = arith.constant 0.707106769 : f32
      %88 = vector.broadcast %cst_84 : f32 to vector<1x16x4xf32>
      %89 = arith.mulf %85, %88 : vector<1x16x4xf32>
      %90 = math.erf %89 : vector<1x16x4xf32>
      %cst_85 = arith.constant 1.000000e+00 : f32
      %91 = vector.broadcast %cst_85 : f32 to vector<1x16x4xf32>
      %92 = arith.addf %91, %90 : vector<1x16x4xf32>
      %93 = arith.mulf %87, %92 : vector<1x16x4xf32>
      %c0_86 = arith.constant 0 : index
      %c1_87 = arith.constant 1 : index
      %c0_88 = arith.constant 0 : index
      %94 = vector.load %arg10[%c0_86, %c1_87, %c0_88] : memref<6x18x4xf32, #tpu.memory_space<vmem>>, vector<1x16x4xf32>
      tpu.vector_store %arg10[%c0_86, %c1_87, %c0_88], %93 {strides = array<i32>} : memref<6x18x4xf32, #tpu.memory_space<vmem>>, vector<1x16x4xf32>,
    } else {
    }
    %c0_i32_19 = arith.constant 0 : i32
    %28 = arith.cmpi eq, %arg1, %c0_i32_19 : i32
    %29 = arith.extui %28 : i1 to i32
    %c0_i32_20 = arith.constant 0 : i32
    %30 = arith.cmpi ne, %29, %c0_i32_20 : i32
    scf.if %30 {
      %cst_79 = arith.constant 0.000000e+00 : f32
      %78 = vector.broadcast %cst_79 : f32 to vector<1x16x4xf32>
      %c0_80 = arith.constant 0 : index
      %c1_81 = arith.constant 1 : index
      %c0_82 = arith.constant 0 : index
      %79 = vector.load %arg10[%c0_80, %c1_81, %c0_82] : memref<6x18x4xf32, #tpu.memory_space<vmem>>, vector<1x16x4xf32>
      tpu.vector_store %arg10[%c0_80, %c1_81, %c0_82], %78 {strides = array<i32>} : memref<6x18x4xf32, #tpu.memory_space<vmem>>, vector<1x16x4xf32>,
    } else {
    }
    %c3_i32 = arith.constant 3 : i32
    %31 = arith.cmpi slt, %arg1, %c3_i32 : i32
    %32 = arith.extui %31 : i1 to i32
    %c0_i32_21 = arith.constant 0 : i32
    %33 = arith.cmpi ne, %32, %c0_i32_21 : i32
    scf.if %33 {
      %c0_79 = arith.constant 0 : index
      %c0_80 = arith.constant 0 : index
      %c0_81 = arith.constant 0 : index
      %c0_82 = arith.constant 0 : index
      %78 = vector.load %arg4[%c0_79, %c0_80, %c0_81, %c0_82] : memref<1x1x16x4xf32, #tpu.memory_space<vmem>>, vector<1x1x16x4xf32>
      %79 = vector.shape_cast %78 : vector<1x1x16x4xf32> to vector<1x16x4xf32>
      %80 = vector.shape_cast %1 : vector<4xf32> to vector<1x1x4xf32>
      %81 = vector.broadcast %80 : vector<1x1x4xf32> to vector<1x16x4xf32>
      %82 = arith.mulf %79, %81 : vector<1x16x4xf32>
      %83 = vector.shape_cast %3 : vector<4xf32> to vector<1x1x4xf32>
      %84 = vector.broadcast %83 : vector<1x1x4xf32> to vector<1x16x4xf32>
      %85 = arith.addf %82, %84 : vector<1x16x4xf32>
      %cst_83 = arith.constant 5.000000e-01 : f32
      %86 = vector.broadcast %cst_83 : f32 to vector<1x16x4xf32>
      %87 = arith.mulf %86, %85 : vector<1x16x4xf32>
      %cst_84 = arith.constant 0.707106769 : f32
      %88 = vector.broadcast %cst_84 : f32 to vector<1x16x4xf32>
      %89 = arith.mulf %85, %88 : vector<1x16x4xf32>
      %90 = math.erf %89 : vector<1x16x4xf32>
      %cst_85 = arith.constant 1.000000e+00 : f32
      %91 = vector.broadcast %cst_85 : f32 to vector<1x16x4xf32>
      %92 = arith.addf %91, %90 : vector<1x16x4xf32>
      %93 = arith.mulf %87, %92 : vector<1x16x4xf32>
      %c5 = arith.constant 5 : index
      %c1_86 = arith.constant 1 : index
      %c0_87 = arith.constant 0 : index
      %94 = vector.load %arg10[%c5, %c1_86, %c0_87] : memref<6x18x4xf32, #tpu.memory_space<vmem>>, vector<1x16x4xf32>
      tpu.vector_store %arg10[%c5, %c1_86, %c0_87], %93 {strides = array<i32>} : memref<6x18x4xf32, #tpu.memory_space<vmem>>, vector<1x16x4xf32>,
    } else {
    }
    %c3_i32_22 = arith.constant 3 : i32
    %34 = arith.cmpi eq, %arg1, %c3_i32_22 : i32
    %35 = arith.extui %34 : i1 to i32
    %c0_i32_23 = arith.constant 0 : i32
    %36 = arith.cmpi ne, %35, %c0_i32_23 : i32
    scf.if %36 {
      %cst_79 = arith.constant 0.000000e+00 : f32
      %78 = vector.broadcast %cst_79 : f32 to vector<1x16x4xf32>
      %c5 = arith.constant 5 : index
      %c1_80 = arith.constant 1 : index
      %c0_81 = arith.constant 0 : index
      %79 = vector.load %arg10[%c5, %c1_80, %c0_81] : memref<6x18x4xf32, #tpu.memory_space<vmem>>, vector<1x16x4xf32>
      tpu.vector_store %arg10[%c5, %c1_80, %c0_81], %78 {strides = array<i32>} : memref<6x18x4xf32, #tpu.memory_space<vmem>>, vector<1x16x4xf32>,
    } else {
    }
    %c0_24 = arith.constant 0 : index
    %c0_25 = arith.constant 0 : index
    %c0_26 = arith.constant 0 : index
    %37 = vector.load %arg10[%c0_24, %c0_25, %c0_26] : memref<6x18x4xf32, #tpu.memory_space<vmem>>, vector<4x16x4xf32>
    %38 = vector.shape_cast %37 : vector<4x16x4xf32> to vector<64x4xf32>
    %c0_27 = arith.constant 0 : index
    %c0_28 = arith.constant 0 : index
    %39 = vector.load %arg11[%c0_27, %c0_28] : memref<64x36xf32, #tpu.memory_space<vmem>>, vector<64x4xf32>
    tpu.vector_store %arg11[%c0_27, %c0_28], %38 {strides = array<i32>} : memref<64x36xf32, #tpu.memory_space<vmem>>, vector<64x4xf32>,
    %c0_29 = arith.constant 0 : index
    %c1_30 = arith.constant 1 : index
    %c0_31 = arith.constant 0 : index
    %40 = vector.load %arg10[%c0_29, %c1_30, %c0_31] : memref<6x18x4xf32, #tpu.memory_space<vmem>>, vector<4x16x4xf32>
    %41 = vector.shape_cast %40 : vector<4x16x4xf32> to vector<64x4xf32>
    %c0_32 = arith.constant 0 : index
    %c4 = arith.constant 4 : index
    %42 = vector.load %arg11[%c0_32, %c4] : memref<64x36xf32, #tpu.memory_space<vmem>>, vector<64x4xf32>
    tpu.vector_store %arg11[%c0_32, %c4], %41 {strides = array<i32>} : memref<64x36xf32, #tpu.memory_space<vmem>>, vector<64x4xf32>,
    %c0_33 = arith.constant 0 : index
    %c2 = arith.constant 2 : index
    %c0_34 = arith.constant 0 : index
    %43 = vector.load %arg10[%c0_33, %c2, %c0_34] : memref<6x18x4xf32, #tpu.memory_space<vmem>>, vector<4x16x4xf32>
    %44 = vector.shape_cast %43 : vector<4x16x4xf32> to vector<64x4xf32>
    %c0_35 = arith.constant 0 : index
    %c8 = arith.constant 8 : index
    %45 = vector.load %arg11[%c0_35, %c8] : memref<64x36xf32, #tpu.memory_space<vmem>>, vector<64x4xf32>
    tpu.vector_store %arg11[%c0_35, %c8], %44 {strides = array<i32>} : memref<64x36xf32, #tpu.memory_space<vmem>>, vector<64x4xf32>,
    %c1_36 = arith.constant 1 : index
    %c0_37 = arith.constant 0 : index
    %c0_38 = arith.constant 0 : index
    %46 = vector.load %arg10[%c1_36, %c0_37, %c0_38] : memref<6x18x4xf32, #tpu.memory_space<vmem>>, vector<4x16x4xf32>
    %47 = vector.shape_cast %46 : vector<4x16x4xf32> to vector<64x4xf32>
    %c0_39 = arith.constant 0 : index
    %c12 = arith.constant 12 : index
    %48 = vector.load %arg11[%c0_39, %c12] : memref<64x36xf32, #tpu.memory_space<vmem>>, vector<64x4xf32>
    tpu.vector_store %arg11[%c0_39, %c12], %47 {strides = array<i32>} : memref<64x36xf32, #tpu.memory_space<vmem>>, vector<64x4xf32>,
    %c1_40 = arith.constant 1 : index
    %c1_41 = arith.constant 1 : index
    %c0_42 = arith.constant 0 : index
    %49 = vector.load %arg10[%c1_40, %c1_41, %c0_42] : memref<6x18x4xf32, #tpu.memory_space<vmem>>, vector<4x16x4xf32>
    %50 = vector.shape_cast %49 : vector<4x16x4xf32> to vector<64x4xf32>
    %c0_43 = arith.constant 0 : index
    %c16 = arith.constant 16 : index
    %51 = vector.load %arg11[%c0_43, %c16] : memref<64x36xf32, #tpu.memory_space<vmem>>, vector<64x4xf32>
    tpu.vector_store %arg11[%c0_43, %c16], %50 {strides = array<i32>} : memref<64x36xf32, #tpu.memory_space<vmem>>, vector<64x4xf32>,
    %c1_44 = arith.constant 1 : index
    %c2_45 = arith.constant 2 : index
    %c0_46 = arith.constant 0 : index
    %52 = vector.load %arg10[%c1_44, %c2_45, %c0_46] : memref<6x18x4xf32, #tpu.memory_space<vmem>>, vector<4x16x4xf32>
    %53 = vector.shape_cast %52 : vector<4x16x4xf32> to vector<64x4xf32>
    %c0_47 = arith.constant 0 : index
    %c20 = arith.constant 20 : index
    %54 = vector.load %arg11[%c0_47, %c20] : memref<64x36xf32, #tpu.memory_space<vmem>>, vector<64x4xf32>
    tpu.vector_store %arg11[%c0_47, %c20], %53 {strides = array<i32>} : memref<64x36xf32, #tpu.memory_space<vmem>>, vector<64x4xf32>,
    %c2_48 = arith.constant 2 : index
    %c0_49 = arith.constant 0 : index
    %c0_50 = arith.constant 0 : index
    %55 = vector.load %arg10[%c2_48, %c0_49, %c0_50] : memref<6x18x4xf32, #tpu.memory_space<vmem>>, vector<4x16x4xf32>
    %56 = vector.shape_cast %55 : vector<4x16x4xf32> to vector<64x4xf32>
    %c0_51 = arith.constant 0 : index
    %c24 = arith.constant 24 : index
    %57 = vector.load %arg11[%c0_51, %c24] : memref<64x36xf32, #tpu.memory_space<vmem>>, vector<64x4xf32>
    tpu.vector_store %arg11[%c0_51, %c24], %56 {strides = array<i32>} : memref<64x36xf32, #tpu.memory_space<vmem>>, vector<64x4xf32>,
    %c2_52 = arith.constant 2 : index
    %c1_53 = arith.constant 1 : index
    %c0_54 = arith.constant 0 : index
    %58 = vector.load %arg10[%c2_52, %c1_53, %c0_54] : memref<6x18x4xf32, #tpu.memory_space<vmem>>, vector<4x16x4xf32>
    %59 = vector.shape_cast %58 : vector<4x16x4xf32> to vector<64x4xf32>
    %c0_55 = arith.constant 0 : index
    %c28 = arith.constant 28 : index
    %60 = vector.load %arg11[%c0_55, %c28] : memref<64x36xf32, #tpu.memory_space<vmem>>, vector<64x4xf32>
    tpu.vector_store %arg11[%c0_55, %c28], %59 {strides = array<i32>} : memref<64x36xf32, #tpu.memory_space<vmem>>, vector<64x4xf32>,
    %c2_56 = arith.constant 2 : index
    %c2_57 = arith.constant 2 : index
    %c0_58 = arith.constant 0 : index
    %61 = vector.load %arg10[%c2_56, %c2_57, %c0_58] : memref<6x18x4xf32, #tpu.memory_space<vmem>>, vector<4x16x4xf32>
    %62 = vector.shape_cast %61 : vector<4x16x4xf32> to vector<64x4xf32>
    %c0_59 = arith.constant 0 : index
    %c32 = arith.constant 32 : index
    %63 = vector.load %arg11[%c0_59, %c32] : memref<64x36xf32, #tpu.memory_space<vmem>>, vector<64x4xf32>
    tpu.vector_store %arg11[%c0_59, %c32], %62 {strides = array<i32>} : memref<64x36xf32, #tpu.memory_space<vmem>>, vector<64x4xf32>,
    %c0_60 = arith.constant 0 : index
    %c0_61 = arith.constant 0 : index
    %64 = vector.load %arg11[%c0_60, %c0_61] : memref<64x36xf32, #tpu.memory_space<vmem>>, vector<64x36xf32>
    %c0_62 = arith.constant 0 : index
    %c0_63 = arith.constant 0 : index
    %65 = vector.load %arg7[%c0_62, %c0_63] : memref<36x4xf32, #tpu.memory_space<vmem>>, vector<36x4xf32>
    %cst_64 = arith.constant dense<0.000000e+00> : vector<64x4xf32>
    %66 = tpu.matmul %64, %65, %cst_64 {dimension_numbers = #tpu.dot_dimension_numbers<[1], [0], [0], [1], [0, 0, 1, 1], [], []>} : vector<64x36xf32>, vector<36x4xf32>, vector<64x4xf32> -> vector<64x4xf32>
    %67 = vector.shape_cast %66 : vector<64x4xf32> to vector<1x4x16x4xf32>
    %c0_65 = arith.constant 0 : index
    %c0_66 = arith.constant 0 : index
    %c0_67 = arith.constant 0 : index
    %c0_68 = arith.constant 0 : index
    %68 = vector.load %arg8[%c0_65, %c0_66, %c0_67, %c0_68] : memref<1x4x16x4xf32, #tpu.memory_space<vmem>>, vector<1x4x16x4xf32>
    tpu.vector_store %arg8[%c0_65, %c0_66, %c0_67, %c0_68], %67 {strides = array<i32>} : memref<1x4x16x4xf32, #tpu.memory_space<vmem>>, vector<1x4x16x4xf32>,
    %cst_69 = arith.constant dense<0.000000e+00> : vector<4xf32>
    %69 = vector.multi_reduction <add>, %66, %cst_69 [0] : vector<64x4xf32> to vector<4xf32>
    %70 = vector.shape_cast %69 : vector<4xf32> to vector<1x4xf32>
    %71 = vector.shape_cast %70 : vector<1x4xf32> to vector<1x1x1x4xf32>
    %c0_70 = arith.constant 0 : index
    %c0_71 = arith.constant 0 : index
    %c0_72 = arith.constant 0 : index
    %c0_73 = arith.constant 0 : index
    %72 = vector.load %arg9[%c0_70, %c0_71, %c0_72, %c0_73] : memref<1x1x2x4xf32, #tpu.memory_space<vmem>>, vector<1x1x1x4xf32>
    tpu.vector_store %arg9[%c0_70, %c0_71, %c0_72, %c0_73], %71 {strides = array<i32>} : memref<1x1x2x4xf32, #tpu.memory_space<vmem>>, vector<1x1x1x4xf32>,
    %73 = arith.mulf %66, %66 : vector<64x4xf32>
    %cst_74 = arith.constant dense<0.000000e+00> : vector<4xf32>
    %74 = vector.multi_reduction <add>, %73, %cst_74 [0] : vector<64x4xf32> to vector<4xf32>
    %75 = vector.shape_cast %74 : vector<4xf32> to vector<1x4xf32>
    %76 = vector.shape_cast %75 : vector<1x4xf32> to vector<1x1x1x4xf32>
    %c0_75 = arith.constant 0 : index
    %c0_76 = arith.constant 0 : index
    %c1_77 = arith.constant 1 : index
    %c0_78 = arith.constant 0 : index
    %77 = vector.load %arg9[%c0_75, %c0_76, %c1_77, %c0_78] : memref<1x1x2x4xf32, #tpu.memory_space<vmem>>, vector<1x1x1x4xf32>
    tpu.vector_store %arg9[%c0_75, %c0_76, %c1_77, %c0_78], %76 {strides = array<i32>} : memref<1x1x2x4xf32, #tpu.memory_space<vmem>>, vector<1x1x1x4xf32>,
    return
  }
  func.func @transform_0(%arg0: i32, %arg1: i32) -> (i32, i32, i32, i32) {
    %c4_i32 = arith.constant 4 : i32
    %0 = arith.muli %arg1, %c4_i32 : i32
    %c1_i32 = arith.constant 1 : i32
    %1 = arith.subi %0, %c1_i32 : i32
    %c0_i32 = arith.constant 0 : i32
    %2 = arith.maxsi %1, %c0_i32 : i32
    %c0_i32_0 = arith.constant 0 : i32
    %c0_i32_1 = arith.constant 0 : i32
    %c0_i32_2 = arith.constant 0 : i32
    return %arg0, %2, %c0_i32_0, %c0_i32_1 : i32, i32, i32, i32
  }
  func.func @transform_1(%arg0: i32, %arg1: i32) -> (i32, i32, i32, i32) {
    %c0_i32 = arith.constant 0 : i32
    %c0_i32_0 = arith.constant 0 : i32
    %c0_i32_1 = arith.constant 0 : i32
    return %arg0, %arg1, %c0_i32, %c0_i32_0 : i32, i32, i32, i32
  }
  func.func @transform_2(%arg0: i32, %arg1: i32) -> (i32, i32, i32, i32) {
    %c1_i32 = arith.constant 1 : i32
    %0 = arith.addi %arg1, %c1_i32 : i32
    %c4_i32 = arith.constant 4 : i32
    %1 = arith.muli %0, %c4_i32 : i32
    %c15_i32 = arith.constant 15 : i32
    %2 = arith.minsi %1, %c15_i32 : i32
    %c0_i32 = arith.constant 0 : i32
    %c0_i32_0 = arith.constant 0 : i32
    %c0_i32_1 = arith.constant 0 : i32
    return %arg0, %2, %c0_i32, %c0_i32_0 : i32, i32, i32, i32
  }
  func.func @transform_3(%arg0: i32, %arg1: i32) -> (i32, i32) {
    %c0_i32 = arith.constant 0 : i32
    %c0_i32_0 = arith.constant 0 : i32
    %c0_i32_1 = arith.constant 0 : i32
    return %c0_i32, %c0_i32_0 : i32, i32
  }
  func.func @transform_4(%arg0: i32, %arg1: i32) -> (i32, i32) {
    %c0_i32 = arith.constant 0 : i32
    %c0_i32_0 = arith.constant 0 : i32
    %c0_i32_1 = arith.constant 0 : i32
    return %c0_i32, %c0_i32_0 : i32, i32
  }
  func.func @transform_5(%arg0: i32, %arg1: i32) -> (i32, i32) {
    %c0_i32 = arith.constant 0 : i32
    %c0_i32_0 = arith.constant 0 : i32
    %c0_i32_1 = arith.constant 0 : i32
    return %c0_i32, %c0_i32_0 : i32, i32
  }
  func.func @transform_6(%arg0: i32, %arg1: i32) -> (i32, i32, i32, i32) {
    %c0_i32 = arith.constant 0 : i32
    %c0_i32_0 = arith.constant 0 : i32
    %c0_i32_1 = arith.constant 0 : i32
    return %arg0, %arg1, %c0_i32, %c0_i32_0 : i32, i32, i32, i32
  }
  func.func @transform_7(%arg0: i32, %arg1: i32) -> (i32, i32, i32, i32) {
    %c0_i32 = arith.constant 0 : i32
    %c0_i32_0 = arith.constant 0 : i32
    %c0_i32_1 = arith.constant 0 : i32
    return %arg0, %arg1, %c0_i32, %c0_i32_0 : i32, i32, i32, i32
  }
}

module attributes {stable_mosaic.version = 11 : i64} {
  func.func @conv3x3_fused_kernel(%arg0: i32, %arg1: i32, %arg2: memref<1x1x16x4xf32, #tpu.memory_space<vmem>>, %arg3: memref<1x4x16x4xf32, #tpu.memory_space<vmem>>, %arg4: memref<1x1x16x4xf32, #tpu.memory_space<vmem>>, %arg5: memref<1x4xf32, #tpu.memory_space<vmem>>, %arg6: memref<1x4xf32, #tpu.memory_space<vmem>>, %arg7: memref<36x8xf32, #tpu.memory_space<vmem>>, %arg8: memref<1x4x16x8xf32, #tpu.memory_space<vmem>>, %arg9: memref<1x1x2x8xf32, #tpu.memory_space<vmem>>, %arg10: memref<6x18x4xf32, #tpu.memory_space<vmem>>, %arg11: memref<64x36xf32, #tpu.memory_space<vmem>>) attributes {dimension_semantics = [#tpu.dimension_semantics<parallel>, #tpu.dimension_semantics<parallel>], iteration_bounds = array<i64: 2, 4>, scalar_prefetch = 0 : i64, scratch_operands = 2 : i64, tpu.core_type = #tpu.core_type<tc>, window_params = [{transform_indices = @transform_0, window_bounds = array<i64: 1, 1, 16, 4>}, {transform_indices = @transform_1, window_bounds = array<i64: 1, 4, 16, 4>}, {transform_indices = @transform_2, window_bounds = array<i64: 1, 1, 16, 4>}, {pipeline_mode = #tpu.pipeline_mode<synchronous>, transform_indices = @transform_3, window_bounds = array<i64: 1, 4>}, {pipeline_mode = #tpu.pipeline_mode<synchronous>, transform_indices = @transform_4, window_bounds = array<i64: 1, 4>}, {pipeline_mode = #tpu.pipeline_mode<synchronous>, transform_indices = @transform_5, window_bounds = array<i64: 36, 8>}, {transform_indices = @transform_6, window_bounds = array<i64: 1, 4, 16, 8>}, {transform_indices = @transform_7, window_bounds = array<i64: 1, 1, 2, 8>}]} {
    %c0 = arith.constant 0 : index
    %c0_0 = arith.constant 0 : index
    %0 = vector.load %arg5[%c0, %c0_0] : memref<1x4xf32, #tpu.memory_space<vmem>>, vector<1x4xf32>
    %1 = vector.shape_cast %0 : vector<1x4xf32> to vector<4xf32>
    %c0_1 = arith.constant 0 : index
    %c0_2 = arith.constant 0 : index
    %2 = vector.load %arg6[%c0_1, %c0_2] : memref<1x4xf32, #tpu.memory_space<vmem>>, vector<1x4xf32>
    %3 = vector.shape_cast %2 : vector<1x4xf32> to vector<4xf32>
    %cst = arith.constant 0.000000e+00 : f32
    %4 = vector.broadcast %cst : f32 to vector<6x1x4xf32>
    %c0_3 = arith.constant 0 : index
    %c0_4 = arith.constant 0 : index
    %c0_5 = arith.constant 0 : index
    %5 = vector.load %arg10[%c0_3, %c0_4, %c0_5] : memref<6x18x4xf32, #tpu.memory_space<vmem>>, vector<6x1x4xf32>
    tpu.vector_store %arg10[%c0_3, %c0_4, %c0_5], %4 {strides = array<i32>} : memref<6x18x4xf32, #tpu.memory_space<vmem>>, vector<6x1x4xf32>,
    %cst_6 = arith.constant 0.000000e+00 : f32
    %6 = vector.broadcast %cst_6 : f32 to vector<6x1x4xf32>
    %c0_7 = arith.constant 0 : index
    %c17 = arith.constant 17 : index
    %c0_8 = arith.constant 0 : index
    %7 = vector.load %arg10[%c0_7, %c17, %c0_8] : memref<6x18x4xf32, #tpu.memory_space<vmem>>, vector<6x1x4xf32>
    tpu.vector_store %arg10[%c0_7, %c17, %c0_8], %6 {strides = array<i32>} : memref<6x18x4xf32, #tpu.memory_space<vmem>>, vector<6x1x4xf32>,
    %c0_9 = arith.constant 0 : index
    %c0_10 = arith.constant 0 : index
    %c0_11 = arith.constant 0 : index
    %c0_12 = arith.constant 0 : index
    %8 = vector.load %arg3[%c0_9, %c0_10, %c0_11, %c0_12] : memref<1x4x16x4xf32, #tpu.memory_space<vmem>>, vector<1x4x16x4xf32>
    %9 = vector.shape_cast %8 : vector<1x4x16x4xf32> to vector<4x16x4xf32>
    %10 = vector.shape_cast %1 : vector<4xf32> to vector<1x1x4xf32>
    %11 = vector.broadcast %10 : vector<1x1x4xf32> to vector<4x16x4xf32>
    %12 = arith.mulf %9, %11 : vector<4x16x4xf32>
    %13 = vector.shape_cast %3 : vector<4xf32> to vector<1x1x4xf32>
    %14 = vector.broadcast %13 : vector<1x1x4xf32> to vector<4x16x4xf32>
    %15 = arith.addf %12, %14 : vector<4x16x4xf32>
    %cst_13 = arith.constant 5.000000e-01 : f32
    %16 = vector.broadcast %cst_13 : f32 to vector<4x16x4xf32>
    %17 = arith.mulf %16, %15 : vector<4x16x4xf32>
    %cst_14 = arith.constant 0.707106769 : f32
    %18 = vector.broadcast %cst_14 : f32 to vector<4x16x4xf32>
    %19 = arith.mulf %15, %18 : vector<4x16x4xf32>
    %20 = math.erf %19 : vector<4x16x4xf32>
    %cst_15 = arith.constant 1.000000e+00 : f32
    %21 = vector.broadcast %cst_15 : f32 to vector<4x16x4xf32>
    %22 = arith.addf %21, %20 : vector<4x16x4xf32>
    %23 = arith.mulf %17, %22 : vector<4x16x4xf32>
    %c1 = arith.constant 1 : index
    %c1_16 = arith.constant 1 : index
    %c0_17 = arith.constant 0 : index
    %24 = vector.load %arg10[%c1, %c1_16, %c0_17] : memref<6x18x4xf32, #tpu.memory_space<vmem>>, vector<4x16x4xf32>
    tpu.vector_store %arg10[%c1, %c1_16, %c0_17], %23 {strides = array<i32>} : memref<6x18x4xf32, #tpu.memory_space<vmem>>, vector<4x16x4xf32>,
    %c0_i32 = arith.constant 0 : i32
    %25 = arith.cmpi sgt, %arg1, %c0_i32 : i32
    %26 = arith.extui %25 : i1 to i32
    %c0_i32_18 = arith.constant 0 : i32
    %27 = arith.cmpi ne, %26, %c0_i32_18 : i32
    scf.if %27 {
      %c0_79 = arith.constant 0 : index
      %c0_80 = arith.constant 0 : index
      %c0_81 = arith.constant 0 : index
      %c0_82 = arith.constant 0 : index
      %78 = vector.load %arg2[%c0_79, %c0_80, %c0_81, %c0_82] : memref<1x1x16x4xf32, #tpu.memory_space<vmem>>, vector<1x1x16x4xf32>
      %79 = vector.shape_cast %78 : vector<1x1x16x4xf32> to vector<1x16x4xf32>
      %80 = vector.shape_cast %1 : vector<4xf32> to vector<1x1x4xf32>
      %81 = vector.broadcast %80 : vector<1x1x4xf32> to vector<1x16x4xf32>
      %82 = arith.mulf %79, %81 : vector<1x16x4xf32>
      %83 = vector.shape_cast %3 : vector<4xf32> to vector<1x1x4xf32>
      %84 = vector.broadcast %83 : vector<1x1x4xf32> to vector<1x16x4xf32>
      %85 = arith.addf %82, %84 : vector<1x16x4xf32>
      %cst_83 = arith.constant 5.000000e-01 : f32
      %86 = vector.broadcast %cst_83 : f32 to vector<1x16x4xf32>
      %87 = arith.mulf %86, %85 : vector<1x16x4xf32>
      %cst_84 = arith.constant 0.707106769 : f32
      %88 = vector.broadcast %cst_84 : f32 to vector<1x16x4xf32>
      %89 = arith.mulf %85, %88 : vector<1x16x4xf32>
      %90 = math.erf %89 : vector<1x16x4xf32>
      %cst_85 = arith.constant 1.000000e+00 : f32
      %91 = vector.broadcast %cst_85 : f32 to vector<1x16x4xf32>
      %92 = arith.addf %91, %90 : vector<1x16x4xf32>
      %93 = arith.mulf %87, %92 : vector<1x16x4xf32>
      %c0_86 = arith.constant 0 : index
      %c1_87 = arith.constant 1 : index
      %c0_88 = arith.constant 0 : index
      %94 = vector.load %arg10[%c0_86, %c1_87, %c0_88] : memref<6x18x4xf32, #tpu.memory_space<vmem>>, vector<1x16x4xf32>
      tpu.vector_store %arg10[%c0_86, %c1_87, %c0_88], %93 {strides = array<i32>} : memref<6x18x4xf32, #tpu.memory_space<vmem>>, vector<1x16x4xf32>,
    } else {
    }
    %c0_i32_19 = arith.constant 0 : i32
    %28 = arith.cmpi eq, %arg1, %c0_i32_19 : i32
    %29 = arith.extui %28 : i1 to i32
    %c0_i32_20 = arith.constant 0 : i32
    %30 = arith.cmpi ne, %29, %c0_i32_20 : i32
    scf.if %30 {
      %cst_79 = arith.constant 0.000000e+00 : f32
      %78 = vector.broadcast %cst_79 : f32 to vector<1x16x4xf32>
      %c0_80 = arith.constant 0 : index
      %c1_81 = arith.constant 1 : index
      %c0_82 = arith.constant 0 : index
      %79 = vector.load %arg10[%c0_80, %c1_81, %c0_82] : memref<6x18x4xf32, #tpu.memory_space<vmem>>, vector<1x16x4xf32>
      tpu.vector_store %arg10[%c0_80, %c1_81, %c0_82], %78 {strides = array<i32>} : memref<6x18x4xf32, #tpu.memory_space<vmem>>, vector<1x16x4xf32>,
    } else {
    }
    %c3_i32 = arith.constant 3 : i32
    %31 = arith.cmpi slt, %arg1, %c3_i32 : i32
    %32 = arith.extui %31 : i1 to i32
    %c0_i32_21 = arith.constant 0 : i32
    %33 = arith.cmpi ne, %32, %c0_i32_21 : i32
    scf.if %33 {
      %c0_79 = arith.constant 0 : index
      %c0_80 = arith.constant 0 : index
      %c0_81 = arith.constant 0 : index
      %c0_82 = arith.constant 0 : index
      %78 = vector.load %arg4[%c0_79, %c0_80, %c0_81, %c0_82] : memref<1x1x16x4xf32, #tpu.memory_space<vmem>>, vector<1x1x16x4xf32>
      %79 = vector.shape_cast %78 : vector<1x1x16x4xf32> to vector<1x16x4xf32>
      %80 = vector.shape_cast %1 : vector<4xf32> to vector<1x1x4xf32>
      %81 = vector.broadcast %80 : vector<1x1x4xf32> to vector<1x16x4xf32>
      %82 = arith.mulf %79, %81 : vector<1x16x4xf32>
      %83 = vector.shape_cast %3 : vector<4xf32> to vector<1x1x4xf32>
      %84 = vector.broadcast %83 : vector<1x1x4xf32> to vector<1x16x4xf32>
      %85 = arith.addf %82, %84 : vector<1x16x4xf32>
      %cst_83 = arith.constant 5.000000e-01 : f32
      %86 = vector.broadcast %cst_83 : f32 to vector<1x16x4xf32>
      %87 = arith.mulf %86, %85 : vector<1x16x4xf32>
      %cst_84 = arith.constant 0.707106769 : f32
      %88 = vector.broadcast %cst_84 : f32 to vector<1x16x4xf32>
      %89 = arith.mulf %85, %88 : vector<1x16x4xf32>
      %90 = math.erf %89 : vector<1x16x4xf32>
      %cst_85 = arith.constant 1.000000e+00 : f32
      %91 = vector.broadcast %cst_85 : f32 to vector<1x16x4xf32>
      %92 = arith.addf %91, %90 : vector<1x16x4xf32>
      %93 = arith.mulf %87, %92 : vector<1x16x4xf32>
      %c5 = arith.constant 5 : index
      %c1_86 = arith.constant 1 : index
      %c0_87 = arith.constant 0 : index
      %94 = vector.load %arg10[%c5, %c1_86, %c0_87] : memref<6x18x4xf32, #tpu.memory_space<vmem>>, vector<1x16x4xf32>
      tpu.vector_store %arg10[%c5, %c1_86, %c0_87], %93 {strides = array<i32>} : memref<6x18x4xf32, #tpu.memory_space<vmem>>, vector<1x16x4xf32>,
    } else {
    }
    %c3_i32_22 = arith.constant 3 : i32
    %34 = arith.cmpi eq, %arg1, %c3_i32_22 : i32
    %35 = arith.extui %34 : i1 to i32
    %c0_i32_23 = arith.constant 0 : i32
    %36 = arith.cmpi ne, %35, %c0_i32_23 : i32
    scf.if %36 {
      %cst_79 = arith.constant 0.000000e+00 : f32
      %78 = vector.broadcast %cst_79 : f32 to vector<1x16x4xf32>
      %c5 = arith.constant 5 : index
      %c1_80 = arith.constant 1 : index
      %c0_81 = arith.constant 0 : index
      %79 = vector.load %arg10[%c5, %c1_80, %c0_81] : memref<6x18x4xf32, #tpu.memory_space<vmem>>, vector<1x16x4xf32>
      tpu.vector_store %arg10[%c5, %c1_80, %c0_81], %78 {strides = array<i32>} : memref<6x18x4xf32, #tpu.memory_space<vmem>>, vector<1x16x4xf32>,
    } else {
    }
    %c0_24 = arith.constant 0 : index
    %c0_25 = arith.constant 0 : index
    %c0_26 = arith.constant 0 : index
    %37 = vector.load %arg10[%c0_24, %c0_25, %c0_26] : memref<6x18x4xf32, #tpu.memory_space<vmem>>, vector<4x16x4xf32>
    %38 = vector.shape_cast %37 : vector<4x16x4xf32> to vector<64x4xf32>
    %c0_27 = arith.constant 0 : index
    %c0_28 = arith.constant 0 : index
    %39 = vector.load %arg11[%c0_27, %c0_28] : memref<64x36xf32, #tpu.memory_space<vmem>>, vector<64x4xf32>
    tpu.vector_store %arg11[%c0_27, %c0_28], %38 {strides = array<i32>} : memref<64x36xf32, #tpu.memory_space<vmem>>, vector<64x4xf32>,
    %c0_29 = arith.constant 0 : index
    %c1_30 = arith.constant 1 : index
    %c0_31 = arith.constant 0 : index
    %40 = vector.load %arg10[%c0_29, %c1_30, %c0_31] : memref<6x18x4xf32, #tpu.memory_space<vmem>>, vector<4x16x4xf32>
    %41 = vector.shape_cast %40 : vector<4x16x4xf32> to vector<64x4xf32>
    %c0_32 = arith.constant 0 : index
    %c4 = arith.constant 4 : index
    %42 = vector.load %arg11[%c0_32, %c4] : memref<64x36xf32, #tpu.memory_space<vmem>>, vector<64x4xf32>
    tpu.vector_store %arg11[%c0_32, %c4], %41 {strides = array<i32>} : memref<64x36xf32, #tpu.memory_space<vmem>>, vector<64x4xf32>,
    %c0_33 = arith.constant 0 : index
    %c2 = arith.constant 2 : index
    %c0_34 = arith.constant 0 : index
    %43 = vector.load %arg10[%c0_33, %c2, %c0_34] : memref<6x18x4xf32, #tpu.memory_space<vmem>>, vector<4x16x4xf32>
    %44 = vector.shape_cast %43 : vector<4x16x4xf32> to vector<64x4xf32>
    %c0_35 = arith.constant 0 : index
    %c8 = arith.constant 8 : index
    %45 = vector.load %arg11[%c0_35, %c8] : memref<64x36xf32, #tpu.memory_space<vmem>>, vector<64x4xf32>
    tpu.vector_store %arg11[%c0_35, %c8], %44 {strides = array<i32>} : memref<64x36xf32, #tpu.memory_space<vmem>>, vector<64x4xf32>,
    %c1_36 = arith.constant 1 : index
    %c0_37 = arith.constant 0 : index
    %c0_38 = arith.constant 0 : index
    %46 = vector.load %arg10[%c1_36, %c0_37, %c0_38] : memref<6x18x4xf32, #tpu.memory_space<vmem>>, vector<4x16x4xf32>
    %47 = vector.shape_cast %46 : vector<4x16x4xf32> to vector<64x4xf32>
    %c0_39 = arith.constant 0 : index
    %c12 = arith.constant 12 : index
    %48 = vector.load %arg11[%c0_39, %c12] : memref<64x36xf32, #tpu.memory_space<vmem>>, vector<64x4xf32>
    tpu.vector_store %arg11[%c0_39, %c12], %47 {strides = array<i32>} : memref<64x36xf32, #tpu.memory_space<vmem>>, vector<64x4xf32>,
    %c1_40 = arith.constant 1 : index
    %c1_41 = arith.constant 1 : index
    %c0_42 = arith.constant 0 : index
    %49 = vector.load %arg10[%c1_40, %c1_41, %c0_42] : memref<6x18x4xf32, #tpu.memory_space<vmem>>, vector<4x16x4xf32>
    %50 = vector.shape_cast %49 : vector<4x16x4xf32> to vector<64x4xf32>
    %c0_43 = arith.constant 0 : index
    %c16 = arith.constant 16 : index
    %51 = vector.load %arg11[%c0_43, %c16] : memref<64x36xf32, #tpu.memory_space<vmem>>, vector<64x4xf32>
    tpu.vector_store %arg11[%c0_43, %c16], %50 {strides = array<i32>} : memref<64x36xf32, #tpu.memory_space<vmem>>, vector<64x4xf32>,
    %c1_44 = arith.constant 1 : index
    %c2_45 = arith.constant 2 : index
    %c0_46 = arith.constant 0 : index
    %52 = vector.load %arg10[%c1_44, %c2_45, %c0_46] : memref<6x18x4xf32, #tpu.memory_space<vmem>>, vector<4x16x4xf32>
    %53 = vector.shape_cast %52 : vector<4x16x4xf32> to vector<64x4xf32>
    %c0_47 = arith.constant 0 : index
    %c20 = arith.constant 20 : index
    %54 = vector.load %arg11[%c0_47, %c20] : memref<64x36xf32, #tpu.memory_space<vmem>>, vector<64x4xf32>
    tpu.vector_store %arg11[%c0_47, %c20], %53 {strides = array<i32>} : memref<64x36xf32, #tpu.memory_space<vmem>>, vector<64x4xf32>,
    %c2_48 = arith.constant 2 : index
    %c0_49 = arith.constant 0 : index
    %c0_50 = arith.constant 0 : index
    %55 = vector.load %arg10[%c2_48, %c0_49, %c0_50] : memref<6x18x4xf32, #tpu.memory_space<vmem>>, vector<4x16x4xf32>
    %56 = vector.shape_cast %55 : vector<4x16x4xf32> to vector<64x4xf32>
    %c0_51 = arith.constant 0 : index
    %c24 = arith.constant 24 : index
    %57 = vector.load %arg11[%c0_51, %c24] : memref<64x36xf32, #tpu.memory_space<vmem>>, vector<64x4xf32>
    tpu.vector_store %arg11[%c0_51, %c24], %56 {strides = array<i32>} : memref<64x36xf32, #tpu.memory_space<vmem>>, vector<64x4xf32>,
    %c2_52 = arith.constant 2 : index
    %c1_53 = arith.constant 1 : index
    %c0_54 = arith.constant 0 : index
    %58 = vector.load %arg10[%c2_52, %c1_53, %c0_54] : memref<6x18x4xf32, #tpu.memory_space<vmem>>, vector<4x16x4xf32>
    %59 = vector.shape_cast %58 : vector<4x16x4xf32> to vector<64x4xf32>
    %c0_55 = arith.constant 0 : index
    %c28 = arith.constant 28 : index
    %60 = vector.load %arg11[%c0_55, %c28] : memref<64x36xf32, #tpu.memory_space<vmem>>, vector<64x4xf32>
    tpu.vector_store %arg11[%c0_55, %c28], %59 {strides = array<i32>} : memref<64x36xf32, #tpu.memory_space<vmem>>, vector<64x4xf32>,
    %c2_56 = arith.constant 2 : index
    %c2_57 = arith.constant 2 : index
    %c0_58 = arith.constant 0 : index
    %61 = vector.load %arg10[%c2_56, %c2_57, %c0_58] : memref<6x18x4xf32, #tpu.memory_space<vmem>>, vector<4x16x4xf32>
    %62 = vector.shape_cast %61 : vector<4x16x4xf32> to vector<64x4xf32>
    %c0_59 = arith.constant 0 : index
    %c32 = arith.constant 32 : index
    %63 = vector.load %arg11[%c0_59, %c32] : memref<64x36xf32, #tpu.memory_space<vmem>>, vector<64x4xf32>
    tpu.vector_store %arg11[%c0_59, %c32], %62 {strides = array<i32>} : memref<64x36xf32, #tpu.memory_space<vmem>>, vector<64x4xf32>,
    %c0_60 = arith.constant 0 : index
    %c0_61 = arith.constant 0 : index
    %64 = vector.load %arg11[%c0_60, %c0_61] : memref<64x36xf32, #tpu.memory_space<vmem>>, vector<64x36xf32>
    %c0_62 = arith.constant 0 : index
    %c0_63 = arith.constant 0 : index
    %65 = vector.load %arg7[%c0_62, %c0_63] : memref<36x8xf32, #tpu.memory_space<vmem>>, vector<36x8xf32>
    %cst_64 = arith.constant dense<0.000000e+00> : vector<64x8xf32>
    %66 = tpu.matmul %64, %65, %cst_64 {dimension_numbers = #tpu.dot_dimension_numbers<[1], [0], [0], [1], [0, 0, 1, 1], [], []>} : vector<64x36xf32>, vector<36x8xf32>, vector<64x8xf32> -> vector<64x8xf32>
    %67 = vector.shape_cast %66 : vector<64x8xf32> to vector<1x4x16x8xf32>
    %c0_65 = arith.constant 0 : index
    %c0_66 = arith.constant 0 : index
    %c0_67 = arith.constant 0 : index
    %c0_68 = arith.constant 0 : index
    %68 = vector.load %arg8[%c0_65, %c0_66, %c0_67, %c0_68] : memref<1x4x16x8xf32, #tpu.memory_space<vmem>>, vector<1x4x16x8xf32>
    tpu.vector_store %arg8[%c0_65, %c0_66, %c0_67, %c0_68], %67 {strides = array<i32>} : memref<1x4x16x8xf32, #tpu.memory_space<vmem>>, vector<1x4x16x8xf32>,
    %cst_69 = arith.constant dense<0.000000e+00> : vector<8xf32>
    %69 = vector.multi_reduction <add>, %66, %cst_69 [0] : vector<64x8xf32> to vector<8xf32>
    %70 = vector.shape_cast %69 : vector<8xf32> to vector<1x8xf32>
    %71 = vector.shape_cast %70 : vector<1x8xf32> to vector<1x1x1x8xf32>
    %c0_70 = arith.constant 0 : index
    %c0_71 = arith.constant 0 : index
    %c0_72 = arith.constant 0 : index
    %c0_73 = arith.constant 0 : index
    %72 = vector.load %arg9[%c0_70, %c0_71, %c0_72, %c0_73] : memref<1x1x2x8xf32, #tpu.memory_space<vmem>>, vector<1x1x1x8xf32>
    tpu.vector_store %arg9[%c0_70, %c0_71, %c0_72, %c0_73], %71 {strides = array<i32>} : memref<1x1x2x8xf32, #tpu.memory_space<vmem>>, vector<1x1x1x8xf32>,
    %73 = arith.mulf %66, %66 : vector<64x8xf32>
    %cst_74 = arith.constant dense<0.000000e+00> : vector<8xf32>
    %74 = vector.multi_reduction <add>, %73, %cst_74 [0] : vector<64x8xf32> to vector<8xf32>
    %75 = vector.shape_cast %74 : vector<8xf32> to vector<1x8xf32>
    %76 = vector.shape_cast %75 : vector<1x8xf32> to vector<1x1x1x8xf32>
    %c0_75 = arith.constant 0 : index
    %c0_76 = arith.constant 0 : index
    %c1_77 = arith.constant 1 : index
    %c0_78 = arith.constant 0 : index
    %77 = vector.load %arg9[%c0_75, %c0_76, %c1_77, %c0_78] : memref<1x1x2x8xf32, #tpu.memory_space<vmem>>, vector<1x1x1x8xf32>
    tpu.vector_store %arg9[%c0_75, %c0_76, %c1_77, %c0_78], %76 {strides = array<i32>} : memref<1x1x2x8xf32, #tpu.memory_space<vmem>>, vector<1x1x1x8xf32>,
    return
  }
  func.func @transform_0(%arg0: i32, %arg1: i32) -> (i32, i32, i32, i32) {
    %c4_i32 = arith.constant 4 : i32
    %0 = arith.muli %arg1, %c4_i32 : i32
    %c1_i32 = arith.constant 1 : i32
    %1 = arith.subi %0, %c1_i32 : i32
    %c0_i32 = arith.constant 0 : i32
    %2 = arith.maxsi %1, %c0_i32 : i32
    %c0_i32_0 = arith.constant 0 : i32
    %c0_i32_1 = arith.constant 0 : i32
    %c0_i32_2 = arith.constant 0 : i32
    return %arg0, %2, %c0_i32_0, %c0_i32_1 : i32, i32, i32, i32
  }
  func.func @transform_1(%arg0: i32, %arg1: i32) -> (i32, i32, i32, i32) {
    %c0_i32 = arith.constant 0 : i32
    %c0_i32_0 = arith.constant 0 : i32
    %c0_i32_1 = arith.constant 0 : i32
    return %arg0, %arg1, %c0_i32, %c0_i32_0 : i32, i32, i32, i32
  }
  func.func @transform_2(%arg0: i32, %arg1: i32) -> (i32, i32, i32, i32) {
    %c1_i32 = arith.constant 1 : i32
    %0 = arith.addi %arg1, %c1_i32 : i32
    %c4_i32 = arith.constant 4 : i32
    %1 = arith.muli %0, %c4_i32 : i32
    %c15_i32 = arith.constant 15 : i32
    %2 = arith.minsi %1, %c15_i32 : i32
    %c0_i32 = arith.constant 0 : i32
    %c0_i32_0 = arith.constant 0 : i32
    %c0_i32_1 = arith.constant 0 : i32
    return %arg0, %2, %c0_i32, %c0_i32_0 : i32, i32, i32, i32
  }
  func.func @transform_3(%arg0: i32, %arg1: i32) -> (i32, i32) {
    %c0_i32 = arith.constant 0 : i32
    %c0_i32_0 = arith.constant 0 : i32
    %c0_i32_1 = arith.constant 0 : i32
    return %c0_i32, %c0_i32_0 : i32, i32
  }
  func.func @transform_4(%arg0: i32, %arg1: i32) -> (i32, i32) {
    %c0_i32 = arith.constant 0 : i32
    %c0_i32_0 = arith.constant 0 : i32
    %c0_i32_1 = arith.constant 0 : i32
    return %c0_i32, %c0_i32_0 : i32, i32
  }
  func.func @transform_5(%arg0: i32, %arg1: i32) -> (i32, i32) {
    %c0_i32 = arith.constant 0 : i32
    %c0_i32_0 = arith.constant 0 : i32
    %c0_i32_1 = arith.constant 0 : i32
    return %c0_i32, %c0_i32_0 : i32, i32
  }
  func.func @transform_6(%arg0: i32, %arg1: i32) -> (i32, i32, i32, i32) {
    %c0_i32 = arith.constant 0 : i32
    %c0_i32_0 = arith.constant 0 : i32
    %c0_i32_1 = arith.constant 0 : i32
    return %arg0, %arg1, %c0_i32, %c0_i32_0 : i32, i32, i32, i32
  }
  func.func @transform_7(%arg0: i32, %arg1: i32) -> (i32, i32, i32, i32) {
    %c0_i32 = arith.constant 0 : i32
    %c0_i32_0 = arith.constant 0 : i32
    %c0_i32_1 = arith.constant 0 : i32
    return %arg0, %arg1, %c0_i32, %c0_i32_0 : i32, i32, i32, i32
  }
}

module attributes {stable_mosaic.version = 11 : i64} {
  func.func @norm_gelu_kernel(%arg0: i32, %arg1: i32, %arg2: memref<1x4x16x8xf32, #tpu.memory_space<vmem>>, %arg3: memref<1x8xf32, #tpu.memory_space<vmem>>, %arg4: memref<1x8xf32, #tpu.memory_space<vmem>>, %arg5: memref<1x4x16x8xf32, #tpu.memory_space<vmem>>) attributes {dimension_semantics = [#tpu.dimension_semantics<parallel>, #tpu.dimension_semantics<parallel>], iteration_bounds = array<i64: 2, 4>, scalar_prefetch = 0 : i64, scratch_operands = 0 : i64, tpu.core_type = #tpu.core_type<tc>, window_params = [{transform_indices = @transform_0, window_bounds = array<i64: 1, 4, 16, 8>}, {pipeline_mode = #tpu.pipeline_mode<synchronous>, transform_indices = @transform_1, window_bounds = array<i64: 1, 8>}, {pipeline_mode = #tpu.pipeline_mode<synchronous>, transform_indices = @transform_2, window_bounds = array<i64: 1, 8>}, {transform_indices = @transform_3, window_bounds = array<i64: 1, 4, 16, 8>}]} {
    %c0 = arith.constant 0 : index
    %c0_0 = arith.constant 0 : index
    %c0_1 = arith.constant 0 : index
    %c0_2 = arith.constant 0 : index
    %0 = vector.load %arg2[%c0, %c0_0, %c0_1, %c0_2] : memref<1x4x16x8xf32, #tpu.memory_space<vmem>>, vector<1x4x16x8xf32>
    %c0_3 = arith.constant 0 : index
    %c0_4 = arith.constant 0 : index
    %1 = vector.load %arg3[%c0_3, %c0_4] : memref<1x8xf32, #tpu.memory_space<vmem>>, vector<1x8xf32>
    %2 = vector.shape_cast %1 : vector<1x8xf32> to vector<8xf32>
    %3 = vector.shape_cast %2 : vector<8xf32> to vector<1x1x1x8xf32>
    %4 = vector.broadcast %3 : vector<1x1x1x8xf32> to vector<1x4x16x8xf32>
    %5 = arith.mulf %0, %4 : vector<1x4x16x8xf32>
    %c0_5 = arith.constant 0 : index
    %c0_6 = arith.constant 0 : index
    %6 = vector.load %arg4[%c0_5, %c0_6] : memref<1x8xf32, #tpu.memory_space<vmem>>, vector<1x8xf32>
    %7 = vector.shape_cast %6 : vector<1x8xf32> to vector<8xf32>
    %8 = vector.shape_cast %7 : vector<8xf32> to vector<1x1x1x8xf32>
    %9 = vector.broadcast %8 : vector<1x1x1x8xf32> to vector<1x4x16x8xf32>
    %10 = arith.addf %5, %9 : vector<1x4x16x8xf32>
    %cst = arith.constant 5.000000e-01 : f32
    %11 = vector.broadcast %cst : f32 to vector<1x4x16x8xf32>
    %12 = arith.mulf %11, %10 : vector<1x4x16x8xf32>
    %cst_7 = arith.constant 0.707106769 : f32
    %13 = vector.broadcast %cst_7 : f32 to vector<1x4x16x8xf32>
    %14 = arith.mulf %10, %13 : vector<1x4x16x8xf32>
    %15 = math.erf %14 : vector<1x4x16x8xf32>
    %cst_8 = arith.constant 1.000000e+00 : f32
    %16 = vector.broadcast %cst_8 : f32 to vector<1x4x16x8xf32>
    %17 = arith.addf %16, %15 : vector<1x4x16x8xf32>
    %18 = arith.mulf %12, %17 : vector<1x4x16x8xf32>
    %c0_9 = arith.constant 0 : index
    %c0_10 = arith.constant 0 : index
    %c0_11 = arith.constant 0 : index
    %c0_12 = arith.constant 0 : index
    %19 = vector.load %arg5[%c0_9, %c0_10, %c0_11, %c0_12] : memref<1x4x16x8xf32, #tpu.memory_space<vmem>>, vector<1x4x16x8xf32>
    tpu.vector_store %arg5[%c0_9, %c0_10, %c0_11, %c0_12], %18 {strides = array<i32>} : memref<1x4x16x8xf32, #tpu.memory_space<vmem>>, vector<1x4x16x8xf32>,
    return
  }
  func.func @transform_0(%arg0: i32, %arg1: i32) -> (i32, i32, i32, i32) {
    %c0_i32 = arith.constant 0 : i32
    %c0_i32_0 = arith.constant 0 : i32
    %c0_i32_1 = arith.constant 0 : i32
    return %arg0, %arg1, %c0_i32, %c0_i32_0 : i32, i32, i32, i32
  }
  func.func @transform_1(%arg0: i32, %arg1: i32) -> (i32, i32) {
    %c0_i32 = arith.constant 0 : i32
    %c0_i32_0 = arith.constant 0 : i32
    %c0_i32_1 = arith.constant 0 : i32
    return %c0_i32, %c0_i32_0 : i32, i32
  }
  func.func @transform_2(%arg0: i32, %arg1: i32) -> (i32, i32) {
    %c0_i32 = arith.constant 0 : i32
    %c0_i32_0 = arith.constant 0 : i32
    %c0_i32_1 = arith.constant 0 : i32
    return %c0_i32, %c0_i32_0 : i32, i32
  }
  func.func @transform_3(%arg0: i32, %arg1: i32) -> (i32, i32, i32, i32) {
    %c0_i32 = arith.constant 0 : i32
    %c0_i32_0 = arith.constant 0 : i32
    %c0_i32_1 = arith.constant 0 : i32
    return %arg0, %arg1, %c0_i32, %c0_i32_0 : i32, i32, i32, i32
  }
}

</mosaic_0001>

<bundles_post_ra>
// kernel: _lambda_.4
= control target key start
LH: loop header
LB: loop body
LE: loop exit
PB: predicated region body
PF: predicated region fallthrough
CT: control target
= control target key end

     0   :  { %s879_s15 = smov 0   ;;  %s881_s16 = smov 0   ;;  %s1003_s0 = inlined_call_operand.vmem [shape: f32[2,16,16,4], index: 0, kind: input, shape index: {}]   ;;  %s1004_s1 = inlined_call_operand.vmem [shape: f32[2,16,16,4], index: 1, kind: input, shape index: {}]   ;;  %s1005_s2 = inlined_call_operand.vmem [shape: f32[8,4], index: 2, kind: input, shape index: {}]   ;;  %s1006_s3 = inlined_call_operand.vmem [shape: f32[2,16,16,4], index: 3, kind: output, shape index: {0}]   ;;  %s1007_s4 = inlined_call_operand.vmem [shape: f32[2,4,2,4], index: 4, kind: output, shape index: {1}]  }
   0x1   :  { %s883_s17 = smov 0   ;;  %s885_s18 = smov 0  }
   0x2   :  { %s887_s19 = smov 0  }
   0x3 LB: > { %s24_s20 = sadd.s32 1, %s843_s17  ;;  %s27_s21 = sadd.s32 1, %s847_s18  ;;  %s851_s19 = sphi %s887_s19, %s15_s19   ;;  %s847_s18 = sphi %s885_s18, %s1011_s18   ;;  %s843_s17 = sphi %s883_s17, %s1010_s17   ;;  %s839_s16 = sphi %s881_s16, %s1009_s16   ;;  %s835_s15 = sphi %s879_s15, %s1008_s15  }
   0x4   : > { %p25_p0 = scmp.ge.s32.totalorder %s24_s20, 4  ;;  %p722_p1 = scmp.ge.s32.totalorder %s851_s19, 1 }
   0x5   : > { %p207_p2 = scmp.lt.s32.totalorder %s851_s19, 9 }
   0x6   : > { %s1013_s20 = smov (%p25_p0, %s24_s20), 0  ;;  %s1015_s21 = smov (!%p25_p0, %s27_s21), %s847_s18 }
   0x7   : > { %p208_p3 = pnand %p722_p1, %p207_p2  ;;  %p29_p4 = scmp.ge.s32.totalorder %s1015_s21, 2 }
   0x8   : > { %s723_s22 = sshll.u32 (!%p208_p3), %s835_s15, 2  ;;  %p262_p5 = scmp.lt.s32.totalorder (!%p208_p3), %s839_s16, 1  ;;  %v359_v0 = vld [vmem:[%s1005_s2] sm:$0xff] (!%p208_p3)  ;;  %vm350_vm0 = vcmask (!%p208_p3), 31744   ;;  %vm360_vm1 = vcmask (!%p208_p3), 64512   ;;  %vm519_vm2 = vcmask (!%p208_p3), 24576  }
   0x9   : > { %s1017_s21 = smov (%p29_p4, %s1015_s21), 0  ;;  %211 = sbr.rel (%p208_p3) target bundleno = 387 (0x183), region = 32 }
   0xa   : > { %p264_p6 = scmp.lt.s32.totalorder (!%p208_p3), %s723_s22, 15  ;;  %756 = vmatprep.subr.mxu0 (!%p208_p3), %v359_v0  ;;  %770 = vmatprep.subr.mxu1 (!%p208_p3), %v359_v0  ;;  %s853_s6 = smov (!%p208_p3), 4  }
   0xb   : > { %757 = vmatpush3.msra.mxu0 (!%p208_p3), %v359_v0  ;;  %771 = vmatpush3.msra.mxu1 (!%p208_p3), %v359_v0  ;;  %p296_p7 = scmp.lt.s32.totalorder (!%p208_p3), %s835_s15, 3 }
  0x10   : > { %s1019_s16 = smov (!%p262_p5, %s839_s16), 1  ;;  %s1021_s22 = smov (!%p264_p6, %s723_s22), 15 }
  0x11   : > { %s725_s25 = sshll.u32 %s1019_s16, 5  ;;  %s724_s26 = sshll.u32 %s1021_s22, 1 }
  0x12   : > { %s268_s27 = sadd.s32 %s725_s25, %s724_s26  ;;  %s1023_s15 = smov (!%p296_p7, %s835_s15), 3 }
  0x13   : > { %s918_s28 = sshll.u32 %s268_s27, 3  ;;  %s735_s13 = sshll.u32 %s1019_s16, 2 }
  0x14   : > { %s281_s5 = scalar_lea.vmem %s1004_s1, %s918_s28  ;;  %s270_s9 = scalar_lea.vmem %s1003_s0, %s918_s28 }
  0x15   : > { %v310_v1 = vld [vmem:[%s281_s5] sm:$0xff]  ;;  %v312_v2 = vld [vmem:[%s281_s5 + $0x10] sm:$0xff]  ;;  %v311_v3 = vld [vmem:[%s281_s5 + $0x8] sm:$0xff]  ;;  %s948_s12 = scalar_lea.vmem %s1006_s3, %s918_s28  ;;  %s299_s14 = sadd.s32 %s735_s13, %s1023_s15 }
  0x16   : > { %326 = vrot.lane.b32.xlu0 %v310_v1, %s853_s6  ;;  %330 = vrot.lane.b32.xlu1 %v312_v2, %s853_s6  ;;  %v313_v4 = vld [vmem:[%s281_s5 + $0x18] sm:$0xff]  ;;  %v314_v5 = vld [vmem:[%s281_s5 + $0x20] sm:$0xff]  ;;  %s736_s22 = sshll.u32 %s299_s14, 1 }
  0x17   : > { %v315_v6 = vld [vmem:[%s281_s5 + $0x28] sm:$0xff]  ;;  %v316_v7 = vld [vmem:[%s281_s5 + $0x30] sm:$0xff]  ;;  %v317_v8 = vld [vmem:[%s281_s5 + $0x38] sm:$0xff]  ;;  %s301_s25 = scalar_lea.vmem %s1007_s4, %s736_s22 }
  0x18   : > { %v302_v9 = vld [vmem:[%s270_s9] sm:$0xff]  ;;  %v304_v13 = vld [vmem:[%s270_s9 + $0x10] sm:$0xff]  ;;  %v303_v14 = vld [vmem:[%s270_s9 + $0x8] sm:$0xff] }
  0x19   : > { %v305_v18 = vld [vmem:[%s270_s9 + $0x18] sm:$0xff]  ;;  %v307_v20 = vld [vmem:[%s270_s9 + $0x28] sm:$0xff]  ;;  %v306_v21 = vld [vmem:[%s270_s9 + $0x20] sm:$0xff] }
  0x1a   : > { %328 = vrot.lane.b32.xlu0 %v311_v3, %s853_s6  ;;  %332 = vrot.lane.b32.xlu1 %v313_v4, %s853_s6  ;;  %v308_v27 = vld [vmem:[%s270_s9 + $0x30] sm:$0xff]  ;;  %v309_v28 = vld [vmem:[%s270_s9 + $0x38] sm:$0xff] }
  0x1e   : > { %334 = vrot.lane.b32.xlu0 %v314_v5, %s853_s6  ;;  %336 = vrot.lane.b32.xlu1 %v315_v6, %s853_s6 }
  0x22   : > { %338 = vrot.lane.b32.xlu0 %v316_v7, %s853_s6  ;;  %340 = vrot.lane.b32.xlu1 %v317_v8, %s853_s6 }
  0x88   : > { %v327_v10 = vpop.permute.xlu0 %326  ;;  %v331_v11 = vpop.permute.xlu1 %330 }
  0x89   : > { %v351_v12 = vsel %vm350_vm0, %v302_v9, %v327_v10  ;;  %v353_v15 = vsel %vm350_vm0, %v304_v13, %v331_v11 }
  0x8a   : > { %758 = vmatprep.mubr.msk.f32.mxu0 %vm360_vm1, %v351_v12 }
  0x8c   : > { %v329_v16 = vpop.permute.xlu0 %328  ;;  %v333_v17 = vpop.permute.xlu1 %332 }
  0x8d   : > { %v352_v19 = vsel %vm350_vm0, %v303_v14, %v329_v16  ;;  %v354_v22 = vsel %vm350_vm0, %v305_v18, %v333_v17 }
  0x8e   : > { %759 = vmatmul.mubr.msk.f32.vlgmr.msra.gmra.mrb[0].mxu0 %vm360_vm1, %v352_v19 }
  0x8f   : > { %761 = vmatprep.mubr.msk.f32.mxu0 %vm360_vm1, %v353_v15 }
  0x90   : > { %v335_v23 = vpop.permute.xlu0 %334  ;;  %v337_v24 = vpop.permute.xlu1 %336 }
  0x91   : > { %v356_v25 = vsel %vm350_vm0, %v307_v20, %v337_v24  ;;  %v355_v26 = vsel %vm350_vm0, %v306_v21, %v335_v23 }
  0x92   : > { %762 = vmatmul.mubr.msk.f32.gmra.mrb[2].mxu0 %vm360_vm1, %v354_v22  ;;  %764 = vmatprep.mubr.msk.f32.mxu1 %vm360_vm1, %v355_v26 }
  0x93   : > { %765 = vmatmul.mubr.msk.f32.vlgmr.msra.gmra.mrb[0].mxu1 %vm360_vm1, %v356_v25 }
  0x94   : > { %v339_v29 = vpop.permute.xlu0 %338  ;;  %v341_v30 = vpop.permute.xlu1 %340 }
  0x95   : > { %v357_v31 = vsel %vm350_vm0, %v308_v27, %v339_v29  ;;  %v358_v32 = vsel %vm350_vm0, %v309_v28, %v341_v30 }
  0x96   : > { %767 = vmatprep.mubr.msk.f32.mxu1 %vm360_vm1, %v357_v31 }
  0x97   : > { %768 = vmatmul.mubr.msk.f32.gmra.mrb[2].mxu1 %vm360_vm1, %v358_v32 }
 0x161   : > { %v760_v33 = vpop.f32.mrb[0].mxu0 }
 0x162   : > { %491 = vst.msk [vmem:[%s948_s12 + $0x8] sm:$0xff] %vm350_vm0, %v760_v33  ;;  %v499_v34 = vsel %vm350_vm0, %v760_v33, 0.0  ;;  %v522_v35 = vmul.f32 %v760_v33, %v760_v33  ;;  %v451_v36 = vpop.f32.mrb[1].mxu0 }
 0x163   : > { %490 = vst.msk [vmem:[%s948_s12] sm:$0xff] %vm350_vm0, %v451_v36  ;;  %v498_v37 = vsel %vm350_vm0, %v451_v36, 0.0  ;;  %v521_v38 = vmul.f32 %v451_v36, %v451_v36 }
 0x164   : > { %v530_v39 = vsel %vm350_vm0, %v522_v35, 0.0  ;;  %v500_v40 = vadd.f32 %v499_v34, %v498_v37 }
 0x165   : > { %v529_v41 = vsel %vm350_vm0, %v521_v38, 0.0  ;;  %v763_v42 = vpop.f32.mrb[2].mxu0 }
 0x166   : > { %v531_v43 = vadd.f32 %v530_v39, %v529_v41  ;;  %493 = vst.msk [vmem:[%s948_s12 + $0x18] sm:$0xff] %vm350_vm0, %v763_v42  ;;  %v461_v44 = vpop.f32.mrb[3].mxu0  ;;  %v766_v45 = vpop.f32.mrb[0].mxu1  ;;  %v524_v46 = vmul.f32 %v763_v42, %v763_v42  ;;  %v503_v52 = vsel %vm350_vm0, %v763_v42, 0.0 }
 0x167   : > { %492 = vst.msk [vmem:[%s948_s12 + $0x10] sm:$0xff] %vm350_vm0, %v461_v44  ;;  %v501_v47 = vsel %vm350_vm0, %v461_v44, 0.0  ;;  %v523_v48 = vmul.f32 %v461_v44, %v461_v44  ;;  %495 = vst.msk [vmem:[%s948_s12 + $0x28] sm:$0xff] %vm350_vm0, %v766_v45  ;;  %v471_v49 = vpop.f32.mrb[1].mxu1  ;;  %v526_v59 = vmul.f32 %v766_v45, %v766_v45  ;;  %v507_v1 = vsel %vm350_vm0, %v766_v45, 0.0 }
 0x168   : > { %v502_v50 = vadd.f32 %v501_v47, %v500_v40  ;;  %494 = vst.msk [vmem:[%s948_s12 + $0x20] sm:$0xff] %vm350_vm0, %v471_v49  ;;  %v525_v51 = vmul.f32 %v471_v49, %v471_v49  ;;  %v505_v54 = vsel %vm350_vm0, %v471_v49, 0.0  ;;  %v534_v58 = vsel %vm350_vm0, %v524_v46, 0.0 }
 0x169   : > { %v532_v53 = vsel %vm350_vm0, %v523_v48, 0.0  ;;  %v538_v5 = vsel %vm350_vm0, %v526_v59, 0.0 }
 0x16a   : > { %v504_v55 = vadd.f32 %v503_v52, %v502_v50  ;;  %v533_v56 = vadd.f32 %v532_v53, %v531_v43  ;;  %v769_v57 = vpop.f32.mrb[2].mxu1  ;;  %v536_v60 = vsel %vm350_vm0, %v525_v51, 0.0 }
 0x16b   : > { %497 = vst.msk [vmem:[%s948_s12 + $0x38] sm:$0xff] %vm350_vm0, %v769_v57  ;;  %v481_v61 = vpop.f32.mrb[3].mxu1  ;;  %v528_v6 = vmul.f32 %v769_v57, %v769_v57  ;;  %v511_v10 = vsel %vm350_vm0, %v769_v57, 0.0 }
 0x16c   : > { %v535_v62 = vadd.f32 %v534_v58, %v533_v56  ;;  %v506_v63 = vadd.f32 %v505_v54, %v504_v55  ;;  %496 = vst.msk [vmem:[%s948_s12 + $0x30] sm:$0xff] %vm350_vm0, %v481_v61  ;;  %v527_v0 = vmul.f32 %v481_v61, %v481_v61  ;;  %v509_v2 = vsel %vm350_vm0, %v481_v61, 0.0 }
 0x16d   : > { %v542_v13 = vsel %vm350_vm0, %v528_v6, 0.0 }
 0x16e   : > { %v537_v3 = vadd.f32 %v536_v60, %v535_v62  ;;  %v508_v4 = vadd.f32 %v507_v1, %v506_v63  ;;  %v540_v7 = vsel %vm350_vm0, %v527_v0, 0.0 }
 0x170   : > { %v510_v8 = vadd.f32 %v509_v2, %v508_v4  ;;  %v539_v9 = vadd.f32 %v538_v5, %v537_v3 }
 0x172   : > { %v512_v11 = vadd.f32 %v511_v10, %v510_v8  ;;  %v541_v12 = vadd.f32 %v540_v7, %v539_v9 }
 0x174   : > { %v513_v14 = vrot.slane %v512_v11, 4  ;;  %v543_v15 = vadd.f32 %v542_v13, %v541_v12 }
 0x176   : > { %v514_v16 = vadd.f32 %v513_v14, %v512_v11  ;;  %v544_v17 = vrot.slane %v543_v15, 4 }
 0x178   : > { %v515_v18 = vrot.slane %v514_v16, 2  ;;  %v545_v19 = vadd.f32 %v544_v17, %v543_v15 }
 0x17a   : > { %v516_v20 = vadd.f32 %v515_v18, %v514_v16  ;;  %v546_v21 = vrot.slane %v545_v19, 2 }
 0x17c   : > { %v517_v22 = vrot.slane %v516_v20, 1  ;;  %v547_v23 = vadd.f32 %v546_v21, %v545_v19 }
 0x17e   : > { %v518_v24 = vadd.f32 %v517_v22, %v516_v20  ;;  %v548_v25 = vrot.slane %v547_v23, 1 }
 0x180   : > { %520 = vst.msk [vmem:[%s301_s25] sm:$0x1] %vm519_vm2, %v518_v24  ;;  %v549_v26 = vadd.f32 %v548_v25, %v547_v23 }
 0x182   : > { %550 = vst.msk [vmem:[%s301_s25 + $0x1] sm:$0x1] %vm519_vm2, %v549_v26 }
 0x183 PF: > { %s15_s19 = sadd.s32 1, %s851_s19   ;;  %s1008_s15 = smov %s843_s17 }
 0x184   : > { %p12_p8 = scmp.ge.s32.totalorder %s15_s19, 10   ;;  %s1009_s16 = smov %s847_s18 }
 0x185   : > { %s1010_s17 = smov %s1013_s20  ;;  %s1011_s18 = smov %s1017_s21 }
 0x186   :  { %14 = sbr.rel (!%p12_p8) target bundleno = 3 (0x3), region = 77 }

// kernel: _lambda_.7
= control target key start
LH: loop header
LB: loop body
LE: loop exit
PB: predicated region body
PF: predicated region fallthrough
CT: control target
= control target key end

     0   :  { %s534_s12 = smov 0   ;;  %s536_s13 = smov 0   ;;  %s616_s0 = inlined_call_operand.vmem [shape: f32[2,16,16,8], index: 0, kind: input, shape index: {}]   ;;  %s617_s1 = inlined_call_operand.vmem [shape: f32[1,8], index: 1, kind: input, shape index: {}]   ;;  %s618_s2 = inlined_call_operand.vmem [shape: f32[1,8], index: 2, kind: input, shape index: {}]   ;;  %s619_s3 = inlined_call_operand.vmem [shape: f32[2,16,16,8], index: 3, kind: output, shape index: {}]  }
   0x1   :  { %s538_s14 = smov 0   ;;  %s540_s15 = smov 0  }
   0x2   :  { %s542_s16 = smov 0  }
   0x3 LB: > { %s22_s17 = sadd.s32 1, %s504_s14  ;;  %s25_s18 = sadd.s32 1, %s508_s15  ;;  %s512_s16 = sphi %s542_s16, %s13_s16   ;;  %s508_s15 = sphi %s540_s15, %s623_s15   ;;  %s504_s14 = sphi %s538_s14, %s622_s14   ;;  %s500_s13 = sphi %s536_s13, %s621_s13   ;;  %s496_s12 = sphi %s534_s12, %s620_s12  }
   0x4   : > { %p23_p0 = scmp.ge.s32.totalorder %s22_s17, 4  ;;  %p405_p1 = scmp.ge.s32.totalorder %s512_s16, 1 }
   0x5   : > { %p159_p2 = scmp.lt.s32.totalorder %s512_s16, 9 }
   0x6   : > { %s625_s17 = smov (%p23_p0, %s22_s17), 0  ;;  %s627_s18 = smov (!%p23_p0, %s25_s18), %s508_s15 }
   0x7   : > { %p160_p3 = pnand %p405_p1, %p159_p2  ;;  %p27_p4 = scmp.ge.s32.totalorder %s627_s18, 2 }
   0x8   : > { %s406_s19 = sshll.u32 (!%p160_p3), %s496_s12, 2  ;;  %p194_p5 = scmp.lt.s32.totalorder (!%p160_p3), %s500_s13, 1  ;;  %v414_v0 = vld [vmem:[%s617_s1] ss:$0 sm:$0xff] (!%p160_p3)  ;;  %vm293_vm0 = vcmask (!%p160_p3), 64512  }
   0x9   : > { %s629_s18 = smov (%p27_p4, %s627_s18), 0  ;;  %163 = sbr.rel (%p160_p3) target bundleno = 51 (0x33), region = 32 }
   0xa   : > { %p196_p6 = scmp.lt.s32.totalorder (!%p160_p3), %s406_s19, 15  ;;  %v415_v1 = vld [vmem:[%s618_s2] ss:$0 sm:$0xff] (!%p160_p3) }
  0x10   : > { %s631_s13 = smov (!%p194_p5, %s500_s13), 1  ;;  %s633_s19 = smov (!%p196_p6, %s406_s19), 15 }
  0x11   : > { %s408_s20 = sshll.u32 %s631_s13, 5  ;;  %s407_s21 = sshll.u32 %s633_s19, 1 }
  0x12   : > { %s564_s22 = sadd.s32 %s408_s20, %s407_s21 }
  0x13   : > { %s409_s23 = sshll.u32 %s564_s22, 3 }
  0x14   : > { %s202_s28 = scalar_lea.vmem %s616_s0, %s409_s23  ;;  %s583_s6 = scalar_lea.vmem %s619_s3, %s409_s23 }
  0x15   : > { %v215_v2 = vld [vmem:[%s202_s28] sm:$0xff]  ;;  %v216_v3 = vld [vmem:[%s202_s28 + $0x8] sm:$0xff]  ;;  %v217_v4 = vld [vmem:[%s202_s28 + $0x10] sm:$0xff] }
  0x16   : > { %v230_v5 = vmul.f32 %v414_v0, %v215_v2  ;;  %v231_v6 = vmul.f32 %v414_v0, %v216_v3  ;;  %v232_v7 = vmul.f32 %v414_v0, %v217_v4  ;;  %v218_v8 = vld [vmem:[%s202_s28 + $0x18] sm:$0xff]  ;;  %v219_v9 = vld [vmem:[%s202_s28 + $0x20] sm:$0xff]  ;;  %v220_v10 = vld [vmem:[%s202_s28 + $0x28] sm:$0xff] }
  0x17   : > { %v233_v11 = vmul.f32 %v414_v0, %v218_v8  ;;  %v234_v12 = vmul.f32 %v414_v0, %v219_v9  ;;  %v235_v13 = vmul.f32 %v414_v0, %v220_v10  ;;  %v221_v14 = vld [vmem:[%s202_s28 + $0x30] sm:$0xff]  ;;  %v222_v15 = vld [vmem:[%s202_s28 + $0x38] sm:$0xff] }
  0x18   : > { %v245_v16 = vadd.f32 %v415_v1, %v230_v5  ;;  %v246_v17 = vadd.f32 %v415_v1, %v231_v6  ;;  %v247_v18 = vadd.f32 %v415_v1, %v232_v7  ;;  %v236_v19 = vmul.f32 %v414_v0, %v221_v14 }
  0x19   : > { %v248_v20 = vadd.f32 %v415_v1, %v233_v11  ;;  %v249_v21 = vadd.f32 %v415_v1, %v234_v12  ;;  %v250_v22 = vadd.f32 %v415_v1, %v235_v13  ;;  %v237_v23 = vmul.f32 %v414_v0, %v222_v15 }
  0x1a   : > { %v261_v24 = vmul.f32 0.70710677, %v245_v16  ;;  %v262_v25 = vmul.f32 0.70710677, %v246_v17  ;;  %v263_v26 = vmul.f32 0.70710677, %v247_v18  ;;  %v251_v30 = vadd.f32 %v415_v1, %v236_v19 }
  0x1b   : > { %v264_v27 = vmul.f32 0.70710677, %v248_v20  ;;  %v265_v28 = vmul.f32 0.70710677, %v249_v21  ;;  %v266_v29 = vmul.f32 0.70710677, %v250_v22  ;;  %v252_v31 = vadd.f32 %v415_v1, %v237_v23 }
  0x1c   : > { %458 = verf.f32 %v261_v24  ;;  %v267_v32 = vmul.f32 0.70710677, %v251_v30  ;;  %v253_v34 = vmul.f32 0.5, %v245_v16  ;;  %v254_v36 = vmul.f32 0.5, %v246_v17 }
  0x1d   : > { %460 = verf.f32 %v262_v25  ;;  %v268_v33 = vmul.f32 0.70710677, %v252_v31  ;;  %v255_v39 = vmul.f32 0.5, %v247_v18  ;;  %v256_v42 = vmul.f32 0.5, %v248_v20 }
  0x1e   : > { %462 = verf.f32 %v263_v26  ;;  %v257_v46 = vmul.f32 0.5, %v249_v21  ;;  %v258_v50 = vmul.f32 0.5, %v250_v22  ;;  %v259_v54 = vmul.f32 0.5, %v251_v30 }
  0x1f   : > { %464 = verf.f32 %v264_v27  ;;  %v260_v58 = vmul.f32 0.5, %v252_v31 }
  0x20   : > { %466 = verf.f32 %v265_v28 }
  0x21   : > { %468 = verf.f32 %v266_v29 }
  0x22   : > { %470 = verf.f32 %v267_v32 }
  0x23   : > { %472 = verf.f32 %v268_v33 }
  0x26   : > { %v459_v35 = vpop.eup %458 }
  0x27   : > { %v461_v37 = vpop.eup %460  ;;  %v277_v38 = vadd.f32 1.0, %v459_v35 }
  0x28   : > { %v463_v40 = vpop.eup %462  ;;  %v278_v41 = vadd.f32 1.0, %v461_v37 }
  0x29   : > { %v465_v43 = vpop.eup %464  ;;  %v285_v44 = vmul.f32 %v277_v38, %v253_v34  ;;  %v279_v45 = vadd.f32 1.0, %v463_v40 }
  0x2a   : > { %v467_v47 = vpop.eup %466  ;;  %v286_v48 = vmul.f32 %v278_v41, %v254_v36  ;;  %v280_v49 = vadd.f32 1.0, %v465_v43 }
  0x2b   : > { %v469_v51 = vpop.eup %468  ;;  %294 = vst.msk [vmem:[%s583_s6] sm:$0xff] %vm293_vm0, %v285_v44  ;;  %v287_v52 = vmul.f32 %v279_v45, %v255_v39  ;;  %v281_v53 = vadd.f32 1.0, %v467_v47 }
  0x2c   : > { %v471_v55 = vpop.eup %470  ;;  %295 = vst.msk [vmem:[%s583_s6 + $0x8] sm:$0xff] %vm293_vm0, %v286_v48  ;;  %v288_v56 = vmul.f32 %v280_v49, %v256_v42  ;;  %v282_v57 = vadd.f32 1.0, %v469_v51 }
  0x2d   : > { %v473_v59 = vpop.eup %472  ;;  %296 = vst.msk [vmem:[%s583_s6 + $0x10] sm:$0xff] %vm293_vm0, %v287_v52  ;;  %v289_v60 = vmul.f32 %v281_v53, %v257_v46  ;;  %v283_v61 = vadd.f32 1.0, %v471_v55 }
  0x2e   : > { %297 = vst.msk [vmem:[%s583_s6 + $0x18] sm:$0xff] %vm293_vm0, %v288_v56  ;;  %v290_v62 = vmul.f32 %v282_v57, %v258_v50  ;;  %v284_v63 = vadd.f32 1.0, %v473_v59 }
  0x2f   : > { %298 = vst.msk [vmem:[%s583_s6 + $0x20] sm:$0xff] %vm293_vm0, %v289_v60  ;;  %v291_v0 = vmul.f32 %v283_v61, %v259_v54 }
  0x30   : > { %299 = vst.msk [vmem:[%s583_s6 + $0x28] sm:$0xff] %vm293_vm0, %v290_v62  ;;  %v292_v1 = vmul.f32 %v284_v63, %v260_v58 }
  0x31   : > { %300 = vst.msk [vmem:[%s583_s6 + $0x30] sm:$0xff] %vm293_vm0, %v291_v0 }
  0x32   : > { %301 = vst.msk [vmem:[%s583_s6 + $0x38] sm:$0xff] %vm293_vm0, %v292_v1 }
  0x33 PF: > { %s13_s16 = sadd.s32 1, %s512_s16   ;;  %s620_s12 = smov %s504_s14 }
  0x34   : > { %p10_p7 = scmp.ge.s32.totalorder %s13_s16, 10   ;;  %s621_s13 = smov %s508_s15 }
  0x35   : > { %s622_s14 = smov %s625_s17  ;;  %s623_s15 = smov %s629_s18 }
  0x36   :  { %12 = sbr.rel (!%p10_p7) target bundleno = 3 (0x3), region = 62 }

// kernel: _lambda_.6
= control target key start
LH: loop header
LB: loop body
LE: loop exit
PB: predicated region body
PF: predicated region fallthrough
CT: control target
= control target key end

     0   :  { %s1711_s24 = smov 0   ;;  %s1713_s25 = smov 0   ;;  %s2076_s0 = inlined_call_operand.vmem [shape: f32[2,16,16,4], index: 0, kind: input, shape index: {}, may-alias: {0,1,2}]   ;;  %s2077_s1 = inlined_call_operand.vmem [shape: f32[2,16,16,4], index: 1, kind: input, shape index: {}, may-alias: {0,1,2}]   ;;  %s2078_s2 = inlined_call_operand.vmem [shape: f32[2,16,16,4], index: 2, kind: input, shape index: {}, may-alias: {0,1,2}]   ;;  %s2079_s3 = inlined_call_operand.vmem [shape: f32[1,4], index: 3, kind: input, shape index: {}]   ;;  %s2080_s4 = inlined_call_operand.vmem [shape: f32[1,4], index: 4, kind: input, shape index: {}]   ;;  %s2081_s5 = inlined_call_operand.vmem [shape: f32[36,8], index: 5, kind: input, shape index: {}]   ;;  %s2082_s6 = inlined_call_operand.vmem [shape: f32[2,16,16,8], index: 6, kind: output, shape index: {0}]   ;;  %s2083_s7 = inlined_call_operand.vmem [shape: f32[2,4,2,8], index: 7, kind: output, shape index: {1}]  }
   0x1   :  { %s1715_s26 = smov 0   ;;  %s1717_s27 = smov 0  }
   0x2   :  { %s1719_s28 = smov 0  }
   0x3 LB: > { %s27_s29 = sadd.s32 1, %s1650_s26  ;;  %s30_s30 = sadd.s32 1, %s1654_s27  ;;  %s1658_s28 = sphi %s1719_s28, %s18_s28   ;;  %s1654_s27 = sphi %s1717_s27, %s2092_s27   ;;  %s1650_s26 = sphi %s1715_s26, %s2091_s26   ;;  %s1646_s25 = sphi %s1713_s25, %s2090_s25   ;;  %s1642_s24 = sphi %s1711_s24, %s2089_s24  }
   0x4   : > { %p28_p0 = scmp.ge.s32.totalorder %s27_s29, 4  ;;  %p1443_p1 = scmp.ge.s32.totalorder %s1658_s28, 1 }
   0x5   : > { %p328_p2 = scmp.lt.s32.totalorder %s1658_s28, 9 }
   0x6   : > { %s2094_s29 = smov (%p28_p0, %s27_s29), 0  ;;  %s2096_s30 = smov (!%p28_p0, %s30_s30), %s1654_s27 }
   0x7   : > { %2084 = sst [smem:[#allocation4_spill]] %s2094_s29  ;;  %p329_p3 = pnand %p1443_p1, %p328_p2 }
   0x8   : > { %p32_p4 = scmp.ge.s32.totalorder %s2096_s30, 2  ;;  %vm470_vm0 = vcmask (!%p329_p3), 24576   ;;  %s1746_s8 = sshll.u32 (!%p329_p3), %s1642_s24, 2  ;;  %v1660_v0 = vmov (!%p329_p3), 0.0   ;;  %v1775_v1 = vld [vmem:[%s2079_s3] ss:$0 sm:$0xff] (!%p329_p3) }
   0x9   : > { %332 = sbr.rel (%p329_p3) target bundleno = 581 (0x245), region = 44  ;;  %p408_p5 = scmp.lt.s32.totalorder (!%p329_p3), %s1646_s25, 1  ;;  %471 = vst.msk [vmem:[#allocation2] sm:$0x1] (!%p329_p3), %vm470_vm0, %v1660_v0  ;;  %472 = vst.msk [vmem:[#allocation2 + $0x18] sm:$0x1] (!%p329_p3), %vm470_vm0, %v1660_v0 }
   0xa   : > { %s2098_s30 = smov (%p32_p4, %s2096_s30), 0  ;;  %473 = vst.msk [vmem:[#allocation2 + $0x30] sm:$0x1] (!%p329_p3), %vm470_vm0, %v1660_v0  ;;  %474 = vst.msk [vmem:[#allocation2 + $0x48] sm:$0x1] (!%p329_p3), %vm470_vm0, %v1660_v0  ;;  %s1445_s9 = sadd.s32 (!%p329_p3), 4294967295, %s1746_s8 }
   0xb   : > { %2085 = sst [smem:[#allocation5_spill]] %s2098_s30  ;;  %475 = vst.msk [vmem:[#allocation2 + $0x60] sm:$0x1] (!%p329_p3), %vm470_vm0, %v1660_v0  ;;  %476 = vst.msk [vmem:[#allocation2 + $0x78] sm:$0x1] (!%p329_p3), %vm470_vm0, %v1660_v0  ;;  %p424_p6 = scmp.lt.s32.totalorder (!%p329_p3), %s1746_s8, 15 }
   0xc   : > { %477 = vst.msk [vmem:[#allocation2 + $0x11] sm:$0x1] (!%p329_p3), %vm470_vm0, %v1660_v0  ;;  %478 = vst.msk [vmem:[#allocation2 + $0x29] sm:$0x1] (!%p329_p3), %vm470_vm0, %v1660_v0  ;;  %p406_p7 = scmp.gt.s32.totalorder (!%p329_p3), %s1445_s9, 0  ;;  %p1446_p8 = scmp.lt.s32.totalorder (!%p329_p3), %s1445_s9, 15 }
   0xd   : > { %479 = vst.msk [vmem:[#allocation2 + $0x41] sm:$0x1] (!%p329_p3), %vm470_vm0, %v1660_v0  ;;  %480 = vst.msk [vmem:[#allocation2 + $0x59] sm:$0x1] (!%p329_p3), %vm470_vm0, %v1660_v0  ;;  %s1495_s11 = sadd.s32 (!%p329_p3), 4, %s1746_s8  ;;  %p462_p10 = scmp.lt.s32.totalorder (!%p329_p3), %s1642_s24, 3 }
   0xe   : > { %481 = vst.msk [vmem:[#allocation2 + $0x71] sm:$0x1] (!%p329_p3), %vm470_vm0, %v1660_v0  ;;  %482 = vst.msk [vmem:[#allocation2 + $0x89] sm:$0x1] (!%p329_p3), %vm470_vm0, %v1660_v0  ;;  %p1761_p9 = scmp.lt.s32.totalorder (!%p329_p3), %s1495_s11, 15  ;;  %vm560_vm1 = vcmask (!%p329_p3), 31744  }
   0xf   : > { %v1788_v2 = vld [vmem:[%s2080_s4] ss:$0 sm:$0xff] (!%p329_p3)  ;;  %p1473_p11 = scmp.le.s32.totalorder (!%p329_p3), %s1642_s24, 0 }
  0x10   : > { %s2100_s25 = smov (!%p408_p5, %s1646_s25), 1  ;;  %s2102_s9 = smov (!%p406_p7, %s1445_s9), 0 }
  0x11   : > { %s1757_s10 = sshll.u32 %s2100_s25, 5  ;;  %s2104_s9 = smov (!%p1446_p8, %s2102_s9), 15 }
  0x12   : > { %s2106_s8 = smov (!%p424_p6, %s1746_s8), 15  ;;  %s1451_s12 = sshll.u32 %s2104_s9, 1 }
  0x13   : > { %s414_s14 = sadd.s32 %s1757_s10, %s1451_s12  ;;  %s1455_s15 = sshll.u32 %s2106_s8, 1 }
  0x14   : > { %s1453_s16 = sshll.u32 %s414_s14, 3  ;;  %s428_s17 = sadd.s32 %s1455_s15, %s1757_s10 }
  0x15   : > { %s1770_s20 = scalar_lea.vmem %s2076_s0, %s1453_s16  ;;  %s1457_s21 = sshll.u32 %s428_s17, 3 }
  0x16   : > { %s430_s29 = scalar_lea.vmem %s2077_s1, %s1457_s21  ;;  %s1783_s14 = scalar_lea.vmem %s2082_s6, %s1457_s21 }
  0x17   : > { %s2108_s11 = smov (!%p1761_p9, %s1495_s11), 15  ;;  %v483_v3 = vld [vmem:[%s430_s29] sm:$0xff]  ;;  %v484_v4 = vld [vmem:[%s430_s29 + $0x8] sm:$0xff]  ;;  %v485_v5 = vld [vmem:[%s430_s29 + $0x10] sm:$0xff]  ;;  %s1469_s30 = sshll.u32 %s2100_s25, 2 }
  0x18   : > { %v497_v6 = vmul.f32 %v1775_v1, %v483_v3  ;;  %v498_v7 = vmul.f32 %v1775_v1, %v484_v4  ;;  %v499_v8 = vmul.f32 %v1775_v1, %v485_v5  ;;  %v486_v9 = vld [vmem:[%s430_s29 + $0x18] sm:$0xff]  ;;  %v487_v10 = vld [vmem:[%s430_s29 + $0x20] sm:$0xff]  ;;  %v488_v11 = vld [vmem:[%s430_s29 + $0x28] sm:$0xff]  ;;  %s2110_s11 = smov (!%p1761_p9, %s2108_s11), 15 }
  0x19   : > { %v500_v12 = vmul.f32 %v1775_v1, %v486_v9  ;;  %v501_v13 = vmul.f32 %v1775_v1, %v487_v10  ;;  %v502_v14 = vmul.f32 %v1775_v1, %v488_v11  ;;  %v489_v15 = vld [vmem:[%s430_s29 + $0x30] sm:$0xff]  ;;  %v490_v16 = vld [vmem:[%s430_s29 + $0x38] sm:$0xff]  ;;  %s463_s25 = scalar_select %p462_p10, %s1642_s24, 3 }
  0x1a   : > { %v511_v17 = vadd.f32 %v1788_v2, %v497_v6  ;;  %v512_v18 = vadd.f32 %v1788_v2, %v498_v7  ;;  %v513_v19 = vadd.f32 %v1788_v2, %v499_v8  ;;  %v503_v20 = vmul.f32 %v1775_v1, %v489_v15  ;;  %s1462_s13 = sshll.u32 %s2110_s11, 1  ;;  %v573_v5 = vld [vmem:[%s1770_s20] sm:$0xff] (!%p1473_p11)  ;;  %v574_v6 = vld [vmem:[%s1770_s20 + $0x8] sm:$0xff] (!%p1473_p11) }
  0x1b   : > { %v514_v21 = vadd.f32 %v1788_v2, %v500_v12  ;;  %v515_v22 = vadd.f32 %v1788_v2, %v501_v13  ;;  %v516_v23 = vadd.f32 %v1788_v2, %v502_v14  ;;  %s442_s16 = sadd.s32 %s1462_s13, %s1757_s10  ;;  %s465_s17 = sadd.s32 %s1469_s30, %s463_s25  ;;  %v504_v26 = vmul.f32 %v1775_v1, %v490_v16 }
  0x1c   : > { %v527_v24 = vmul.f32 0.70710677, %v511_v17  ;;  %v528_v25 = vmul.f32 0.70710677, %v512_v18  ;;  %s1464_s29 = sshll.u32 %s442_s16, 3  ;;  %s1470_s19 = sshll.u32 %s465_s17, 1  ;;  %v517_v28 = vadd.f32 %v1788_v2, %v503_v20  ;;  %v575_v7 = vmul.f32 (!%p1473_p11), %v1775_v1, %v573_v5 }
  0x1d   : > { %v529_v27 = vmul.f32 0.70710677, %v513_v19  ;;  %s1818_s11 = scalar_lea.vmem %s2078_s2, %s1464_s29  ;;  %s1823_s12 = scalar_lea.vmem %s2083_s7, %s1470_s19  ;;  %v530_v29 = vmul.f32 0.70710677, %v514_v21  ;;  %v531_v30 = vmul.f32 0.70710677, %v515_v22  ;;  %v518_v33 = vadd.f32 %v1788_v2, %v504_v26 }
  0x1e   : > { %1596 = verf.f32 %v527_v24  ;;  %v532_v31 = vmul.f32 0.70710677, %v516_v23  ;;  %v533_v32 = vmul.f32 0.70710677, %v517_v28  ;;  %v519_v35 = vmul.f32 0.5, %v511_v17 }
  0x1f   : > { %1598 = verf.f32 %v528_v25  ;;  %v534_v34 = vmul.f32 0.70710677, %v518_v33  ;;  %v520_v37 = vmul.f32 0.5, %v512_v18  ;;  %v521_v40 = vmul.f32 0.5, %v513_v19 }
  0x20   : > { %1600 = verf.f32 %v529_v27  ;;  %v522_v43 = vmul.f32 0.5, %v514_v21  ;;  %v523_v47 = vmul.f32 0.5, %v515_v22  ;;  %v524_v51 = vmul.f32 0.5, %v516_v23 }
  0x21   : > { %1602 = verf.f32 %v530_v29  ;;  %v525_v55 = vmul.f32 0.5, %v517_v28  ;;  %v526_v59 = vmul.f32 0.5, %v518_v33  ;;  %v576_v8 = vmul.f32 (!%p1473_p11), %v1775_v1, %v574_v6 }
  0x22   : > { %1604 = verf.f32 %v531_v30  ;;  %v577_v9 = vadd.f32 (!%p1473_p11), %v1788_v2, %v575_v7 }
  0x23   : > { %1606 = verf.f32 %v532_v31  ;;  %v578_v10 = vadd.f32 (!%p1473_p11), %v1788_v2, %v576_v8 }
  0x24   : > { %1608 = verf.f32 %v533_v32  ;;  %v581_v11 = vmul.f32 (!%p1473_p11), 0.70710677, %v577_v9  ;;  %v579_v13 = vmul.f32 (!%p1473_p11), 0.5, %v577_v9 }
  0x25   : > { %1610 = verf.f32 %v534_v34  ;;  %v582_v12 = vmul.f32 (!%p1473_p11), 0.70710677, %v578_v10  ;;  %v580_v15 = vmul.f32 (!%p1473_p11), 0.5, %v578_v10 }
  0x26   : > { %1612 = verf.f32 (!%p1473_p11), %v581_v11 }
  0x27   : > { %1614 = verf.f32 (!%p1473_p11), %v582_v12 }
  0x28   : > { %v1597_v36 = vpop.eup %1596 }
  0x29   : > { %v1599_v38 = vpop.eup %1598  ;;  %v543_v39 = vadd.f32 1.0, %v1597_v36 }
  0x2a   : > { %v1601_v41 = vpop.eup %1600  ;;  %v544_v42 = vadd.f32 1.0, %v1599_v38 }
  0x2b   : > { %v1603_v44 = vpop.eup %1602  ;;  %v551_v45 = vmul.f32 %v543_v39, %v519_v35  ;;  %v545_v46 = vadd.f32 1.0, %v1601_v41 }
  0x2c   : > { %v1605_v48 = vpop.eup %1604  ;;  %v552_v49 = vmul.f32 %v544_v42, %v520_v37  ;;  %v546_v50 = vadd.f32 1.0, %v1603_v44 }
  0x2d   : > { %v1607_v52 = vpop.eup %1606  ;;  %561 = vst.msk [vmem:[#allocation2 + $0x19] sm:$0xff] %vm560_vm1, %v551_v45  ;;  %v553_v53 = vmul.f32 %v545_v46, %v521_v40  ;;  %v547_v54 = vadd.f32 1.0, %v1605_v48 }
  0x2e   : > { %v1609_v56 = vpop.eup %1608  ;;  %562 = vst.msk [vmem:[#allocation2 + $0x21] sm:$0xff] %vm560_vm1, %v552_v49  ;;  %v554_v57 = vmul.f32 %v546_v50, %v522_v43  ;;  %v548_v58 = vadd.f32 1.0, %v1607_v52  ;;  %572 = sbr.rel (%p1473_p11) target bundleno = 55 (0x37), region = 48 }
  0x2f   : > { %v1611_v60 = vpop.eup %1610  ;;  %563 = vst.msk [vmem:[#allocation2 + $0x31] sm:$0xff] %vm560_vm1, %v553_v53  ;;  %v555_v61 = vmul.f32 %v547_v54, %v523_v47  ;;  %v549_v62 = vadd.f32 1.0, %v1609_v56 }
  0x30   : > { %564 = vst.msk [vmem:[#allocation2 + $0x39] sm:$0xff] %vm560_vm1, %v554_v57  ;;  %v556_v63 = vmul.f32 %v548_v58, %v524_v51  ;;  %v550_v0 = vadd.f32 1.0, %v1611_v60  ;;  %v1613_v14 = vpop.eup (!%p1473_p11), %1612 }
  0x31   : > { %565 = vst.msk [vmem:[#allocation2 + $0x49] sm:$0xff] %vm560_vm1, %v555_v61  ;;  %v557_v3 = vmul.f32 %v549_v62, %v525_v55  ;;  %v1615_v16 = vpop.eup (!%p1473_p11), %1614  ;;  %v585_v17 = vadd.f32 (!%p1473_p11), 1.0, %v1613_v14 }
  0x32   : > { %566 = vst.msk [vmem:[#allocation2 + $0x51] sm:$0xff] %vm560_vm1, %v556_v63  ;;  %v558_v4 = vmul.f32 %v550_v0, %v526_v59  ;;  %v586_v18 = vadd.f32 (!%p1473_p11), 1.0, %v1615_v16 }
  0x33   : > { %567 = vst.msk [vmem:[#allocation2 + $0x61] sm:$0xff] %vm560_vm1, %v557_v3  ;;  %v587_v19 = vmul.f32 (!%p1473_p11), %v585_v17, %v579_v13 }
  0x34   : > { %568 = vst.msk [vmem:[#allocation2 + $0x69] sm:$0xff] %vm560_vm1, %v558_v4  ;;  %v588_v20 = vmul.f32 (!%p1473_p11), %v586_v18, %v580_v15 }
  0x35   : > { %589 = vst.msk [vmem:[#allocation2 + $0x1] sm:$0xff] %vm560_vm1, %v587_v19 }
  0x36   : > { %590 = vst.msk [vmem:[#allocation2 + $0x9] sm:$0xff] %vm560_vm1, %v588_v20 }
  0x37 PF: > { %p1474_p12 = scmp.ne.s32.totalorder %s1642_s24, 0 }
  0x38   : > { %v1661_v21 = vmov (!%p1474_p12), 0.0  }
  0x39   : > { %594 = sbr.rel (%p1474_p12) target bundleno = 64 (0x40), region = 52  ;;  %595 = vst.msk [vmem:[#allocation2 + $0x1] sm:$0xff] (!%p1474_p12), %vm560_vm1, %v1661_v21  ;;  %596 = vst.msk [vmem:[#allocation2 + $0x9] sm:$0xff] (!%p1474_p12), %vm560_vm1, %v1661_v21 }
  0x40 PF: > { %p1475_p13 = scmp.ge.s32.totalorder %s1642_s24, 3 }
  0x41   : > { %v601_v22 = vld [vmem:[%s1818_s11] sm:$0xff] (!%p1475_p13)  ;;  %v602_v23 = vld [vmem:[%s1818_s11 + $0x8] sm:$0xff] (!%p1475_p13) }
  0x42   : > { %600 = sbr.rel (%p1475_p13) target bundleno = 89 (0x59), region = 56  ;;  %v603_v24 = vmul.f32 (!%p1475_p13), %v1775_v1, %v601_v22  ;;  %v604_v25 = vmul.f32 (!%p1475_p13), %v1775_v1, %v602_v23 }
  0x44   : > { %v605_v26 = vadd.f32 (!%p1475_p13), %v1788_v2, %v603_v24  ;;  %v606_v27 = vadd.f32 (!%p1475_p13), %v1788_v2, %v604_v25 }
  0x46   : > { %v609_v28 = vmul.f32 (!%p1475_p13), 0.70710677, %v605_v26  ;;  %v610_v29 = vmul.f32 (!%p1475_p13), 0.70710677, %v606_v27  ;;  %v607_v30 = vmul.f32 (!%p1475_p13), 0.5, %v605_v26  ;;  %v608_v32 = vmul.f32 (!%p1475_p13), 0.5, %v606_v27 }
  0x48   : > { %1616 = verf.f32 (!%p1475_p13), %v609_v28 }
  0x49   : > { %1618 = verf.f32 %v610_v29 }
  0x52   : > { %v1617_v31 = vpop.eup %1616 }
  0x53   : > { %v1619_v33 = vpop.eup %1618  ;;  %v613_v34 = vadd.f32 1.0, %v1617_v31 }
  0x54   : > { %v614_v35 = vadd.f32 1.0, %v1619_v33 }
  0x55   : > { %v615_v36 = vmul.f32 %v613_v34, %v607_v30 }
  0x56   : > { %v616_v37 = vmul.f32 %v614_v35, %v608_v32 }
  0x57   : > { %618 = vst.msk [vmem:[#allocation2 + $0x79] sm:$0xff] %vm560_vm1, %v615_v36 }
  0x58   : > { %619 = vst.msk [vmem:[#allocation2 + $0x81] sm:$0xff] %vm560_vm1, %v616_v37 }
  0x59 PF: > { %p1476_p0 = scmp.ne.s32.totalorder %s1642_s24, 3 }
  0x5a   : > { %v1662_v1 = vmov (!%p1476_p0), 0.0  }
  0x5b   : > { %623 = sbr.rel (%p1476_p0) target bundleno = 98 (0x62), region = 60  ;;  %625 = vst.msk [vmem:[#allocation2 + $0x79] sm:$0xff] (!%p1476_p0), %vm560_vm1, %v1662_v1  ;;  %626 = vst.msk [vmem:[#allocation2 + $0x81] sm:$0xff] (!%p1476_p0), %vm560_vm1, %v1662_v1 }
  0x62 PF: > { %v692_v2 = vld [vmem:[#allocation2 + $0x2] sm:$0xff]  ;;  %s1663_s10 = smov 8   ;;  %s1664_s20 = smov 4   ;;  %v741_v40 = vld [vmem:[#allocation2 + $0x18] sm:$0xff]  ;;  %v693_v41 = vld [vmem:[#allocation2 + $0xa] sm:$0xff]  ;;  %vm1074_vm2 = vcmask 1043456  }
  0x63   : > { %v643_v38 = vld [vmem:[#allocation2 + $0x1] sm:$0xff]  ;;  %708 = vrot.lane.b32.xlu1 %v692_v2, %s1663_s10  ;;  %v644_v42 = vld [vmem:[#allocation2 + $0x9] sm:$0xff]  ;;  %637 = vst.msk [vmem:[#allocation3 + $0x10] sm:$0xff] %vm560_vm1, %v741_v40  ;;  %v890_v44 = vld [vmem:[#allocation2 + $0x38] sm:$0xff]  ;;  %s1665_s24 = smov 12   ;;  %s1666_s8 = smov 16  }
  0x64   : > { %659 = vrot.lane.b32.xlu0 %v643_v38, %s1664_s20  ;;  %v742_v39 = vld [vmem:[#allocation2 + $0x20] sm:$0xff]  ;;  %v889_v43 = vld [vmem:[#allocation2 + $0x30] sm:$0xff]  ;;  %v1865_v45 = vld [vmem:[#allocation2 + $0x48] sm:$0xff]  ;;  %640 = vst.msk [vmem:[#allocation3 + $0x28] sm:$0xff] %vm560_vm1, %v890_v44  ;;  %s1667_s15 = smov 20   ;;  %s1668_s18 = smov 24  }
  0x65   : > { %638 = vst.msk [vmem:[#allocation3 + $0x18] sm:$0xff] %vm560_vm1, %v742_v39  ;;  %639 = vst.msk [vmem:[#allocation3 + $0x20] sm:$0xff] %vm560_vm1, %v889_v43  ;;  %v1868_v46 = vld [vmem:[#allocation2 + $0x50] sm:$0xff]  ;;  %v627_v47 = vld [vmem:[#allocation2] sm:$0xff]  ;;  %s1669_s17 = smov 28   ;;  %s1670_s9 = smov 32  }
  0x66   : > { %641 = vst.msk [vmem:[#allocation3 + $0x30] sm:$0xff] %vm560_vm1, %v1865_v45  ;;  %642 = vst.msk [vmem:[#allocation3 + $0x38] sm:$0xff] %vm560_vm1, %v1868_v46  ;;  %v645_v48 = vld [vmem:[#allocation2 + $0x19] sm:$0xff]  ;;  %v628_v49 = vld [vmem:[#allocation2 + $0x8] sm:$0xff]  ;;  %vm683_vm3 = vcmask 64544   ;;  %vm732_vm4 = vcmask 97344  }
  0x67   : > { %710 = vrot.lane.b32.xlu1 %v693_v41, %s1663_s10  ;;  %635 = vst.msk [vmem:[#allocation3] sm:$0xff] %vm560_vm1, %v627_v47  ;;  %636 = vst.msk [vmem:[#allocation3 + $0x8] sm:$0xff] %vm560_vm1, %v628_v49  ;;  %v839_v50 = vld [vmem:[#allocation2 + $0x1a] sm:$0xff]  ;;  %v840_v52 = vld [vmem:[#allocation2 + $0x22] sm:$0xff]  ;;  %vm781_vm5 = vcmask 130144   ;;  %vm830_vm6 = vcmask 162944  }
  0x68   : > { %661 = vrot.lane.b32.xlu0 %v644_v42, %s1664_s20  ;;  %v791_v51 = vld [vmem:[#allocation2 + $0x21] sm:$0xff]  ;;  %v938_v53 = vld [vmem:[#allocation2 + $0x31] sm:$0xff]  ;;  %v939_v61 = vld [vmem:[#allocation2 + $0x39] sm:$0xff]  ;;  %vm879_vm7 = vcmask 195744   ;;  %vm929_vm8 = vcmask 228544   ;;  %vm978_vm9 = vcmask 261344  }
  0x69   : > { %v1044_v54 = vld [vmem:[%s2081_s5] sm:$0xff]  ;;  %v1045_v55 = vld [vmem:[%s2081_s5 + $0x8] sm:$0xff]  ;;  %v1046_v57 = vld [vmem:[%s2081_s5 + $0x10] sm:$0xff]  ;;  %vm1027_vm10 = vcmask 294144   ;;  %vm1049_vm11 = vcmask 293888   ;;  %vm1183_vm12 = vcmask 64512  }
  0x6a   : > { %v1531_v56 = vpack.c.bf16 %v1045_v55, %v1044_v54  ;;  %v1047_v58 = vld [vmem:[%s2081_s5 + $0x18] sm:$0xff]  ;;  %v1048_v62 = vld [vmem:[%s2081_s5 + $0x20] sm:$0xf]  ;;  %v940_v0 = vld [vmem:[#allocation2 + $0x49] sm:$0xff]  ;;  %vm1213_vm13 = vcmask 57344  }
  0x6b   : > { %759 = vrot.lane.b32.xlu1 %v742_v39, %s1665_s24  ;;  %v1535_v59 = vpack.c.bf16 %v1047_v58, %v1046_v57  ;;  %v987_v60 = vld [vmem:[#allocation2 + $0x32] sm:$0xff]  ;;  %v988_v63 = vld [vmem:[#allocation2 + $0x3a] sm:$0xff]  ;;  %v989_v3 = vld [vmem:[#allocation2 + $0x4a] sm:$0xff] }
  0x6c   : > { %757 = vrot.lane.b32.xlu0 %v741_v40, %s1665_s24  ;;  %1532 = vmatprep.subr.bf16.mxu0 %v1531_v56  ;;  %v941_v4 = vld [vmem:[#allocation2 + $0x51] sm:$0xff]  ;;  %v893_v6 = vld [vmem:[#allocation2 + $0x60] sm:$0xff]  ;;  %v894_v7 = vld [vmem:[#allocation2 + $0x68] sm:$0xff] }
  0x6d   : > { %1539 = vmatprep.subr.bf16.mxu1 %v1531_v56  ;;  %1534 = vmatpush3.bf16.msra.mxu0 %v1531_v56  ;;  %v990_v5 = vld [vmem:[#allocation2 + $0x52] sm:$0xff]  ;;  %v942_v8 = vld [vmem:[#allocation2 + $0x61] sm:$0xff]  ;;  %v943_v9 = vld [vmem:[#allocation2 + $0x69] sm:$0xff] }
  0x6e   : > { %1542 = vmatpush3.bf16.msra.mxu1 %v1531_v56  ;;  %1536 = vmatprep.subr.bf16.mxu0 %v1535_v59  ;;  %v991_v10 = vld [vmem:[#allocation2 + $0x62] sm:$0xff]  ;;  %v992_v11 = vld [vmem:[#allocation2 + $0x6a] sm:$0xff]  ;;  %v895_v12 = vld [vmem:[#allocation2 + $0x78] sm:$0xff] }
  0x6f   : > { %663 = vrot.lane.b32.xlu1 %v645_v48, %s1664_s20  ;;  %1540 = vmatprep.subr.bf16.mxu1 %v1535_v59  ;;  %v896_v13 = vld [vmem:[#allocation2 + $0x80] sm:$0xff] }
  0x70   : > { %806 = vrot.lane.b32.xlu0 %v645_v48, %s1666_s8  ;;  %v944_v16 = vld [vmem:[#allocation2 + $0x79] sm:$0xff]  ;;  %v945_v17 = vld [vmem:[#allocation2 + $0x81] sm:$0xff] }
  0x71   : > { %1538 = vmatpush3.bf16.msra.mxu0 %v1535_v59  ;;  %v993_v20 = vld [vmem:[#allocation2 + $0x7a] sm:$0xff]  ;;  %v994_v21 = vld [vmem:[#allocation2 + $0x82] sm:$0xff] }
  0x72   : > { %1543 = vmatpush3.bf16.msra.mxu1 %v1535_v59  ;;  %1517 = vmatprep.subr.msk.mxu0 %vm1074_vm2, %v1048_v62 }
  0x73   : > { %855 = vrot.lane.b32.xlu1 %v839_v50, %s1667_s15  ;;  %1541 = vmatprep.subr.msk.mxu1 %vm1074_vm2, %v1048_v62 }
  0x74   : > { %808 = vrot.lane.b32.xlu0 %v791_v51, %s1666_s8 }
  0x75   : > { %1518 = vmatpush3.msk.msra.mxu0 %vm1074_vm2, %v1048_v62 }
  0x76   : > { %1544 = vmatpush3.msk.msra.mxu1 %vm1074_vm2, %v1048_v62 }
  0x77   : > { %712 = vrot.lane.b32.xlu1 %v839_v50, %s1663_s10 }
  0x78   : > { %665 = vrot.lane.b32.xlu0 %v791_v51, %s1664_s20 }
  0x7b   : > { %905 = vrot.lane.b32.xlu1 %v889_v43, %s1668_s18 }
  0x7c   : > { %857 = vrot.lane.b32.xlu0 %v840_v52, %s1667_s15 }
  0x7f   : > { %761 = vrot.lane.b32.xlu1 %v889_v43, %s1665_s24 }
  0x80   : > { %714 = vrot.lane.b32.xlu0 %v840_v52, %s1663_s10 }
  0x83   : > { %954 = vrot.lane.b32.xlu1 %v938_v53, %s1669_s17 }
  0x84   : > { %907 = vrot.lane.b32.xlu0 %v890_v44, %s1668_s18 }
  0x87   : > { %810 = vrot.lane.b32.xlu1 %v938_v53, %s1666_s8 }
  0x88   : > { %763 = vrot.lane.b32.xlu0 %v890_v44, %s1665_s24 }
  0x8b   : > { %1003 = vrot.lane.b32.xlu1 %v987_v60, %s1670_s9 }
  0x8c   : > { %956 = vrot.lane.b32.xlu0 %v939_v61, %s1669_s17 }
  0x8f   : > { %812 = vrot.lane.b32.xlu1 %v939_v61, %s1666_s8 }
  0x90   : > { %667 = vrot.lane.b32.xlu0 %v938_v53, %s1664_s20 }
  0x93   : > { %1005 = vrot.lane.b32.xlu1 %v988_v63, %s1670_s9 }
  0x94   : > { %859 = vrot.lane.b32.xlu0 %v987_v60, %s1667_s15 }
  0x97   : > { %716 = vrot.lane.b32.xlu1 %v987_v60, %s1663_s10 }
  0x98   : > { %669 = vrot.lane.b32.xlu0 %v939_v61, %s1664_s20 }
  0x9b   : > { %909 = vrot.lane.b32.xlu1 %v1865_v45, %s1668_s18 }
  0x9c   : > { %861 = vrot.lane.b32.xlu0 %v988_v63, %s1667_s15 }
  0x9f   : > { %765 = vrot.lane.b32.xlu1 %v1865_v45, %s1665_s24 }
  0xa0   : > { %718 = vrot.lane.b32.xlu0 %v988_v63, %s1663_s10 }
  0xa3   : > { %958 = vrot.lane.b32.xlu1 %v940_v0, %s1669_s17 }
  0xa4   : > { %911 = vrot.lane.b32.xlu0 %v1868_v46, %s1668_s18 }
  0xa7   : > { %814 = vrot.lane.b32.xlu1 %v940_v0, %s1666_s8 }
  0xa8   : > { %767 = vrot.lane.b32.xlu0 %v1868_v46, %s1665_s24 }
  0xab   : > { %1007 = vrot.lane.b32.xlu1 %v989_v3, %s1670_s9 }
  0xac   : > { %960 = vrot.lane.b32.xlu0 %v941_v4, %s1669_s17 }
  0xaf   : > { %816 = vrot.lane.b32.xlu1 %v941_v4, %s1666_s8 }
  0xb0   : > { %671 = vrot.lane.b32.xlu0 %v940_v0, %s1664_s20 }
  0xb3   : > { %1009 = vrot.lane.b32.xlu1 %v990_v5, %s1670_s9 }
  0xb4   : > { %863 = vrot.lane.b32.xlu0 %v989_v3, %s1667_s15 }
  0xb7   : > { %720 = vrot.lane.b32.xlu1 %v989_v3, %s1663_s10 }
  0xb8   : > { %673 = vrot.lane.b32.xlu0 %v941_v4, %s1664_s20 }
  0xbb   : > { %913 = vrot.lane.b32.xlu1 %v893_v6, %s1668_s18 }
  0xbc   : > { %865 = vrot.lane.b32.xlu0 %v990_v5, %s1667_s15 }
  0xbf   : > { %769 = vrot.lane.b32.xlu1 %v893_v6, %s1665_s24 }
  0xc0   : > { %722 = vrot.lane.b32.xlu0 %v990_v5, %s1663_s10 }
  0xc3   : > { %962 = vrot.lane.b32.xlu1 %v942_v8, %s1669_s17 }
  0xc4   : > { %915 = vrot.lane.b32.xlu0 %v894_v7, %s1668_s18 }
  0xc7   : > { %818 = vrot.lane.b32.xlu1 %v942_v8, %s1666_s8 }
  0xc8   : > { %771 = vrot.lane.b32.xlu0 %v894_v7, %s1665_s24 }
  0xcb   : > { %1011 = vrot.lane.b32.xlu1 %v991_v10, %s1670_s9 }
  0xcc   : > { %964 = vrot.lane.b32.xlu0 %v943_v9, %s1669_s17 }
  0xcf   : > { %867 = vrot.lane.b32.xlu1 %v991_v10, %s1667_s15 }
  0xd0   : > { %820 = vrot.lane.b32.xlu0 %v943_v9, %s1666_s8 }
  0xd3   : > { %869 = vrot.lane.b32.xlu1 %v992_v11, %s1667_s15 }
  0xd4   : > { %1013 = vrot.lane.b32.xlu0 %v992_v11, %s1670_s9 }
  0xd5   : > { %v709_v14 = vpop.permute.xlu1 %708 }
  0xd6   : > { %v660_v15 = vpop.permute.xlu0 %659 }
  0xd7   : > { %684 = vst.msk [vmem:[#allocation3] sm:$0xff] %vm683_vm3, %v660_v15  ;;  %919 = vrot.lane.b32.xlu1 %v896_v13, %s1668_s18 }
  0xd8   : > { %917 = vrot.lane.b32.xlu0 %v895_v12, %s1668_s18  ;;  %733 = vst.msk [vmem:[#allocation3] sm:$0xff] %vm732_vm4, %v709_v14 }
  0xd9   : > { %v711_v18 = vpop.permute.xlu1 %710 }
  0xda   : > { %v662_v19 = vpop.permute.xlu0 %661 }
  0xdb   : > { %685 = vst.msk [vmem:[#allocation3 + $0x8] sm:$0xff] %vm683_vm3, %v662_v19  ;;  %968 = vrot.lane.b32.xlu1 %v945_v17, %s1669_s17 }
  0xdc   : > { %966 = vrot.lane.b32.xlu0 %v944_v16, %s1669_s17  ;;  %734 = vst.msk [vmem:[#allocation3 + $0x8] sm:$0xff] %vm732_vm4, %v711_v18 }
  0xdd   : > { %v760_v22 = vpop.permute.xlu1 %759 }
  0xde   : > { %v758_v23 = vpop.permute.xlu0 %757  ;;  %783 = vst.msk [vmem:[#allocation3 + $0x8] sm:$0xff] %vm781_vm5, %v760_v22 }
  0xdf   : > { %782 = vst.msk [vmem:[#allocation3] sm:$0xff] %vm781_vm5, %v758_v23  ;;  %1017 = vrot.lane.b32.xlu1 %v994_v21, %s1670_s9 }
  0xe0   : > { %1015 = vrot.lane.b32.xlu0 %v993_v20, %s1670_s9 }
  0xe1   : > { %v664_v24 = vpop.permute.xlu1 %663 }
  0xe2   : > { %v807_v25 = vpop.permute.xlu0 %806  ;;  %686 = vst.msk [vmem:[#allocation3 + $0x10] sm:$0xff] %vm683_vm3, %v664_v24 }
  0xe3   : > { %831 = vst.msk [vmem:[#allocation3] sm:$0xff] %vm830_vm6, %v807_v25 }
  0xe5   : > { %v856_v26 = vpop.permute.xlu1 %855 }
  0xe6   : > { %v809_v27 = vpop.permute.xlu0 %808  ;;  %880 = vst.msk [vmem:[#allocation3] sm:$0xff] %vm879_vm7, %v856_v26 }
  0xe7   : > { %832 = vst.msk [vmem:[#allocation3 + $0x8] sm:$0xff] %vm830_vm6, %v809_v27 }
  0xe9   : > { %v713_v28 = vpop.permute.xlu1 %712 }
  0xea   : > { %v666_v29 = vpop.permute.xlu0 %665  ;;  %735 = vst.msk [vmem:[#allocation3 + $0x10] sm:$0xff] %vm732_vm4, %v713_v28 }
  0xeb   : > { %687 = vst.msk [vmem:[#allocation3 + $0x18] sm:$0xff] %vm683_vm3, %v666_v29 }
  0xed   : > { %v906_v30 = vpop.permute.xlu1 %905 }
  0xee   : > { %v858_v31 = vpop.permute.xlu0 %857  ;;  %930 = vst.msk [vmem:[#allocation3] sm:$0xff] %vm929_vm8, %v906_v30 }
  0xef   : > { %881 = vst.msk [vmem:[#allocation3 + $0x8] sm:$0xff] %vm879_vm7, %v858_v31 }
  0xf1   : > { %v762_v32 = vpop.permute.xlu1 %761 }
  0xf2   : > { %v715_v33 = vpop.permute.xlu0 %714  ;;  %784 = vst.msk [vmem:[#allocation3 + $0x10] sm:$0xff] %vm781_vm5, %v762_v32 }
  0xf3   : > { %736 = vst.msk [vmem:[#allocation3 + $0x18] sm:$0xff] %vm732_vm4, %v715_v33 }
  0xf5   : > { %v955_v34 = vpop.permute.xlu1 %954 }
  0xf6   : > { %v908_v35 = vpop.permute.xlu0 %907  ;;  %979 = vst.msk [vmem:[#allocation3] sm:$0xff] %vm978_vm9, %v955_v34 }
  0xf7   : > { %931 = vst.msk [vmem:[#allocation3 + $0x8] sm:$0xff] %vm929_vm8, %v908_v35 }
  0xf9   : > { %v811_v36 = vpop.permute.xlu1 %810 }
  0xfa   : > { %v764_v37 = vpop.permute.xlu0 %763  ;;  %833 = vst.msk [vmem:[#allocation3 + $0x10] sm:$0xff] %vm830_vm6, %v811_v36 }
  0xfb   : > { %785 = vst.msk [vmem:[#allocation3 + $0x18] sm:$0xff] %vm781_vm5, %v764_v37 }
  0xfd   : > { %v1004_v1 = vpop.permute.xlu1 %1003 }
  0xfe   : > { %v957_v2 = vpop.permute.xlu0 %956  ;;  %1028 = vst.msk [vmem:[#allocation3] sm:$0xff] %vm1027_vm10, %v1004_v1 }
  0xff   : > { %980 = vst.msk [vmem:[#allocation3 + $0x8] sm:$0xff] %vm978_vm9, %v957_v2 }
 0x101   : > { %v813_v38 = vpop.permute.xlu1 %812 }
 0x102   : > { %v668_v39 = vpop.permute.xlu0 %667  ;;  %834 = vst.msk [vmem:[#allocation3 + $0x18] sm:$0xff] %vm830_vm6, %v813_v38 }
 0x103   : > { %688 = vst.msk [vmem:[#allocation3 + $0x20] sm:$0xff] %vm683_vm3, %v668_v39 }
 0x105   : > { %v1006_v40 = vpop.permute.xlu1 %1005  ;;  %v1036_v42 = vld [vmem:[#allocation3] sm:$0xff] }
 0x106   : > { %v860_v41 = vpop.permute.xlu0 %859  ;;  %1029 = vst.msk [vmem:[#allocation3 + $0x8] sm:$0xff] %vm1027_vm10, %v1006_v40  ;;  %1519 = vmatprep.mubr.msk.f32.mxu0 %vm1049_vm11, %v1036_v42 }
 0x107   : > { %882 = vst.msk [vmem:[#allocation3 + $0x10] sm:$0xff] %vm879_vm7, %v860_v41 }
 0x109   : > { %v717_v43 = vpop.permute.xlu1 %716 }
 0x10a   : > { %v670_v44 = vpop.permute.xlu0 %669  ;;  %737 = vst.msk [vmem:[#allocation3 + $0x20] sm:$0xff] %vm732_vm4, %v717_v43 }
 0x10b   : > { %689 = vst.msk [vmem:[#allocation3 + $0x28] sm:$0xff] %vm683_vm3, %v670_v44 }
 0x10d   : > { %v910_v45 = vpop.permute.xlu1 %909  ;;  %v1037_v47 = vld [vmem:[#allocation3 + $0x8] sm:$0xff] }
 0x10e   : > { %v862_v46 = vpop.permute.xlu0 %861  ;;  %932 = vst.msk [vmem:[#allocation3 + $0x10] sm:$0xff] %vm929_vm8, %v910_v45  ;;  %1520 = vmatmul.mubr.msk.f32.vlgmr.msra.gmra.mrb[0].mxu0 %vm1049_vm11, %v1037_v47 }
 0x10f   : > { %883 = vst.msk [vmem:[#allocation3 + $0x18] sm:$0xff] %vm879_vm7, %v862_v46 }
 0x111   : > { %v766_v48 = vpop.permute.xlu1 %765 }
 0x112   : > { %v719_v49 = vpop.permute.xlu0 %718  ;;  %786 = vst.msk [vmem:[#allocation3 + $0x20] sm:$0xff] %vm781_vm5, %v766_v48 }
 0x113   : > { %738 = vst.msk [vmem:[#allocation3 + $0x28] sm:$0xff] %vm732_vm4, %v719_v49 }
 0x115   : > { %v959_v50 = vpop.permute.xlu1 %958 }
 0x116   : > { %v912_v51 = vpop.permute.xlu0 %911  ;;  %981 = vst.msk [vmem:[#allocation3 + $0x10] sm:$0xff] %vm978_vm9, %v959_v50 }
 0x117   : > { %933 = vst.msk [vmem:[#allocation3 + $0x18] sm:$0xff] %vm929_vm8, %v912_v51 }
 0x119   : > { %v815_v52 = vpop.permute.xlu1 %814 }
 0x11a   : > { %v768_v53 = vpop.permute.xlu0 %767  ;;  %835 = vst.msk [vmem:[#allocation3 + $0x20] sm:$0xff] %vm830_vm6, %v815_v52 }
 0x11b   : > { %787 = vst.msk [vmem:[#allocation3 + $0x28] sm:$0xff] %vm781_vm5, %v768_v53 }
 0x11d   : > { %v1008_v54 = vpop.permute.xlu1 %1007 }
 0x11e   : > { %v961_v55 = vpop.permute.xlu0 %960  ;;  %1030 = vst.msk [vmem:[#allocation3 + $0x10] sm:$0xff] %vm1027_vm10, %v1008_v54 }
 0x11f   : > { %982 = vst.msk [vmem:[#allocation3 + $0x18] sm:$0xff] %vm978_vm9, %v961_v55 }
 0x121   : > { %v817_v56 = vpop.permute.xlu1 %816 }
 0x122   : > { %v672_v57 = vpop.permute.xlu0 %671  ;;  %836 = vst.msk [vmem:[#allocation3 + $0x28] sm:$0xff] %vm830_vm6, %v817_v56 }
 0x123   : > { %690 = vst.msk [vmem:[#allocation3 + $0x30] sm:$0xff] %vm683_vm3, %v672_v57 }
 0x125   : > { %v1010_v58 = vpop.permute.xlu1 %1009  ;;  %v1038_v60 = vld [vmem:[#allocation3 + $0x10] sm:$0xff] }
 0x126   : > { %v864_v59 = vpop.permute.xlu0 %863  ;;  %1031 = vst.msk [vmem:[#allocation3 + $0x18] sm:$0xff] %vm1027_vm10, %v1010_v58  ;;  %1522 = vmatprep.mubr.msk.f32.mxu0 %vm1049_vm11, %v1038_v60 }
 0x127   : > { %884 = vst.msk [vmem:[#allocation3 + $0x20] sm:$0xff] %vm879_vm7, %v864_v59 }
 0x129   : > { %v721_v62 = vpop.permute.xlu1 %720 }
 0x12a   : > { %v674_v61 = vpop.permute.xlu0 %673  ;;  %739 = vst.msk [vmem:[#allocation3 + $0x30] sm:$0xff] %vm732_vm4, %v721_v62 }
 0x12b   : > { %691 = vst.msk [vmem:[#allocation3 + $0x38] sm:$0xff] %vm683_vm3, %v674_v61 }
 0x12d   : > { %v914_v0 = vpop.permute.xlu1 %913  ;;  %v1039_v3 = vld [vmem:[#allocation3 + $0x18] sm:$0xff] }
 0x12e   : > { %v866_v63 = vpop.permute.xlu0 %865  ;;  %934 = vst.msk [vmem:[#allocation3 + $0x20] sm:$0xff] %vm929_vm8, %v914_v0  ;;  %1523 = vmatmul.mubr.msk.f32.gmra.mrb[2].mxu0 %vm1049_vm11, %v1039_v3 }
 0x12f   : > { %885 = vst.msk [vmem:[#allocation3 + $0x28] sm:$0xff] %vm879_vm7, %v866_v63 }
 0x131   : > { %v770_v5 = vpop.permute.xlu1 %769 }
 0x132   : > { %v723_v4 = vpop.permute.xlu0 %722  ;;  %788 = vst.msk [vmem:[#allocation3 + $0x30] sm:$0xff] %vm781_vm5, %v770_v5 }
 0x133   : > { %740 = vst.msk [vmem:[#allocation3 + $0x38] sm:$0xff] %vm732_vm4, %v723_v4 }
 0x135   : > { %v963_v7 = vpop.permute.xlu1 %962 }
 0x136   : > { %v916_v6 = vpop.permute.xlu0 %915  ;;  %983 = vst.msk [vmem:[#allocation3 + $0x20] sm:$0xff] %vm978_vm9, %v963_v7 }
 0x137   : > { %935 = vst.msk [vmem:[#allocation3 + $0x28] sm:$0xff] %vm929_vm8, %v916_v6 }
 0x139   : > { %v819_v9 = vpop.permute.xlu1 %818 }
 0x13a   : > { %v772_v8 = vpop.permute.xlu0 %771  ;;  %837 = vst.msk [vmem:[#allocation3 + $0x30] sm:$0xff] %vm830_vm6, %v819_v9 }
 0x13b   : > { %789 = vst.msk [vmem:[#allocation3 + $0x38] sm:$0xff] %vm781_vm5, %v772_v8 }
 0x13d   : > { %v1012_v11 = vpop.permute.xlu1 %1011 }
 0x13e   : > { %v965_v10 = vpop.permute.xlu0 %964  ;;  %1032 = vst.msk [vmem:[#allocation3 + $0x20] sm:$0xff] %vm1027_vm10, %v1012_v11 }
 0x13f   : > { %984 = vst.msk [vmem:[#allocation3 + $0x28] sm:$0xff] %vm978_vm9, %v965_v10 }
 0x141   : > { %v868_v13 = vpop.permute.xlu1 %867 }
 0x142   : > { %v821_v12 = vpop.permute.xlu0 %820  ;;  %886 = vst.msk [vmem:[#allocation3 + $0x30] sm:$0xff] %vm879_vm7, %v868_v13 }
 0x143   : > { %838 = vst.msk [vmem:[#allocation3 + $0x38] sm:$0xff] %vm830_vm6, %v821_v12 }
 0x145   : > { %v870_v15 = vpop.permute.xlu1 %869  ;;  %v1040_v16 = vld [vmem:[#allocation3 + $0x20] sm:$0xff] }
 0x146   : > { %v1014_v14 = vpop.permute.xlu0 %1013  ;;  %887 = vst.msk [vmem:[#allocation3 + $0x38] sm:$0xff] %vm879_vm7, %v870_v15  ;;  %1525 = vmatprep.mubr.msk.f32.mxu1 %vm1049_vm11, %v1040_v16 }
 0x147   : > { %1033 = vst.msk [vmem:[#allocation3 + $0x28] sm:$0xff] %vm1027_vm10, %v1014_v14 }
 0x149   : > { %v920_v18 = vpop.permute.xlu1 %919 }
 0x14a   : > { %v918_v17 = vpop.permute.xlu0 %917  ;;  %937 = vst.msk [vmem:[#allocation3 + $0x38] sm:$0xff] %vm929_vm8, %v920_v18 }
 0x14b   : > { %936 = vst.msk [vmem:[#allocation3 + $0x30] sm:$0xff] %vm929_vm8, %v918_v17 }
 0x14d   : > { %v969_v20 = vpop.permute.xlu1 %968 }
 0x14e   : > { %v967_v19 = vpop.permute.xlu0 %966  ;;  %v1041_v21 = vld [vmem:[#allocation3 + $0x28] sm:$0xff]  ;;  %986 = vst.msk [vmem:[#allocation3 + $0x38] sm:$0xff] %vm978_vm9, %v969_v20 }
 0x14f   : > { %985 = vst.msk [vmem:[#allocation3 + $0x30] sm:$0xff] %vm978_vm9, %v967_v19  ;;  %1526 = vmatmul.mubr.msk.f32.vlgmr.msra.gmra.mrb[0].mxu1 %vm1049_vm11, %v1041_v21 }
 0x151   : > { %v1018_v23 = vpop.permute.xlu1 %1017 }
 0x152   : > { %v1016_v22 = vpop.permute.xlu0 %1015  ;;  %1035 = vst.msk [vmem:[#allocation3 + $0x38] sm:$0xff] %vm1027_vm10, %v1018_v23 }
 0x153   : > { %1034 = vst.msk [vmem:[#allocation3 + $0x30] sm:$0xff] %vm1027_vm10, %v1016_v22 }
 0x159   : > { %v1043_v25 = vld [vmem:[#allocation3 + $0x38] sm:$0xff] }
 0x15a   : > { %v1042_v24 = vld [vmem:[#allocation3 + $0x30] sm:$0xff] }
 0x15b   : > { %1528 = vmatprep.mubr.msk.f32.mxu1 %vm1049_vm11, %v1042_v24 }
 0x15c   : > { %1529 = vmatmul.mubr.msk.f32.gmra.mrb[2].mxu1 %vm1049_vm11, %v1043_v25 }
 0x1e1   : > { %v1521_v26 = vpop.f32.mrb[0].mxu0 }
 0x1e2   : > { %1185 = vst.msk [vmem:[%s1783_s14 + $0x8] sm:$0xff] %vm1183_vm12, %v1521_v26  ;;  %v1193_v27 = vsel %vm1183_vm12, %v1521_v26, 0.0  ;;  %v1216_v28 = vmul.f32 %v1521_v26, %v1521_v26  ;;  %v1144_v29 = vpop.f32.mrb[1].mxu0 }
 0x1e3   : > { %1184 = vst.msk [vmem:[%s1783_s14] sm:$0xff] %vm1183_vm12, %v1144_v29  ;;  %v1192_v30 = vsel %vm1183_vm12, %v1144_v29, 0.0  ;;  %v1215_v31 = vmul.f32 %v1144_v29, %v1144_v29 }
 0x1e4   : > { %v1224_v32 = vsel %vm1183_vm12, %v1216_v28, 0.0  ;;  %v1194_v33 = vadd.f32 %v1193_v27, %v1192_v30 }
 0x1e5   : > { %v1223_v34 = vsel %vm1183_vm12, %v1215_v31, 0.0 }
 0x1e6   : > { %v1225_v35 = vadd.f32 %v1224_v32, %v1223_v34 }
 0x201   : > { %v1524_v36 = vpop.f32.mrb[2].mxu0 }
 0x202   : > { %1187 = vst.msk [vmem:[%s1783_s14 + $0x18] sm:$0xff] %vm1183_vm12, %v1524_v36  ;;  %v1154_v37 = vpop.f32.mrb[3].mxu0  ;;  %v1218_v1 = vmul.f32 %v1524_v36, %v1524_v36  ;;  %v1197_v40 = vsel %vm1183_vm12, %v1524_v36, 0.0 }
 0x203   : > { %1186 = vst.msk [vmem:[%s1783_s14 + $0x10] sm:$0xff] %vm1183_vm12, %v1154_v37  ;;  %v1195_v2 = vsel %vm1183_vm12, %v1154_v37, 0.0  ;;  %v1217_v38 = vmul.f32 %v1154_v37, %v1154_v37 }
 0x204   : > { %v1196_v39 = vadd.f32 %v1195_v2, %v1194_v33  ;;  %v1228_v44 = vsel %vm1183_vm12, %v1218_v1, 0.0 }
 0x205   : > { %v1226_v41 = vsel %vm1183_vm12, %v1217_v38, 0.0 }
 0x206   : > { %v1198_v42 = vadd.f32 %v1197_v40, %v1196_v39  ;;  %v1227_v43 = vadd.f32 %v1226_v41, %v1225_v35 }
 0x208   : > { %v1229_v45 = vadd.f32 %v1228_v44, %v1227_v43 }
 0x222   : > { %v1527_v46 = vpop.f32.mrb[0].mxu1 }
 0x223   : > { %1189 = vst.msk [vmem:[%s1783_s14 + $0x28] sm:$0xff] %vm1183_vm12, %v1527_v46  ;;  %v1164_v47 = vpop.f32.mrb[1].mxu1  ;;  %v1220_v48 = vmul.f32 %v1527_v46, %v1527_v46  ;;  %v1201_v52 = vsel %vm1183_vm12, %v1527_v46, 0.0 }
 0x224   : > { %1188 = vst.msk [vmem:[%s1783_s14 + $0x20] sm:$0xff] %vm1183_vm12, %v1164_v47  ;;  %v1199_v49 = vsel %vm1183_vm12, %v1164_v47, 0.0  ;;  %v1219_v50 = vmul.f32 %v1164_v47, %v1164_v47 }
 0x225   : > { %v1200_v51 = vadd.f32 %v1199_v49, %v1198_v42  ;;  %v1232_v56 = vsel %vm1183_vm12, %v1220_v48, 0.0 }
 0x226   : > { %v1230_v53 = vsel %vm1183_vm12, %v1219_v50, 0.0 }
 0x227   : > { %v1231_v54 = vadd.f32 %v1230_v53, %v1229_v45  ;;  %v1202_v55 = vadd.f32 %v1201_v52, %v1200_v51 }
 0x229   : > { %v1233_v57 = vadd.f32 %v1232_v56, %v1231_v54 }
 0x22f   : > { %v1530_v58 = vpop.f32.mrb[2].mxu1 }
 0x230   : > { %1191 = vst.msk [vmem:[%s1783_s14 + $0x38] sm:$0xff] %vm1183_vm12, %v1530_v58  ;;  %v1174_v59 = vpop.f32.mrb[3].mxu1  ;;  %v1222_v60 = vmul.f32 %v1530_v58, %v1530_v58  ;;  %v1205_v0 = vsel %vm1183_vm12, %v1530_v58, 0.0 }
 0x231   : > { %1190 = vst.msk [vmem:[%s1783_s14 + $0x30] sm:$0xff] %vm1183_vm12, %v1174_v59  ;;  %v1203_v61 = vsel %vm1183_vm12, %v1174_v59, 0.0  ;;  %v1221_v62 = vmul.f32 %v1174_v59, %v1174_v59 }
 0x232   : > { %v1204_v63 = vadd.f32 %v1203_v61, %v1202_v55  ;;  %v1236_v6 = vsel %vm1183_vm12, %v1222_v60, 0.0 }
 0x233   : > { %v1234_v3 = vsel %vm1183_vm12, %v1221_v62, 0.0 }
 0x234   : > { %v1206_v4 = vadd.f32 %v1205_v0, %v1204_v63  ;;  %v1235_v5 = vadd.f32 %v1234_v3, %v1233_v57 }
 0x236   : > { %v1207_v7 = vrot.slane %v1206_v4, 4  ;;  %v1237_v8 = vadd.f32 %v1236_v6, %v1235_v5 }
 0x238   : > { %v1208_v9 = vadd.f32 %v1207_v7, %v1206_v4  ;;  %v1238_v10 = vrot.slane %v1237_v8, 4 }
 0x23a   : > { %v1209_v11 = vrot.slane %v1208_v9, 2  ;;  %v1239_v12 = vadd.f32 %v1238_v10, %v1237_v8 }
 0x23c   : > { %v1210_v13 = vadd.f32 %v1209_v11, %v1208_v9  ;;  %v1240_v14 = vrot.slane %v1239_v12, 2 }
 0x23e   : > { %v1211_v15 = vrot.slane %v1210_v13, 1  ;;  %v1241_v16 = vadd.f32 %v1240_v14, %v1239_v12 }
 0x240   : > { %v1212_v17 = vadd.f32 %v1211_v15, %v1210_v13  ;;  %v1242_v18 = vrot.slane %v1241_v16, 1 }
 0x242   : > { %1214 = vst.msk [vmem:[%s1823_s12] sm:$0x1] %vm1213_vm13, %v1212_v17  ;;  %v1243_v19 = vadd.f32 %v1242_v18, %v1241_v16 }
 0x244   : > { %1244 = vst.msk [vmem:[%s1823_s12 + $0x1] sm:$0x1] %vm1213_vm13, %v1243_v19 }
 0x245 PF: > { %s18_s28 = sadd.s32 1, %s1658_s28   ;;  %s2087_s14 = sld [smem:[#allocation4_spill]] }
 0x246   : > { %p15_p1 = scmp.ge.s32.totalorder %s18_s28, 10   ;;  %s2088_s10 = sld [smem:[#allocation5_spill]] }
 0x247   : > { %s2089_s24 = smov %s1650_s26  ;;  %s2090_s25 = smov %s1654_s27 }
 0x248   :  { %17 = sbr.rel (!%p15_p1) target bundleno = 3 (0x3), region = 112 }
 0x24b   : > { %s2091_s26 = smov %s2087_s14 }
 0x24c   : > { %s2092_s27 = smov %s2088_s10 }

// kernel: _lambda_.5
= control target key start
LH: loop header
LB: loop body
LE: loop exit
PB: predicated region body
PF: predicated region fallthrough
CT: control target
= control target key end

     0   :  { %s1709_s24 = smov 0   ;;  %s1711_s25 = smov 0   ;;  %s2088_s0 = inlined_call_operand.vmem [shape: f32[2,16,16,4], index: 0, kind: input, shape index: {}, may-alias: {0,1,2}]   ;;  %s2089_s1 = inlined_call_operand.vmem [shape: f32[2,16,16,4], index: 1, kind: input, shape index: {}, may-alias: {0,1,2}]   ;;  %s2090_s2 = inlined_call_operand.vmem [shape: f32[2,16,16,4], index: 2, kind: input, shape index: {}, may-alias: {0,1,2}]   ;;  %s2091_s3 = inlined_call_operand.vmem [shape: f32[1,4], index: 3, kind: input, shape index: {}]   ;;  %s2092_s4 = inlined_call_operand.vmem [shape: f32[1,4], index: 4, kind: input, shape index: {}]   ;;  %s2093_s5 = inlined_call_operand.vmem [shape: f32[36,4], index: 5, kind: input, shape index: {}]   ;;  %s2094_s6 = inlined_call_operand.vmem [shape: f32[2,16,16,4], index: 6, kind: output, shape index: {0}]   ;;  %s2095_s7 = inlined_call_operand.vmem [shape: f32[2,4,2,4], index: 7, kind: output, shape index: {1}]  }
   0x1   :  { %s1713_s26 = smov 0   ;;  %s1715_s27 = smov 0  }
   0x2   :  { %s1717_s28 = smov 0  }
   0x3 LB: > { %s27_s29 = sadd.s32 1, %s1648_s26  ;;  %s30_s30 = sadd.s32 1, %s1652_s27  ;;  %s1656_s28 = sphi %s1717_s28, %s18_s28   ;;  %s1652_s27 = sphi %s1715_s27, %s2104_s27   ;;  %s1648_s26 = sphi %s1713_s26, %s2103_s26   ;;  %s1644_s25 = sphi %s1711_s25, %s2102_s25   ;;  %s1640_s24 = sphi %s1709_s24, %s2101_s24  }
   0x4   : > { %p28_p0 = scmp.ge.s32.totalorder %s27_s29, 4  ;;  %p1441_p1 = scmp.ge.s32.totalorder %s1656_s28, 1 }
   0x5   : > { %p328_p2 = scmp.lt.s32.totalorder %s1656_s28, 9 }
   0x6   : > { %s2106_s29 = smov (%p28_p0, %s27_s29), 0  ;;  %s2108_s30 = smov (!%p28_p0, %s30_s30), %s1652_s27 }
   0x7   : > { %2096 = sst [smem:[#allocation4_spill]] %s2106_s29  ;;  %p329_p3 = pnand %p1441_p1, %p328_p2 }
   0x8   : > { %p32_p4 = scmp.ge.s32.totalorder %s2108_s30, 2  ;;  %vm470_vm0 = vcmask (!%p329_p3), 24576   ;;  %s1744_s8 = sshll.u32 (!%p329_p3), %s1640_s24, 2  ;;  %v1658_v0 = vmov (!%p329_p3), 0.0   ;;  %v1785_v1 = vld [vmem:[%s2091_s3] ss:$0 sm:$0xff] (!%p329_p3) }
   0x9   : > { %332 = sbr.rel (%p329_p3) target bundleno = 581 (0x245), region = 44  ;;  %p408_p5 = scmp.lt.s32.totalorder (!%p329_p3), %s1644_s25, 1  ;;  %471 = vst.msk [vmem:[#allocation2] sm:$0x1] (!%p329_p3), %vm470_vm0, %v1658_v0  ;;  %472 = vst.msk [vmem:[#allocation2 + $0x18] sm:$0x1] (!%p329_p3), %vm470_vm0, %v1658_v0 }
   0xa   : > { %s2110_s30 = smov (%p32_p4, %s2108_s30), 0  ;;  %473 = vst.msk [vmem:[#allocation2 + $0x30] sm:$0x1] (!%p329_p3), %vm470_vm0, %v1658_v0  ;;  %474 = vst.msk [vmem:[#allocation2 + $0x48] sm:$0x1] (!%p329_p3), %vm470_vm0, %v1658_v0  ;;  %s1443_s9 = sadd.s32 (!%p329_p3), 4294967295, %s1744_s8 }
   0xb   : > { %2097 = sst [smem:[#allocation5_spill]] %s2110_s30  ;;  %475 = vst.msk [vmem:[#allocation2 + $0x60] sm:$0x1] (!%p329_p3), %vm470_vm0, %v1658_v0  ;;  %476 = vst.msk [vmem:[#allocation2 + $0x78] sm:$0x1] (!%p329_p3), %vm470_vm0, %v1658_v0  ;;  %p424_p6 = scmp.lt.s32.totalorder (!%p329_p3), %s1744_s8, 15 }
   0xc   : > { %477 = vst.msk [vmem:[#allocation2 + $0x11] sm:$0x1] (!%p329_p3), %vm470_vm0, %v1658_v0  ;;  %478 = vst.msk [vmem:[#allocation2 + $0x29] sm:$0x1] (!%p329_p3), %vm470_vm0, %v1658_v0  ;;  %p406_p7 = scmp.gt.s32.totalorder (!%p329_p3), %s1443_s9, 0  ;;  %p1444_p8 = scmp.lt.s32.totalorder (!%p329_p3), %s1443_s9, 15 }
   0xd   : > { %479 = vst.msk [vmem:[#allocation2 + $0x41] sm:$0x1] (!%p329_p3), %vm470_vm0, %v1658_v0  ;;  %480 = vst.msk [vmem:[#allocation2 + $0x59] sm:$0x1] (!%p329_p3), %vm470_vm0, %v1658_v0  ;;  %s1493_s11 = sadd.s32 (!%p329_p3), 4, %s1744_s8  ;;  %p462_p10 = scmp.lt.s32.totalorder (!%p329_p3), %s1640_s24, 3 }
   0xe   : > { %481 = vst.msk [vmem:[#allocation2 + $0x71] sm:$0x1] (!%p329_p3), %vm470_vm0, %v1658_v0  ;;  %482 = vst.msk [vmem:[#allocation2 + $0x89] sm:$0x1] (!%p329_p3), %vm470_vm0, %v1658_v0  ;;  %p1771_p9 = scmp.lt.s32.totalorder (!%p329_p3), %s1493_s11, 15  ;;  %vm560_vm1 = vcmask (!%p329_p3), 31744  }
   0xf   : > { %v1798_v2 = vld [vmem:[%s2092_s4] ss:$0 sm:$0xff] (!%p329_p3)  ;;  %p1471_p11 = scmp.le.s32.totalorder (!%p329_p3), %s1640_s24, 0 }
  0x10   : > { %s2112_s25 = smov (!%p408_p5, %s1644_s25), 1  ;;  %s2114_s9 = smov (!%p406_p7, %s1443_s9), 0 }
  0x11   : > { %s1767_s10 = sshll.u32 %s2112_s25, 5  ;;  %s2116_s9 = smov (!%p1444_p8, %s2114_s9), 15 }
  0x12   : > { %s2118_s8 = smov (!%p424_p6, %s1744_s8), 15  ;;  %s1449_s12 = sshll.u32 %s2116_s9, 1 }
  0x13   : > { %s414_s14 = sadd.s32 %s1767_s10, %s1449_s12  ;;  %s1453_s15 = sshll.u32 %s2118_s8, 1 }
  0x14   : > { %s1451_s16 = sshll.u32 %s414_s14, 3  ;;  %s428_s17 = sadd.s32 %s1453_s15, %s1767_s10 }
  0x15   : > { %s1780_s20 = scalar_lea.vmem %s2088_s0, %s1451_s16  ;;  %s1455_s21 = sshll.u32 %s428_s17, 3 }
  0x16   : > { %s430_s29 = scalar_lea.vmem %s2089_s1, %s1455_s21  ;;  %s1793_s14 = scalar_lea.vmem %s2094_s6, %s1455_s21 }
  0x17   : > { %s2120_s11 = smov (!%p1771_p9, %s1493_s11), 15  ;;  %v483_v3 = vld [vmem:[%s430_s29] sm:$0xff]  ;;  %v484_v4 = vld [vmem:[%s430_s29 + $0x8] sm:$0xff]  ;;  %v485_v5 = vld [vmem:[%s430_s29 + $0x10] sm:$0xff]  ;;  %s1467_s30 = sshll.u32 %s2112_s25, 2 }
  0x18   : > { %v497_v6 = vmul.f32 %v1785_v1, %v483_v3  ;;  %v498_v7 = vmul.f32 %v1785_v1, %v484_v4  ;;  %v499_v8 = vmul.f32 %v1785_v1, %v485_v5  ;;  %v486_v9 = vld [vmem:[%s430_s29 + $0x18] sm:$0xff]  ;;  %v487_v10 = vld [vmem:[%s430_s29 + $0x20] sm:$0xff]  ;;  %v488_v11 = vld [vmem:[%s430_s29 + $0x28] sm:$0xff]  ;;  %s2122_s11 = smov (!%p1771_p9, %s2120_s11), 15 }
  0x19   : > { %v500_v12 = vmul.f32 %v1785_v1, %v486_v9  ;;  %v501_v13 = vmul.f32 %v1785_v1, %v487_v10  ;;  %v502_v14 = vmul.f32 %v1785_v1, %v488_v11  ;;  %v489_v15 = vld [vmem:[%s430_s29 + $0x30] sm:$0xff]  ;;  %v490_v16 = vld [vmem:[%s430_s29 + $0x38] sm:$0xff]  ;;  %s463_s25 = scalar_select %p462_p10, %s1640_s24, 3 }
  0x1a   : > { %v511_v17 = vadd.f32 %v1798_v2, %v497_v6  ;;  %v512_v18 = vadd.f32 %v1798_v2, %v498_v7  ;;  %v513_v19 = vadd.f32 %v1798_v2, %v499_v8  ;;  %v503_v20 = vmul.f32 %v1785_v1, %v489_v15  ;;  %s1460_s13 = sshll.u32 %s2122_s11, 1  ;;  %v573_v5 = vld [vmem:[%s1780_s20] sm:$0xff] (!%p1471_p11)  ;;  %v574_v6 = vld [vmem:[%s1780_s20 + $0x8] sm:$0xff] (!%p1471_p11) }
  0x1b   : > { %v514_v21 = vadd.f32 %v1798_v2, %v500_v12  ;;  %v515_v22 = vadd.f32 %v1798_v2, %v501_v13  ;;  %v516_v23 = vadd.f32 %v1798_v2, %v502_v14  ;;  %s442_s16 = sadd.s32 %s1460_s13, %s1767_s10  ;;  %s465_s17 = sadd.s32 %s1467_s30, %s463_s25  ;;  %v504_v26 = vmul.f32 %v1785_v1, %v490_v16 }
  0x1c   : > { %v527_v24 = vmul.f32 0.70710677, %v511_v17  ;;  %v528_v25 = vmul.f32 0.70710677, %v512_v18  ;;  %s1462_s29 = sshll.u32 %s442_s16, 3  ;;  %s1468_s19 = sshll.u32 %s465_s17, 1  ;;  %v517_v28 = vadd.f32 %v1798_v2, %v503_v20  ;;  %v575_v7 = vmul.f32 (!%p1471_p11), %v1785_v1, %v573_v5 }
  0x1d   : > { %v529_v27 = vmul.f32 0.70710677, %v513_v19  ;;  %s1828_s11 = scalar_lea.vmem %s2090_s2, %s1462_s29  ;;  %s1833_s12 = scalar_lea.vmem %s2095_s7, %s1468_s19  ;;  %v530_v29 = vmul.f32 0.70710677, %v514_v21  ;;  %v531_v30 = vmul.f32 0.70710677, %v515_v22  ;;  %v518_v33 = vadd.f32 %v1798_v2, %v504_v26 }
  0x1e   : > { %1594 = verf.f32 %v527_v24  ;;  %v532_v31 = vmul.f32 0.70710677, %v516_v23  ;;  %v533_v32 = vmul.f32 0.70710677, %v517_v28  ;;  %v519_v35 = vmul.f32 0.5, %v511_v17 }
  0x1f   : > { %1596 = verf.f32 %v528_v25  ;;  %v534_v34 = vmul.f32 0.70710677, %v518_v33  ;;  %v520_v37 = vmul.f32 0.5, %v512_v18  ;;  %v521_v40 = vmul.f32 0.5, %v513_v19 }
  0x20   : > { %1598 = verf.f32 %v529_v27  ;;  %v522_v43 = vmul.f32 0.5, %v514_v21  ;;  %v523_v47 = vmul.f32 0.5, %v515_v22  ;;  %v524_v51 = vmul.f32 0.5, %v516_v23 }
  0x21   : > { %1600 = verf.f32 %v530_v29  ;;  %v525_v55 = vmul.f32 0.5, %v517_v28  ;;  %v526_v59 = vmul.f32 0.5, %v518_v33  ;;  %v576_v8 = vmul.f32 (!%p1471_p11), %v1785_v1, %v574_v6 }
  0x22   : > { %1602 = verf.f32 %v531_v30  ;;  %v577_v9 = vadd.f32 (!%p1471_p11), %v1798_v2, %v575_v7 }
  0x23   : > { %1604 = verf.f32 %v532_v31  ;;  %v578_v10 = vadd.f32 (!%p1471_p11), %v1798_v2, %v576_v8 }
  0x24   : > { %1606 = verf.f32 %v533_v32  ;;  %v581_v11 = vmul.f32 (!%p1471_p11), 0.70710677, %v577_v9  ;;  %v579_v13 = vmul.f32 (!%p1471_p11), 0.5, %v577_v9 }
  0x25   : > { %1608 = verf.f32 %v534_v34  ;;  %v582_v12 = vmul.f32 (!%p1471_p11), 0.70710677, %v578_v10  ;;  %v580_v15 = vmul.f32 (!%p1471_p11), 0.5, %v578_v10 }
  0x26   : > { %1610 = verf.f32 (!%p1471_p11), %v581_v11 }
  0x27   : > { %1612 = verf.f32 (!%p1471_p11), %v582_v12 }
  0x28   : > { %v1595_v36 = vpop.eup %1594 }
  0x29   : > { %v1597_v38 = vpop.eup %1596  ;;  %v543_v39 = vadd.f32 1.0, %v1595_v36 }
  0x2a   : > { %v1599_v41 = vpop.eup %1598  ;;  %v544_v42 = vadd.f32 1.0, %v1597_v38 }
  0x2b   : > { %v1601_v44 = vpop.eup %1600  ;;  %v551_v45 = vmul.f32 %v543_v39, %v519_v35  ;;  %v545_v46 = vadd.f32 1.0, %v1599_v41 }
  0x2c   : > { %v1603_v48 = vpop.eup %1602  ;;  %v552_v49 = vmul.f32 %v544_v42, %v520_v37  ;;  %v546_v50 = vadd.f32 1.0, %v1601_v44 }
  0x2d   : > { %v1605_v52 = vpop.eup %1604  ;;  %561 = vst.msk [vmem:[#allocation2 + $0x19] sm:$0xff] %vm560_vm1, %v551_v45  ;;  %v553_v53 = vmul.f32 %v545_v46, %v521_v40  ;;  %v547_v54 = vadd.f32 1.0, %v1603_v48 }
  0x2e   : > { %v1607_v56 = vpop.eup %1606  ;;  %562 = vst.msk [vmem:[#allocation2 + $0x21] sm:$0xff] %vm560_vm1, %v552_v49  ;;  %v554_v57 = vmul.f32 %v546_v50, %v522_v43  ;;  %v548_v58 = vadd.f32 1.0, %v1605_v52  ;;  %572 = sbr.rel (%p1471_p11) target bundleno = 55 (0x37), region = 48 }
  0x2f   : > { %v1609_v60 = vpop.eup %1608  ;;  %563 = vst.msk [vmem:[#allocation2 + $0x31] sm:$0xff] %vm560_vm1, %v553_v53  ;;  %v555_v61 = vmul.f32 %v547_v54, %v523_v47  ;;  %v549_v62 = vadd.f32 1.0, %v1607_v56 }
  0x30   : > { %564 = vst.msk [vmem:[#allocation2 + $0x39] sm:$0xff] %vm560_vm1, %v554_v57  ;;  %v556_v63 = vmul.f32 %v548_v58, %v524_v51  ;;  %v550_v0 = vadd.f32 1.0, %v1609_v60  ;;  %v1611_v14 = vpop.eup (!%p1471_p11), %1610 }
  0x31   : > { %565 = vst.msk [vmem:[#allocation2 + $0x49] sm:$0xff] %vm560_vm1, %v555_v61  ;;  %v557_v3 = vmul.f32 %v549_v62, %v525_v55  ;;  %v1613_v16 = vpop.eup (!%p1471_p11), %1612  ;;  %v585_v17 = vadd.f32 (!%p1471_p11), 1.0, %v1611_v14 }
  0x32   : > { %566 = vst.msk [vmem:[#allocation2 + $0x51] sm:$0xff] %vm560_vm1, %v556_v63  ;;  %v558_v4 = vmul.f32 %v550_v0, %v526_v59  ;;  %v586_v18 = vadd.f32 (!%p1471_p11), 1.0, %v1613_v16 }
  0x33   : > { %567 = vst.msk [vmem:[#allocation2 + $0x61] sm:$0xff] %vm560_vm1, %v557_v3  ;;  %v587_v19 = vmul.f32 (!%p1471_p11), %v585_v17, %v579_v13 }
  0x34   : > { %568 = vst.msk [vmem:[#allocation2 + $0x69] sm:$0xff] %vm560_vm1, %v558_v4  ;;  %v588_v20 = vmul.f32 (!%p1471_p11), %v586_v18, %v580_v15 }
  0x35   : > { %589 = vst.msk [vmem:[#allocation2 + $0x1] sm:$0xff] %vm560_vm1, %v587_v19 }
  0x36   : > { %590 = vst.msk [vmem:[#allocation2 + $0x9] sm:$0xff] %vm560_vm1, %v588_v20 }
  0x37 PF: > { %p1472_p12 = scmp.ne.s32.totalorder %s1640_s24, 0 }
  0x38   : > { %v1659_v21 = vmov (!%p1472_p12), 0.0  }
  0x39   : > { %594 = sbr.rel (%p1472_p12) target bundleno = 64 (0x40), region = 52  ;;  %595 = vst.msk [vmem:[#allocation2 + $0x1] sm:$0xff] (!%p1472_p12), %vm560_vm1, %v1659_v21  ;;  %596 = vst.msk [vmem:[#allocation2 + $0x9] sm:$0xff] (!%p1472_p12), %vm560_vm1, %v1659_v21 }
  0x40 PF: > { %p1473_p13 = scmp.ge.s32.totalorder %s1640_s24, 3 }
  0x41   : > { %v601_v22 = vld [vmem:[%s1828_s11] sm:$0xff] (!%p1473_p13)  ;;  %v602_v23 = vld [vmem:[%s1828_s11 + $0x8] sm:$0xff] (!%p1473_p13) }
  0x42   : > { %600 = sbr.rel (%p1473_p13) target bundleno = 89 (0x59), region = 56  ;;  %v603_v24 = vmul.f32 (!%p1473_p13), %v1785_v1, %v601_v22  ;;  %v604_v25 = vmul.f32 (!%p1473_p13), %v1785_v1, %v602_v23 }
  0x44   : > { %v605_v26 = vadd.f32 (!%p1473_p13), %v1798_v2, %v603_v24  ;;  %v606_v27 = vadd.f32 (!%p1473_p13), %v1798_v2, %v604_v25 }
  0x46   : > { %v609_v28 = vmul.f32 (!%p1473_p13), 0.70710677, %v605_v26  ;;  %v610_v29 = vmul.f32 (!%p1473_p13), 0.70710677, %v606_v27  ;;  %v607_v30 = vmul.f32 (!%p1473_p13), 0.5, %v605_v26  ;;  %v608_v32 = vmul.f32 (!%p1473_p13), 0.5, %v606_v27 }
  0x48   : > { %1614 = verf.f32 (!%p1473_p13), %v609_v28 }
  0x49   : > { %1616 = verf.f32 %v610_v29 }
  0x52   : > { %v1615_v31 = vpop.eup %1614 }
  0x53   : > { %v1617_v33 = vpop.eup %1616  ;;  %v613_v34 = vadd.f32 1.0, %v1615_v31 }
  0x54   : > { %v614_v35 = vadd.f32 1.0, %v1617_v33 }
  0x55   : > { %v615_v36 = vmul.f32 %v613_v34, %v607_v30 }
  0x56   : > { %v616_v37 = vmul.f32 %v614_v35, %v608_v32 }
  0x57   : > { %618 = vst.msk [vmem:[#allocation2 + $0x79] sm:$0xff] %vm560_vm1, %v615_v36 }
  0x58   : > { %619 = vst.msk [vmem:[#allocation2 + $0x81] sm:$0xff] %vm560_vm1, %v616_v37 }
  0x59 PF: > { %p1474_p0 = scmp.ne.s32.totalorder %s1640_s24, 3 }
  0x5a   : > { %v1660_v1 = vmov (!%p1474_p0), 0.0  }
  0x5b   : > { %623 = sbr.rel (%p1474_p0) target bundleno = 98 (0x62), region = 60  ;;  %625 = vst.msk [vmem:[#allocation2 + $0x79] sm:$0xff] (!%p1474_p0), %vm560_vm1, %v1660_v1  ;;  %626 = vst.msk [vmem:[#allocation2 + $0x81] sm:$0xff] (!%p1474_p0), %vm560_vm1, %v1660_v1 }
  0x62 PF: > { %v692_v2 = vld [vmem:[#allocation2 + $0x2] sm:$0xff]  ;;  %s1661_s10 = smov 8   ;;  %s1662_s20 = smov 4   ;;  %v741_v40 = vld [vmem:[#allocation2 + $0x18] sm:$0xff]  ;;  %v693_v41 = vld [vmem:[#allocation2 + $0xa] sm:$0xff]  ;;  %vm1074_vm2 = vcmask 1043456  }
  0x63   : > { %v643_v38 = vld [vmem:[#allocation2 + $0x1] sm:$0xff]  ;;  %708 = vrot.lane.b32.xlu1 %v692_v2, %s1661_s10  ;;  %v644_v42 = vld [vmem:[#allocation2 + $0x9] sm:$0xff]  ;;  %637 = vst.msk [vmem:[#allocation3 + $0x10] sm:$0xff] %vm560_vm1, %v741_v40  ;;  %v890_v44 = vld [vmem:[#allocation2 + $0x38] sm:$0xff]  ;;  %s1663_s24 = smov 12   ;;  %s1664_s8 = smov 16  }
  0x64   : > { %659 = vrot.lane.b32.xlu0 %v643_v38, %s1662_s20  ;;  %v742_v39 = vld [vmem:[#allocation2 + $0x20] sm:$0xff]  ;;  %v889_v43 = vld [vmem:[#allocation2 + $0x30] sm:$0xff]  ;;  %v1875_v45 = vld [vmem:[#allocation2 + $0x48] sm:$0xff]  ;;  %640 = vst.msk [vmem:[#allocation3 + $0x28] sm:$0xff] %vm560_vm1, %v890_v44  ;;  %s1665_s15 = smov 20   ;;  %s1666_s18 = smov 24  }
  0x65   : > { %638 = vst.msk [vmem:[#allocation3 + $0x18] sm:$0xff] %vm560_vm1, %v742_v39  ;;  %639 = vst.msk [vmem:[#allocation3 + $0x20] sm:$0xff] %vm560_vm1, %v889_v43  ;;  %v1878_v46 = vld [vmem:[#allocation2 + $0x50] sm:$0xff]  ;;  %v627_v47 = vld [vmem:[#allocation2] sm:$0xff]  ;;  %s1667_s17 = smov 28   ;;  %s1668_s9 = smov 32  }
  0x66   : > { %641 = vst.msk [vmem:[#allocation3 + $0x30] sm:$0xff] %vm560_vm1, %v1875_v45  ;;  %642 = vst.msk [vmem:[#allocation3 + $0x38] sm:$0xff] %vm560_vm1, %v1878_v46  ;;  %v645_v48 = vld [vmem:[#allocation2 + $0x19] sm:$0xff]  ;;  %v628_v49 = vld [vmem:[#allocation2 + $0x8] sm:$0xff]  ;;  %vm683_vm3 = vcmask 64544   ;;  %vm732_vm4 = vcmask 97344  }
  0x67   : > { %710 = vrot.lane.b32.xlu1 %v693_v41, %s1661_s10  ;;  %635 = vst.msk [vmem:[#allocation3] sm:$0xff] %vm560_vm1, %v627_v47  ;;  %636 = vst.msk [vmem:[#allocation3 + $0x8] sm:$0xff] %vm560_vm1, %v628_v49  ;;  %v839_v50 = vld [vmem:[#allocation2 + $0x1a] sm:$0xff]  ;;  %v840_v52 = vld [vmem:[#allocation2 + $0x22] sm:$0xff]  ;;  %vm781_vm5 = vcmask 130144   ;;  %vm830_vm6 = vcmask 162944  }
  0x68   : > { %661 = vrot.lane.b32.xlu0 %v644_v42, %s1662_s20  ;;  %v791_v51 = vld [vmem:[#allocation2 + $0x21] sm:$0xff]  ;;  %v938_v53 = vld [vmem:[#allocation2 + $0x31] sm:$0xff]  ;;  %v939_v61 = vld [vmem:[#allocation2 + $0x39] sm:$0xff]  ;;  %vm879_vm7 = vcmask 195744   ;;  %vm929_vm8 = vcmask 228544   ;;  %vm978_vm9 = vcmask 261344  }
  0x69   : > { %v1044_v54 = vld [vmem:[%s2093_s5] sm:$0xff]  ;;  %v1045_v55 = vld [vmem:[%s2093_s5 + $0x8] sm:$0xff]  ;;  %v1046_v57 = vld [vmem:[%s2093_s5 + $0x10] sm:$0xff]  ;;  %vm1027_vm10 = vcmask 294144   ;;  %vm1049_vm11 = vcmask 293888  }
  0x6a   : > { %v1529_v56 = vpack.c.bf16 %v1045_v55, %v1044_v54  ;;  %v1047_v58 = vld [vmem:[%s2093_s5 + $0x18] sm:$0xff]  ;;  %v1048_v62 = vld [vmem:[%s2093_s5 + $0x20] sm:$0xf]  ;;  %v940_v0 = vld [vmem:[#allocation2 + $0x49] sm:$0xff] }
  0x6b   : > { %759 = vrot.lane.b32.xlu1 %v742_v39, %s1663_s24  ;;  %v1533_v59 = vpack.c.bf16 %v1047_v58, %v1046_v57  ;;  %v987_v60 = vld [vmem:[#allocation2 + $0x32] sm:$0xff]  ;;  %v988_v63 = vld [vmem:[#allocation2 + $0x3a] sm:$0xff]  ;;  %v989_v3 = vld [vmem:[#allocation2 + $0x4a] sm:$0xff] }
  0x6c   : > { %757 = vrot.lane.b32.xlu0 %v741_v40, %s1663_s24  ;;  %1530 = vmatprep.subr.bf16.mxu0 %v1529_v56  ;;  %v941_v4 = vld [vmem:[#allocation2 + $0x51] sm:$0xff]  ;;  %v893_v6 = vld [vmem:[#allocation2 + $0x60] sm:$0xff]  ;;  %v894_v7 = vld [vmem:[#allocation2 + $0x68] sm:$0xff] }
  0x6d   : > { %1537 = vmatprep.subr.bf16.mxu1 %v1529_v56  ;;  %1532 = vmatpush3.bf16.msra.mxu0 %v1529_v56  ;;  %v990_v5 = vld [vmem:[#allocation2 + $0x52] sm:$0xff]  ;;  %v942_v8 = vld [vmem:[#allocation2 + $0x61] sm:$0xff]  ;;  %v943_v9 = vld [vmem:[#allocation2 + $0x69] sm:$0xff] }
  0x6e   : > { %1540 = vmatpush3.bf16.msra.mxu1 %v1529_v56  ;;  %1534 = vmatprep.subr.bf16.mxu0 %v1533_v59  ;;  %v991_v10 = vld [vmem:[#allocation2 + $0x62] sm:$0xff]  ;;  %v992_v11 = vld [vmem:[#allocation2 + $0x6a] sm:$0xff]  ;;  %v895_v12 = vld [vmem:[#allocation2 + $0x78] sm:$0xff] }
  0x6f   : > { %663 = vrot.lane.b32.xlu1 %v645_v48, %s1662_s20  ;;  %1538 = vmatprep.subr.bf16.mxu1 %v1533_v59  ;;  %v896_v13 = vld [vmem:[#allocation2 + $0x80] sm:$0xff] }
  0x70   : > { %806 = vrot.lane.b32.xlu0 %v645_v48, %s1664_s8  ;;  %v944_v16 = vld [vmem:[#allocation2 + $0x79] sm:$0xff]  ;;  %v945_v17 = vld [vmem:[#allocation2 + $0x81] sm:$0xff] }
  0x71   : > { %1536 = vmatpush3.bf16.msra.mxu0 %v1533_v59  ;;  %v993_v20 = vld [vmem:[#allocation2 + $0x7a] sm:$0xff]  ;;  %v994_v21 = vld [vmem:[#allocation2 + $0x82] sm:$0xff] }
  0x72   : > { %1541 = vmatpush3.bf16.msra.mxu1 %v1533_v59  ;;  %1515 = vmatprep.subr.msk.mxu0 %vm1074_vm2, %v1048_v62 }
  0x73   : > { %855 = vrot.lane.b32.xlu1 %v839_v50, %s1665_s15  ;;  %1539 = vmatprep.subr.msk.mxu1 %vm1074_vm2, %v1048_v62 }
  0x74   : > { %808 = vrot.lane.b32.xlu0 %v791_v51, %s1664_s8 }
  0x75   : > { %1516 = vmatpush3.msk.msra.mxu0 %vm1074_vm2, %v1048_v62 }
  0x76   : > { %1542 = vmatpush3.msk.msra.mxu1 %vm1074_vm2, %v1048_v62 }
  0x77   : > { %712 = vrot.lane.b32.xlu1 %v839_v50, %s1661_s10 }
  0x78   : > { %665 = vrot.lane.b32.xlu0 %v791_v51, %s1662_s20 }
  0x7b   : > { %905 = vrot.lane.b32.xlu1 %v889_v43, %s1666_s18 }
  0x7c   : > { %857 = vrot.lane.b32.xlu0 %v840_v52, %s1665_s15 }
  0x7f   : > { %761 = vrot.lane.b32.xlu1 %v889_v43, %s1663_s24 }
  0x80   : > { %714 = vrot.lane.b32.xlu0 %v840_v52, %s1661_s10 }
  0x83   : > { %954 = vrot.lane.b32.xlu1 %v938_v53, %s1667_s17 }
  0x84   : > { %907 = vrot.lane.b32.xlu0 %v890_v44, %s1666_s18 }
  0x87   : > { %810 = vrot.lane.b32.xlu1 %v938_v53, %s1664_s8 }
  0x88   : > { %763 = vrot.lane.b32.xlu0 %v890_v44, %s1663_s24 }
  0x8b   : > { %1003 = vrot.lane.b32.xlu1 %v987_v60, %s1668_s9 }
  0x8c   : > { %956 = vrot.lane.b32.xlu0 %v939_v61, %s1667_s17 }
  0x8f   : > { %812 = vrot.lane.b32.xlu1 %v939_v61, %s1664_s8 }
  0x90   : > { %667 = vrot.lane.b32.xlu0 %v938_v53, %s1662_s20 }
  0x93   : > { %1005 = vrot.lane.b32.xlu1 %v988_v63, %s1668_s9 }
  0x94   : > { %859 = vrot.lane.b32.xlu0 %v987_v60, %s1665_s15 }
  0x97   : > { %716 = vrot.lane.b32.xlu1 %v987_v60, %s1661_s10 }
  0x98   : > { %669 = vrot.lane.b32.xlu0 %v939_v61, %s1662_s20 }
  0x9b   : > { %909 = vrot.lane.b32.xlu1 %v1875_v45, %s1666_s18 }
  0x9c   : > { %861 = vrot.lane.b32.xlu0 %v988_v63, %s1665_s15 }
  0x9f   : > { %765 = vrot.lane.b32.xlu1 %v1875_v45, %s1663_s24 }
  0xa0   : > { %718 = vrot.lane.b32.xlu0 %v988_v63, %s1661_s10 }
  0xa3   : > { %958 = vrot.lane.b32.xlu1 %v940_v0, %s1667_s17 }
  0xa4   : > { %911 = vrot.lane.b32.xlu0 %v1878_v46, %s1666_s18 }
  0xa7   : > { %814 = vrot.lane.b32.xlu1 %v940_v0, %s1664_s8 }
  0xa8   : > { %767 = vrot.lane.b32.xlu0 %v1878_v46, %s1663_s24 }
  0xab   : > { %1007 = vrot.lane.b32.xlu1 %v989_v3, %s1668_s9 }
  0xac   : > { %960 = vrot.lane.b32.xlu0 %v941_v4, %s1667_s17 }
  0xaf   : > { %816 = vrot.lane.b32.xlu1 %v941_v4, %s1664_s8 }
  0xb0   : > { %671 = vrot.lane.b32.xlu0 %v940_v0, %s1662_s20 }
  0xb3   : > { %1009 = vrot.lane.b32.xlu1 %v990_v5, %s1668_s9 }
  0xb4   : > { %863 = vrot.lane.b32.xlu0 %v989_v3, %s1665_s15 }
  0xb7   : > { %720 = vrot.lane.b32.xlu1 %v989_v3, %s1661_s10 }
  0xb8   : > { %673 = vrot.lane.b32.xlu0 %v941_v4, %s1662_s20 }
  0xbb   : > { %913 = vrot.lane.b32.xlu1 %v893_v6, %s1666_s18 }
  0xbc   : > { %865 = vrot.lane.b32.xlu0 %v990_v5, %s1665_s15 }
  0xbf   : > { %769 = vrot.lane.b32.xlu1 %v893_v6, %s1663_s24 }
  0xc0   : > { %722 = vrot.lane.b32.xlu0 %v990_v5, %s1661_s10 }
  0xc3   : > { %962 = vrot.lane.b32.xlu1 %v942_v8, %s1667_s17 }
  0xc4   : > { %915 = vrot.lane.b32.xlu0 %v894_v7, %s1666_s18 }
  0xc7   : > { %818 = vrot.lane.b32.xlu1 %v942_v8, %s1664_s8 }
  0xc8   : > { %771 = vrot.lane.b32.xlu0 %v894_v7, %s1663_s24 }
  0xcb   : > { %1011 = vrot.lane.b32.xlu1 %v991_v10, %s1668_s9 }
  0xcc   : > { %964 = vrot.lane.b32.xlu0 %v943_v9, %s1667_s17 }
  0xcf   : > { %867 = vrot.lane.b32.xlu1 %v991_v10, %s1665_s15 }
  0xd0   : > { %820 = vrot.lane.b32.xlu0 %v943_v9, %s1664_s8 }
  0xd3   : > { %869 = vrot.lane.b32.xlu1 %v992_v11, %s1665_s15 }
  0xd4   : > { %1013 = vrot.lane.b32.xlu0 %v992_v11, %s1668_s9 }
  0xd5   : > { %v709_v14 = vpop.permute.xlu1 %708 }
  0xd6   : > { %v660_v15 = vpop.permute.xlu0 %659 }
  0xd7   : > { %684 = vst.msk [vmem:[#allocation3] sm:$0xff] %vm683_vm3, %v660_v15  ;;  %919 = vrot.lane.b32.xlu1 %v896_v13, %s1666_s18 }
  0xd8   : > { %917 = vrot.lane.b32.xlu0 %v895_v12, %s1666_s18  ;;  %733 = vst.msk [vmem:[#allocation3] sm:$0xff] %vm732_vm4, %v709_v14 }
  0xd9   : > { %v711_v18 = vpop.permute.xlu1 %710 }
  0xda   : > { %v662_v19 = vpop.permute.xlu0 %661 }
  0xdb   : > { %685 = vst.msk [vmem:[#allocation3 + $0x8] sm:$0xff] %vm683_vm3, %v662_v19  ;;  %968 = vrot.lane.b32.xlu1 %v945_v17, %s1667_s17 }
  0xdc   : > { %966 = vrot.lane.b32.xlu0 %v944_v16, %s1667_s17  ;;  %734 = vst.msk [vmem:[#allocation3 + $0x8] sm:$0xff] %vm732_vm4, %v711_v18 }
  0xdd   : > { %v760_v22 = vpop.permute.xlu1 %759 }
  0xde   : > { %v758_v23 = vpop.permute.xlu0 %757  ;;  %783 = vst.msk [vmem:[#allocation3 + $0x8] sm:$0xff] %vm781_vm5, %v760_v22 }
  0xdf   : > { %782 = vst.msk [vmem:[#allocation3] sm:$0xff] %vm781_vm5, %v758_v23  ;;  %1017 = vrot.lane.b32.xlu1 %v994_v21, %s1668_s9 }
  0xe0   : > { %1015 = vrot.lane.b32.xlu0 %v993_v20, %s1668_s9 }
  0xe1   : > { %v664_v24 = vpop.permute.xlu1 %663 }
  0xe2   : > { %v807_v25 = vpop.permute.xlu0 %806  ;;  %686 = vst.msk [vmem:[#allocation3 + $0x10] sm:$0xff] %vm683_vm3, %v664_v24 }
  0xe3   : > { %831 = vst.msk [vmem:[#allocation3] sm:$0xff] %vm830_vm6, %v807_v25 }
  0xe5   : > { %v856_v26 = vpop.permute.xlu1 %855 }
  0xe6   : > { %v809_v27 = vpop.permute.xlu0 %808  ;;  %880 = vst.msk [vmem:[#allocation3] sm:$0xff] %vm879_vm7, %v856_v26 }
  0xe7   : > { %832 = vst.msk [vmem:[#allocation3 + $0x8] sm:$0xff] %vm830_vm6, %v809_v27 }
  0xe9   : > { %v713_v28 = vpop.permute.xlu1 %712 }
  0xea   : > { %v666_v29 = vpop.permute.xlu0 %665  ;;  %735 = vst.msk [vmem:[#allocation3 + $0x10] sm:$0xff] %vm732_vm4, %v713_v28 }
  0xeb   : > { %687 = vst.msk [vmem:[#allocation3 + $0x18] sm:$0xff] %vm683_vm3, %v666_v29 }
  0xed   : > { %v906_v30 = vpop.permute.xlu1 %905 }
  0xee   : > { %v858_v31 = vpop.permute.xlu0 %857  ;;  %930 = vst.msk [vmem:[#allocation3] sm:$0xff] %vm929_vm8, %v906_v30 }
  0xef   : > { %881 = vst.msk [vmem:[#allocation3 + $0x8] sm:$0xff] %vm879_vm7, %v858_v31 }
  0xf1   : > { %v762_v32 = vpop.permute.xlu1 %761 }
  0xf2   : > { %v715_v33 = vpop.permute.xlu0 %714  ;;  %784 = vst.msk [vmem:[#allocation3 + $0x10] sm:$0xff] %vm781_vm5, %v762_v32 }
  0xf3   : > { %736 = vst.msk [vmem:[#allocation3 + $0x18] sm:$0xff] %vm732_vm4, %v715_v33 }
  0xf5   : > { %v955_v34 = vpop.permute.xlu1 %954 }
  0xf6   : > { %v908_v35 = vpop.permute.xlu0 %907  ;;  %979 = vst.msk [vmem:[#allocation3] sm:$0xff] %vm978_vm9, %v955_v34 }
  0xf7   : > { %931 = vst.msk [vmem:[#allocation3 + $0x8] sm:$0xff] %vm929_vm8, %v908_v35 }
  0xf9   : > { %v811_v36 = vpop.permute.xlu1 %810 }
  0xfa   : > { %v764_v37 = vpop.permute.xlu0 %763  ;;  %833 = vst.msk [vmem:[#allocation3 + $0x10] sm:$0xff] %vm830_vm6, %v811_v36 }
  0xfb   : > { %785 = vst.msk [vmem:[#allocation3 + $0x18] sm:$0xff] %vm781_vm5, %v764_v37 }
  0xfd   : > { %v1004_v1 = vpop.permute.xlu1 %1003 }
  0xfe   : > { %v957_v2 = vpop.permute.xlu0 %956  ;;  %1028 = vst.msk [vmem:[#allocation3] sm:$0xff] %vm1027_vm10, %v1004_v1 }
  0xff   : > { %980 = vst.msk [vmem:[#allocation3 + $0x8] sm:$0xff] %vm978_vm9, %v957_v2 }
 0x101   : > { %v813_v38 = vpop.permute.xlu1 %812 }
 0x102   : > { %v668_v39 = vpop.permute.xlu0 %667  ;;  %834 = vst.msk [vmem:[#allocation3 + $0x18] sm:$0xff] %vm830_vm6, %v813_v38 }
 0x103   : > { %688 = vst.msk [vmem:[#allocation3 + $0x20] sm:$0xff] %vm683_vm3, %v668_v39 }
 0x105   : > { %v1006_v40 = vpop.permute.xlu1 %1005  ;;  %v1036_v42 = vld [vmem:[#allocation3] sm:$0xff] }
 0x106   : > { %v860_v41 = vpop.permute.xlu0 %859  ;;  %1029 = vst.msk [vmem:[#allocation3 + $0x8] sm:$0xff] %vm1027_vm10, %v1006_v40  ;;  %1517 = vmatprep.mubr.msk.f32.mxu0 %vm1049_vm11, %v1036_v42 }
 0x107   : > { %882 = vst.msk [vmem:[#allocation3 + $0x10] sm:$0xff] %vm879_vm7, %v860_v41 }
 0x109   : > { %v717_v43 = vpop.permute.xlu1 %716 }
 0x10a   : > { %v670_v44 = vpop.permute.xlu0 %669  ;;  %737 = vst.msk [vmem:[#allocation3 + $0x20] sm:$0xff] %vm732_vm4, %v717_v43 }
 0x10b   : > { %689 = vst.msk [vmem:[#allocation3 + $0x28] sm:$0xff] %vm683_vm3, %v670_v44 }
 0x10d   : > { %v910_v45 = vpop.permute.xlu1 %909  ;;  %v1037_v47 = vld [vmem:[#allocation3 + $0x8] sm:$0xff] }
 0x10e   : > { %v862_v46 = vpop.permute.xlu0 %861  ;;  %932 = vst.msk [vmem:[#allocation3 + $0x10] sm:$0xff] %vm929_vm8, %v910_v45  ;;  %1518 = vmatmul.mubr.msk.f32.vlgmr.msra.gmra.mrb[0].mxu0 %vm1049_vm11, %v1037_v47 }
 0x10f   : > { %883 = vst.msk [vmem:[#allocation3 + $0x18] sm:$0xff] %vm879_vm7, %v862_v46 }
 0x111   : > { %v766_v48 = vpop.permute.xlu1 %765 }
 0x112   : > { %v719_v49 = vpop.permute.xlu0 %718  ;;  %786 = vst.msk [vmem:[#allocation3 + $0x20] sm:$0xff] %vm781_vm5, %v766_v48 }
 0x113   : > { %738 = vst.msk [vmem:[#allocation3 + $0x28] sm:$0xff] %vm732_vm4, %v719_v49 }
 0x115   : > { %v959_v50 = vpop.permute.xlu1 %958 }
 0x116   : > { %v912_v51 = vpop.permute.xlu0 %911  ;;  %981 = vst.msk [vmem:[#allocation3 + $0x10] sm:$0xff] %vm978_vm9, %v959_v50 }
 0x117   : > { %933 = vst.msk [vmem:[#allocation3 + $0x18] sm:$0xff] %vm929_vm8, %v912_v51 }
 0x119   : > { %v815_v52 = vpop.permute.xlu1 %814 }
 0x11a   : > { %v768_v53 = vpop.permute.xlu0 %767  ;;  %835 = vst.msk [vmem:[#allocation3 + $0x20] sm:$0xff] %vm830_vm6, %v815_v52 }
 0x11b   : > { %787 = vst.msk [vmem:[#allocation3 + $0x28] sm:$0xff] %vm781_vm5, %v768_v53 }
 0x11d   : > { %v1008_v54 = vpop.permute.xlu1 %1007 }
 0x11e   : > { %v961_v55 = vpop.permute.xlu0 %960  ;;  %1030 = vst.msk [vmem:[#allocation3 + $0x10] sm:$0xff] %vm1027_vm10, %v1008_v54 }
 0x11f   : > { %982 = vst.msk [vmem:[#allocation3 + $0x18] sm:$0xff] %vm978_vm9, %v961_v55 }
 0x121   : > { %v817_v56 = vpop.permute.xlu1 %816 }
 0x122   : > { %v672_v57 = vpop.permute.xlu0 %671  ;;  %836 = vst.msk [vmem:[#allocation3 + $0x28] sm:$0xff] %vm830_vm6, %v817_v56 }
 0x123   : > { %690 = vst.msk [vmem:[#allocation3 + $0x30] sm:$0xff] %vm683_vm3, %v672_v57 }
 0x125   : > { %v1010_v58 = vpop.permute.xlu1 %1009  ;;  %v1038_v60 = vld [vmem:[#allocation3 + $0x10] sm:$0xff] }
 0x126   : > { %v864_v59 = vpop.permute.xlu0 %863  ;;  %1031 = vst.msk [vmem:[#allocation3 + $0x18] sm:$0xff] %vm1027_vm10, %v1010_v58  ;;  %1520 = vmatprep.mubr.msk.f32.mxu0 %vm1049_vm11, %v1038_v60 }
 0x127   : > { %884 = vst.msk [vmem:[#allocation3 + $0x20] sm:$0xff] %vm879_vm7, %v864_v59 }
 0x129   : > { %v721_v62 = vpop.permute.xlu1 %720 }
 0x12a   : > { %v674_v61 = vpop.permute.xlu0 %673  ;;  %739 = vst.msk [vmem:[#allocation3 + $0x30] sm:$0xff] %vm732_vm4, %v721_v62 }
 0x12b   : > { %691 = vst.msk [vmem:[#allocation3 + $0x38] sm:$0xff] %vm683_vm3, %v674_v61 }
 0x12d   : > { %v914_v0 = vpop.permute.xlu1 %913  ;;  %v1039_v3 = vld [vmem:[#allocation3 + $0x18] sm:$0xff] }
 0x12e   : > { %v866_v63 = vpop.permute.xlu0 %865  ;;  %934 = vst.msk [vmem:[#allocation3 + $0x20] sm:$0xff] %vm929_vm8, %v914_v0  ;;  %1521 = vmatmul.mubr.msk.f32.gmra.mrb[2].mxu0 %vm1049_vm11, %v1039_v3 }
 0x12f   : > { %885 = vst.msk [vmem:[#allocation3 + $0x28] sm:$0xff] %vm879_vm7, %v866_v63 }
 0x131   : > { %v770_v5 = vpop.permute.xlu1 %769 }
 0x132   : > { %v723_v4 = vpop.permute.xlu0 %722  ;;  %788 = vst.msk [vmem:[#allocation3 + $0x30] sm:$0xff] %vm781_vm5, %v770_v5 }
 0x133   : > { %740 = vst.msk [vmem:[#allocation3 + $0x38] sm:$0xff] %vm732_vm4, %v723_v4 }
 0x135   : > { %v963_v7 = vpop.permute.xlu1 %962 }
 0x136   : > { %v916_v6 = vpop.permute.xlu0 %915  ;;  %983 = vst.msk [vmem:[#allocation3 + $0x20] sm:$0xff] %vm978_vm9, %v963_v7 }
 0x137   : > { %935 = vst.msk [vmem:[#allocation3 + $0x28] sm:$0xff] %vm929_vm8, %v916_v6 }
 0x139   : > { %v819_v9 = vpop.permute.xlu1 %818 }
 0x13a   : > { %v772_v8 = vpop.permute.xlu0 %771  ;;  %837 = vst.msk [vmem:[#allocation3 + $0x30] sm:$0xff] %vm830_vm6, %v819_v9 }
 0x13b   : > { %789 = vst.msk [vmem:[#allocation3 + $0x38] sm:$0xff] %vm781_vm5, %v772_v8 }
 0x13d   : > { %v1012_v11 = vpop.permute.xlu1 %1011 }
 0x13e   : > { %v965_v10 = vpop.permute.xlu0 %964  ;;  %1032 = vst.msk [vmem:[#allocation3 + $0x20] sm:$0xff] %vm1027_vm10, %v1012_v11 }
 0x13f   : > { %984 = vst.msk [vmem:[#allocation3 + $0x28] sm:$0xff] %vm978_vm9, %v965_v10 }
 0x141   : > { %v868_v13 = vpop.permute.xlu1 %867 }
 0x142   : > { %v821_v12 = vpop.permute.xlu0 %820  ;;  %886 = vst.msk [vmem:[#allocation3 + $0x30] sm:$0xff] %vm879_vm7, %v868_v13 }
 0x143   : > { %838 = vst.msk [vmem:[#allocation3 + $0x38] sm:$0xff] %vm830_vm6, %v821_v12 }
 0x145   : > { %v870_v15 = vpop.permute.xlu1 %869  ;;  %v1040_v16 = vld [vmem:[#allocation3 + $0x20] sm:$0xff] }
 0x146   : > { %v1014_v14 = vpop.permute.xlu0 %1013  ;;  %887 = vst.msk [vmem:[#allocation3 + $0x38] sm:$0xff] %vm879_vm7, %v870_v15  ;;  %1523 = vmatprep.mubr.msk.f32.mxu1 %vm1049_vm11, %v1040_v16 }
 0x147   : > { %1033 = vst.msk [vmem:[#allocation3 + $0x28] sm:$0xff] %vm1027_vm10, %v1014_v14 }
 0x149   : > { %v920_v18 = vpop.permute.xlu1 %919 }
 0x14a   : > { %v918_v17 = vpop.permute.xlu0 %917  ;;  %937 = vst.msk [vmem:[#allocation3 + $0x38] sm:$0xff] %vm929_vm8, %v920_v18 }
 0x14b   : > { %936 = vst.msk [vmem:[#allocation3 + $0x30] sm:$0xff] %vm929_vm8, %v918_v17 }
 0x14d   : > { %v969_v20 = vpop.permute.xlu1 %968 }
 0x14e   : > { %v967_v19 = vpop.permute.xlu0 %966  ;;  %v1041_v21 = vld [vmem:[#allocation3 + $0x28] sm:$0xff]  ;;  %986 = vst.msk [vmem:[#allocation3 + $0x38] sm:$0xff] %vm978_vm9, %v969_v20 }
 0x14f   : > { %985 = vst.msk [vmem:[#allocation3 + $0x30] sm:$0xff] %vm978_vm9, %v967_v19  ;;  %1524 = vmatmul.mubr.msk.f32.vlgmr.msra.gmra.mrb[0].mxu1 %vm1049_vm11, %v1041_v21 }
 0x151   : > { %v1018_v23 = vpop.permute.xlu1 %1017 }
 0x152   : > { %v1016_v22 = vpop.permute.xlu0 %1015  ;;  %1035 = vst.msk [vmem:[#allocation3 + $0x38] sm:$0xff] %vm1027_vm10, %v1018_v23 }
 0x153   : > { %1034 = vst.msk [vmem:[#allocation3 + $0x30] sm:$0xff] %vm1027_vm10, %v1016_v22 }
 0x159   : > { %v1043_v25 = vld [vmem:[#allocation3 + $0x38] sm:$0xff] }
 0x15a   : > { %v1042_v24 = vld [vmem:[#allocation3 + $0x30] sm:$0xff] }
 0x15b   : > { %1526 = vmatprep.mubr.msk.f32.mxu1 %vm1049_vm11, %v1042_v24 }
 0x15c   : > { %1527 = vmatmul.mubr.msk.f32.gmra.mrb[2].mxu1 %vm1049_vm11, %v1043_v25 }
 0x1e1   : > { %v1519_v26 = vpop.f32.mrb[0].mxu0 }
 0x1e2   : > { %1184 = vst.msk [vmem:[%s1793_s14 + $0x8] sm:$0xff] %vm560_vm1, %v1519_v26  ;;  %v1192_v27 = vsel %vm560_vm1, %v1519_v26, 0.0  ;;  %v1214_v28 = vmul.f32 %v1519_v26, %v1519_v26  ;;  %v1144_v29 = vpop.f32.mrb[1].mxu0 }
 0x1e3   : > { %1183 = vst.msk [vmem:[%s1793_s14] sm:$0xff] %vm560_vm1, %v1144_v29  ;;  %v1191_v30 = vsel %vm560_vm1, %v1144_v29, 0.0  ;;  %v1213_v31 = vmul.f32 %v1144_v29, %v1144_v29 }
 0x1e4   : > { %v1222_v32 = vsel %vm560_vm1, %v1214_v28, 0.0  ;;  %v1193_v33 = vadd.f32 %v1192_v27, %v1191_v30 }
 0x1e5   : > { %v1221_v34 = vsel %vm560_vm1, %v1213_v31, 0.0 }
 0x1e6   : > { %v1223_v35 = vadd.f32 %v1222_v32, %v1221_v34 }
 0x201   : > { %v1522_v36 = vpop.f32.mrb[2].mxu0 }
 0x202   : > { %1186 = vst.msk [vmem:[%s1793_s14 + $0x18] sm:$0xff] %vm560_vm1, %v1522_v36  ;;  %v1154_v37 = vpop.f32.mrb[3].mxu0  ;;  %v1216_v1 = vmul.f32 %v1522_v36, %v1522_v36  ;;  %v1196_v40 = vsel %vm560_vm1, %v1522_v36, 0.0 }
 0x203   : > { %1185 = vst.msk [vmem:[%s1793_s14 + $0x10] sm:$0xff] %vm560_vm1, %v1154_v37  ;;  %v1194_v2 = vsel %vm560_vm1, %v1154_v37, 0.0  ;;  %v1215_v38 = vmul.f32 %v1154_v37, %v1154_v37 }
 0x204   : > { %v1195_v39 = vadd.f32 %v1194_v2, %v1193_v33  ;;  %v1226_v44 = vsel %vm560_vm1, %v1216_v1, 0.0 }
 0x205   : > { %v1224_v41 = vsel %vm560_vm1, %v1215_v38, 0.0 }
 0x206   : > { %v1197_v42 = vadd.f32 %v1196_v40, %v1195_v39  ;;  %v1225_v43 = vadd.f32 %v1224_v41, %v1223_v35 }
 0x208   : > { %v1227_v45 = vadd.f32 %v1226_v44, %v1225_v43 }
 0x222   : > { %v1525_v46 = vpop.f32.mrb[0].mxu1 }
 0x223   : > { %1188 = vst.msk [vmem:[%s1793_s14 + $0x28] sm:$0xff] %vm560_vm1, %v1525_v46  ;;  %v1164_v47 = vpop.f32.mrb[1].mxu1  ;;  %v1218_v48 = vmul.f32 %v1525_v46, %v1525_v46  ;;  %v1200_v52 = vsel %vm560_vm1, %v1525_v46, 0.0 }
 0x224   : > { %1187 = vst.msk [vmem:[%s1793_s14 + $0x20] sm:$0xff] %vm560_vm1, %v1164_v47  ;;  %v1198_v49 = vsel %vm560_vm1, %v1164_v47, 0.0  ;;  %v1217_v50 = vmul.f32 %v1164_v47, %v1164_v47 }
 0x225   : > { %v1199_v51 = vadd.f32 %v1198_v49, %v1197_v42  ;;  %v1230_v56 = vsel %vm560_vm1, %v1218_v48, 0.0 }
 0x226   : > { %v1228_v53 = vsel %vm560_vm1, %v1217_v50, 0.0 }
 0x227   : > { %v1229_v54 = vadd.f32 %v1228_v53, %v1227_v45  ;;  %v1201_v55 = vadd.f32 %v1200_v52, %v1199_v51 }
 0x229   : > { %v1231_v57 = vadd.f32 %v1230_v56, %v1229_v54 }
 0x22f   : > { %v1528_v58 = vpop.f32.mrb[2].mxu1 }
 0x230   : > { %1190 = vst.msk [vmem:[%s1793_s14 + $0x38] sm:$0xff] %vm560_vm1, %v1528_v58  ;;  %v1174_v59 = vpop.f32.mrb[3].mxu1  ;;  %v1220_v60 = vmul.f32 %v1528_v58, %v1528_v58  ;;  %v1204_v0 = vsel %vm560_vm1, %v1528_v58, 0.0 }
 0x231   : > { %1189 = vst.msk [vmem:[%s1793_s14 + $0x30] sm:$0xff] %vm560_vm1, %v1174_v59  ;;  %v1202_v61 = vsel %vm560_vm1, %v1174_v59, 0.0  ;;  %v1219_v62 = vmul.f32 %v1174_v59, %v1174_v59 }
 0x232   : > { %v1203_v63 = vadd.f32 %v1202_v61, %v1201_v55  ;;  %v1234_v6 = vsel %vm560_vm1, %v1220_v60, 0.0 }
 0x233   : > { %v1232_v3 = vsel %vm560_vm1, %v1219_v62, 0.0 }
 0x234   : > { %v1205_v4 = vadd.f32 %v1204_v0, %v1203_v63  ;;  %v1233_v5 = vadd.f32 %v1232_v3, %v1231_v57 }
 0x236   : > { %v1206_v7 = vrot.slane %v1205_v4, 4  ;;  %v1235_v8 = vadd.f32 %v1234_v6, %v1233_v5 }
 0x238   : > { %v1207_v9 = vadd.f32 %v1206_v7, %v1205_v4  ;;  %v1236_v10 = vrot.slane %v1235_v8, 4 }
 0x23a   : > { %v1208_v11 = vrot.slane %v1207_v9, 2  ;;  %v1237_v12 = vadd.f32 %v1236_v10, %v1235_v8 }
 0x23c   : > { %v1209_v13 = vadd.f32 %v1208_v11, %v1207_v9  ;;  %v1238_v14 = vrot.slane %v1237_v12, 2 }
 0x23e   : > { %v1210_v15 = vrot.slane %v1209_v13, 1  ;;  %v1239_v16 = vadd.f32 %v1238_v14, %v1237_v12 }
 0x240   : > { %v1211_v17 = vadd.f32 %v1210_v15, %v1209_v13  ;;  %v1240_v18 = vrot.slane %v1239_v16, 1 }
 0x242   : > { %1212 = vst.msk [vmem:[%s1833_s12] sm:$0x1] %vm470_vm0, %v1211_v17  ;;  %v1241_v19 = vadd.f32 %v1240_v18, %v1239_v16 }
 0x244   : > { %1242 = vst.msk [vmem:[%s1833_s12 + $0x1] sm:$0x1] %vm470_vm0, %v1241_v19 }
 0x245 PF: > { %s18_s28 = sadd.s32 1, %s1656_s28   ;;  %s2099_s14 = sld [smem:[#allocation4_spill]] }
 0x246   : > { %p15_p1 = scmp.ge.s32.totalorder %s18_s28, 10   ;;  %s2100_s10 = sld [smem:[#allocation5_spill]] }
 0x247   : > { %s2101_s24 = smov %s1648_s26  ;;  %s2102_s25 = smov %s1652_s27 }
 0x248   :  { %17 = sbr.rel (!%p15_p1) target bundleno = 3 (0x3), region = 112 }
 0x24b   : > { %s2103_s26 = smov %s2099_s14 }
 0x24c   : > { %s2104_s27 = smov %s2100_s10 }

</bundles_post_ra>
